<compile_context>
chip_gen: v7x
topology: tpu7x:2x2x1
jax: 0.10.0
libtpu: 0.0.40
codegen_flags: <defaults>
</compile_context>

<pallas_src>
import functools

import jax
import jax.numpy as jnp
from jax.experimental import pallas as pl
from jax.experimental.pallas import tpu as pltpu

EPS = 1e-5
LANE = 128


def _round_up(n, m=LANE):
    return ((n + m - 1) // m) * m


def _vmem_capacity_bytes():
    try:
        return int(pltpu.get_tpu_info().vmem_capacity_bytes)
    except Exception:
        return 64 << 20          # conservative fallback (v7x per-core VMEM)


# ----------------------------------------------------------------------------
# Pallas kernels
# ----------------------------------------------------------------------------
def _conv3x3_kernel(x_ref, w_ref, b_ref, s_ref, t_ref, o_ref, *,
                    block_h, hh, ww, cin, k_pad, fuse_input_affine):
    """One (block_h x ww) output strip of a 3x3 'same' conv, taps packed into K.

    x_ref : (H_eff+2, ww+2, c_hbm)  spatially padded bf16 image (batch dim squeezed);
                                    only the first `cin` channels are real.
    w_ref : (k_pad, cout_p)         bf16 weights, rows ordered (kw, kh, cin).
    b_ref : (1, cout_p)             conv bias (f32).
    s_ref : (1, cin)                fused input-affine scale (prev layer's folded BN).
    t_ref : (1, cin)                fused input-affine shift.
    o_ref : (block_h, ww, cout_p)   raw conv output strip (bf16).
    """
    wp = ww + 2
    cout_p = w_ref.shape[-1]

    h0 = pl.multiple_of(pl.program_id(1) * block_h, block_h)
    rows = x_ref[pl.ds(h0, block_h + 2), :, :][:, :, :cin].astype(jnp.float32)

    if fuse_input_affine:
        # Previous layer's BatchNorm + ReLU, applied to its raw conv output.
        scale = s_ref[...].reshape(1, 1, cin)
        shift = t_ref[...].reshape(1, 1, cin)
        act = jnp.maximum(rows * scale + shift, 0.0)
        # The zero spatial-padding ring (and the H tail pad) must stay zero *after*
        # the affine+ReLU (Conv2d pads the activation, not the raw pre-BN tensor).
        # Cheap rank-1 0/1 mask: (bh+2,1) row vector x (1,wp) col vector, applied as
        # a multiply on cin-channel data (relu output is finite and >= 0).
        r = jax.lax.broadcasted_iota(jnp.int32, (block_h + 2, 1), 0) + h0
        c = jax.lax.broadcasted_iota(jnp.int32, (1, wp), 1)
        row_ok = ((r >= 1) & (r <= hh)).astype(jnp.float32)
        col_ok = ((c >= 1) & (c <= ww)).astype(jnp.float32)
        rows = act * (row_ok * col_ok)[:, :, None]

    # In-kernel im2col with the 9 taps packed into the contraction dim:
    #   row (kh) shifts are free leading-dim slices; the 3 column (kw) shifts are the
    #   only sublane-misaligned copies and run at cin (not 128) lanes.
    rows3 = jnp.concatenate([rows[i:i + block_h] for i in range(3)], axis=-1)
    pieces = [rows3[:, j:j + ww, :] for j in range(3)]
    if k_pad > 9 * cin:
        pieces.append(jnp.zeros((block_h, ww, k_pad - 9 * cin), jnp.float32))
    lhs = (jnp.concatenate(pieces, axis=-1)
           .reshape(block_h * ww, k_pad)
           .astype(jnp.bfloat16))

    # Single MXU matmul per strip: (bh*ww, k_pad) x (k_pad, cout_p), f32 accumulation.
    acc = jnp.dot(lhs, w_ref[...], preferred_element_type=jnp.float32)
    acc = acc + b_ref[...]                                  # conv bias epilogue only
    o_ref[...] = acc.reshape(block_h, ww, cout_p).astype(o_ref.dtype)


def _affine_relu_kernel(x_ref, s_ref, b_ref, o_ref):
    x = x_ref[...].astype(jnp.float32)
    o_ref[...] = jnp.maximum(x * s_ref[...] + b_ref[...], 0.0).astype(o_ref.dtype)


# ----------------------------------------------------------------------------
# Wrappers around pallas_call
# ----------------------------------------------------------------------------
def _pick_block_h(hh, ww, cout_p, k_pad, *, target_m=512, strip_budget=4 << 20):
    """Output rows per strip: aim for MXU M = block_h*ww >= target_m, capped by a
    per-strip VMEM budget.  The caller pads H to a multiple of block_h, so block_h
    does NOT have to divide H (no silent block_h=1 cliff on prime H)."""
    bh = max(1, min(hh, -(-target_m // ww)))
    per_row = ww * (cout_p * 4 + k_pad * 6)          # acc (f32) + lhs (f32+bf16) temps
    while bh > 1 and bh * per_row > strip_budget:
        bh -= 1
    return bh


def conv3x3(x_nhwc, w_packed, bias, cin, in_scale=None, in_shift=None):
    """3x3 / stride 1 / pad 1 conv (+ bias) with taps packed into the contraction dim.

    x_nhwc   : (N, H, W, c_hbm) bf16; only the first `cin` channels are real (c_hbm may
               be the previous layer's lane-padded output width).
    w_packed : (k_pad, cout_p) bf16, rows ordered (kw, kh, cin), zero-padded.
    bias     : (cout_p,) f32.
    in_scale / in_shift : optional (cin,) f32 — previous layer's folded BN+ReLU,
               applied to the input inside the kernel (saves an HBM round trip).
    Returns the RAW conv output (N, H, W, cout_p) in bf16 (its own BN not applied yet).
    """
    n, hh, ww, c_hbm = x_nhwc.shape
    k_pad, cout_p = w_packed.shape
    assert cout_p % LANE == 0 and cin <= c_hbm and k_pad >= 9 * cin

    fuse = in_scale is not None
    if not fuse:
        in_scale = jnp.zeros((cin,), jnp.float32)
        in_shift = jnp.zeros((cin,), jnp.float32)

    block_h = _pick_block_h(hh, ww, cout_p, k_pad)
    hh_eff = _round_up(hh, block_h)
    n_strips = hh_eff // block_h

    # Zero ring for 'same' padding, plus tail rows so block_h always divides H.
    x_pad = jnp.pad(x_nhwc, ((0, 0), (1, 1 + hh_eff - hh), (1, 1), (0, 0)))

    kernel = functools.partial(_conv3x3_kernel, block_h=block_h, hh=hh, ww=ww,
                               cin=cin, k_pad=k_pad, fuse_input_affine=fuse)

    # VMEM budget: double-buffered image/weight/output blocks + in-kernel temporaries.
    x_img = (hh_eff + 2) * (ww + 2) * c_hbm * 2
    w_buf = k_pad * cout_p * 2
    o_blk = block_h * ww * cout_p * 2
    tmp = block_h * ww * (k_pad * 6 + cout_p * 4) + (block_h + 2) * (ww + 2) * cin * 8
    need = 2 * (x_img + w_buf + o_blk) + tmp + (1 << 20)

    cap = _vmem_capacity_bytes()
    hard_cap = min(100 << 20, int(cap * 0.8))        # headroom: never the full VMEM
    vmem_limit = int(min(hard_cap, max(2 * need, 32 << 20)))

    cost = pl.CostEstimate(
        flops=2 * n * hh_eff * ww * k_pad * cout_p,
        transcendentals=0,
        bytes_accessed=int(x_pad.size) * 2 + int(w_packed.size) * 2
        + n * hh_eff * ww * cout_p * 2,
    )

    out = pl.pallas_call(
        kernel,
        out_shape=jax.ShapeDtypeStruct((n, hh_eff, ww, cout_p), jnp.bfloat16),
        grid=(n, n_strips),
        in_specs=[
            # Whole padded image of batch element `bi` stays VMEM-resident across the
            # strip axis (DMA'd once per image); strips slice it in-kernel with pl.ds.
            pl.BlockSpec((None, hh_eff + 2, ww + 2, c_hbm), lambda bi, hi: (bi, 0, 0, 0)),
            pl.BlockSpec((k_pad, cout_p), lambda bi, hi: (0, 0)),
            pl.BlockSpec((1, cout_p), lambda bi, hi: (0, 0)),
            pl.BlockSpec((1, cin), lambda bi, hi: (0, 0)),
            pl.BlockSpec((1, cin), lambda bi, hi: (0, 0)),
        ],
        out_specs=pl.BlockSpec((None, block_h, ww, cout_p), lambda bi, hi: (bi, hi, 0, 0)),
        compiler_params=pltpu.CompilerParams(
            dimension_semantics=("parallel", "parallel"),   # disjoint strips: both TCs
            vmem_limit_bytes=vmem_limit,
        ),
        cost_estimate=cost,
    )(x_pad, w_packed, bias.reshape(1, cout_p),
      in_scale.reshape(1, cin), in_shift.reshape(1, cin))

    return out[:, :hh]


def affine_relu(x2d, scale, shift, *, block_m=1024):
    """relu(x * scale + shift) over (M, Cpad) rows; lane-dense, HBM-bandwidth bound."""
    m, c = x2d.shape
    block_m = min(block_m, m)
    return pl.pallas_call(
        _affine_relu_kernel,
        out_shape=jax.ShapeDtypeStruct((m, c), jnp.float32),
        grid=(pl.cdiv(m, block_m),),
        in_specs=[
            pl.BlockSpec((block_m, c), lambda i: (i, 0)),
            pl.BlockSpec((1, c), lambda i: (0, 0)),
            pl.BlockSpec((1, c), lambda i: (0, 0)),
        ],
        out_specs=pl.BlockSpec((block_m, c), lambda i: (i, 0)),
        compiler_params=pltpu.CompilerParams(dimension_semantics=("parallel",)),
    )(x2d, scale.reshape(1, c), shift.reshape(1, c))


def _bn_scale_shift(z, gamma, beta):
    """Fold training-mode BatchNorm (biased batch variance, like PyTorch) to scale/shift."""
    # TODO(synk): this tiny per-channel batch-statistic reduction stays in XLA glue;
    # folding it into the conv kernel would force the parallel grid axes to serialize.
    zf = z.astype(jnp.float32)
    mu = jnp.mean(zf, axis=(0, 1, 2))
    var = jnp.mean(jnp.square(zf - mu), axis=(0, 1, 2))
    scale = gamma * jax.lax.rsqrt(var + EPS)
    return scale, beta - mu * scale


def _pack_conv_params(w_hwio, b, cout_p):
    """Pack 3x3 HWIO weights to (k_pad, cout_p) with rows ordered (kw, kh, cin),
    matching the kernel's tap-concatenation order, zero-padded on both dims."""
    kh, kw, cin, cout = w_hwio.shape
    k = kh * kw * cin
    k_pad = _round_up(k, 8)
    wt = jnp.transpose(w_hwio, (1, 0, 2, 3)).reshape(k, cout)
    wt = jnp.pad(wt, ((0, k_pad - k), (0, cout_p - cout))).astype(jnp.bfloat16)
    bp = jnp.pad(b, (0, cout_p - cout)).astype(jnp.float32)
    return wt, bp


# ----------------------------------------------------------------------------
# `Conv` module forward (Conv2d -> BN -> ReLU -> Conv2d -> BN -> ReLU), NCHW boundary
# ----------------------------------------------------------------------------
def conv_forward(x_nchw, params):
    w1, b1, g1, be1 = params["layer1"]
    w2, b2, g2, be2 = params["layer2"]
    n, cin, hh, ww = x_nchw.shape
    cmid, cout = w1.shape[-1], w2.shape[-1]
    cmid_p, cout_p = _round_up(cmid), _round_up(cout)

    x = jnp.transpose(x_nchw, (0, 2, 3, 1)).astype(jnp.bfloat16)     # NCHW -> NHWC, bf16

    w1p, b1p = _pack_conv_params(w1, b1, cmid_p)
    w2p, b2p = _pack_conv_params(w2, b2, cout_p)
    g1p, be1p = (jnp.pad(v, (0, cmid_p - cmid)) for v in (g1, be1))
    g2p, be2p = (jnp.pad(v, (0, cout_p - cout)) for v in (g2, be2))

    z1 = conv3x3(x, w1p, b1p, cin)                                   # raw Conv2d #1
    s1, t1 = _bn_scale_shift(z1, g1p, be1p)                          # fold BN1 (batch stats)
    z2 = conv3x3(z1, w2p, b2p, cmid,
                 in_scale=s1[:cmid], in_shift=t1[:cmid])             # BN1+ReLU fused into conv2
    s2, t2 = _bn_scale_shift(z2, g2p, be2p)                          # fold BN2
    y = affine_relu(z2.reshape(n * hh * ww, cout_p), s2, t2)         # final BN2 + ReLU (f32)
    y = y.reshape(n, hh, ww, cout_p)[..., :cout]
    return jnp.transpose(y, (0, 3, 1, 2))                            # back to NCHW


# ----------------------------------------------------------------------------
# Parameter init (deterministic, synthetic) and pure-JAX reference
# ----------------------------------------------------------------------------
def init_conv_params(key, in_channels, out_channels, mid_channels=None):
    if mid_channels is None:
        mid_channels = out_channels
    k = jax.random.split(key, 8)

    def conv_init(kw, kb, cin, cout):
        w = 0.1 * jax.random.normal(kw, (3, 3, cin, cout), jnp.float32)   # HWIO
        b = 0.01 * jax.random.normal(kb, (cout,), jnp.float32)
        return w, b

    def bn_init(kg, kb, c):
        gamma = 1.0 + 0.05 * jax.random.normal(kg, (c,), jnp.float32)
        beta = 0.01 * jax.random.normal(kb, (c,), jnp.float32)
        return gamma, beta

    w1, b1 = conv_init(k[0], k[1], in_channels, mid_channels)
    g1, be1 = bn_init(k[2], k[3], mid_channels)
    w2, b2 = conv_init(k[4], k[5], mid_channels, out_channels)
    g2, be2 = bn_init(k[6], k[7], out_channels)
    return {"layer1": (w1, b1, g1, be1), "layer2": (w2, b2, g2, be2)}


def reference_forward(x_nchw, params):
    """Pure-JAX f32 reference of the same module, for a correctness check."""
    w1, b1, g1, be1 = params["layer1"]
    w2, b2, g2, be2 = params["layer2"]

    def conv(x, w, b):
        y = jax.lax.conv_general_dilated(x, w, (1, 1), ((1, 1), (1, 1)),
                                         dimension_numbers=("NHWC", "HWIO", "NHWC"))
        return y + b

    def bn_relu(z, gamma, beta):
        mu = jnp.mean(z, axis=(0, 1, 2))
        var = jnp.mean(jnp.square(z - mu), axis=(0, 1, 2))
        return jnp.maximum((z - mu) * jax.lax.rsqrt(var + EPS) * gamma + beta, 0.0)

    x = jnp.transpose(x_nchw, (0, 2, 3, 1))
    r1 = bn_relu(conv(x, w1, b1), g1, be1)
    out = bn_relu(conv(r1, w2, b2), g2, be2)
    return jnp.transpose(out, (0, 3, 1, 2))


# ----------------------------------------------------------------------------
if __name__ == "__main__":
    batch, in_channels, out_channels, spatial = 2, 4, 8, 16

    key = jax.random.PRNGKey(0)
    k_param, k_input = jax.random.split(key)
    params = init_conv_params(k_param, in_channels, out_channels)
    x = jax.random.normal(k_input, (batch, in_channels, spatial, spatial), jnp.float32)

    fwd = jax.jit(conv_forward)
    out = fwd(x, params)
    jax.block_until_ready(out)

    assert out.shape == (batch, out_channels, spatial, spatial)
    assert out.dtype == jnp.float32

    # Correctness vs. pure-JAX f32 reference (bf16 activations/weights -> ~1e-2 abs error).
    ref = reference_forward(x, params)
    err = jnp.max(jnp.abs(out - ref))
    assert bool(jnp.isfinite(err)) and float(err) < 0.1, f"max |err| = {float(err)}"

    print("KERNEL_OK")
</pallas_src>

<mosaic_0001>
module attributes {stable_mosaic.version = 11 : i64} {
  func.func @_conv3x3_kernel(%arg0: i32, %arg1: i32, %arg2: memref<1x18x18x4xbf16, #tpu.memory_space<vmem>>, %arg3: memref<40x128xbf16, #tpu.memory_space<vmem>>, %arg4: memref<1x128xf32, #tpu.memory_space<vmem>>, %arg5: memref<1x4xf32, #tpu.memory_space<vmem>>, %arg6: memref<1x4xf32, #tpu.memory_space<vmem>>, %arg7: memref<1x16x16x128xbf16, #tpu.memory_space<vmem>>) attributes {dimension_semantics = [#tpu.dimension_semantics<parallel>, #tpu.dimension_semantics<parallel>], iteration_bounds = array<i64: 2, 1>, scalar_prefetch = 0 : i64, scratch_operands = 0 : i64, tpu.core_type = #tpu.core_type<tc>, window_params = [{transform_indices = @transform_0, window_bounds = array<i64: 1, 18, 18, 4>}, {pipeline_mode = #tpu.pipeline_mode<synchronous>, transform_indices = @transform_1, window_bounds = array<i64: 40, 128>}, {pipeline_mode = #tpu.pipeline_mode<synchronous>, transform_indices = @transform_2, window_bounds = array<i64: 1, 128>}, {pipeline_mode = #tpu.pipeline_mode<synchronous>, transform_indices = @transform_3, window_bounds = array<i64: 1, 4>}, {pipeline_mode = #tpu.pipeline_mode<synchronous>, transform_indices = @transform_4, window_bounds = array<i64: 1, 4>}, {transform_indices = @transform_5, window_bounds = array<i64: 1, 16, 16, 128>}]} {
    %c16_i32 = arith.constant 16 : i32
    %0 = arith.muli %arg1, %c16_i32 : i32
    %1 = tpu.assume_multiple %0, 16 : i32
    %c0 = arith.constant 0 : index
    %2 = arith.index_cast %1 : i32 to index
    %c0_0 = arith.constant 0 : index
    %c0_1 = arith.constant 0 : index
    %3 = vector.load %arg2[%c0, %2, %c0_0, %c0_1] : memref<1x18x18x4xbf16, #tpu.memory_space<vmem>>, vector<1x18x18x4xbf16>
    %4 = vector.shape_cast %3 : vector<1x18x18x4xbf16> to vector<18x18x4xbf16>
    %5 = arith.extf %4 : vector<18x18x4xbf16> to vector<18x18x4xf32>
    %6 = vector.extract_strided_slice %5 {offsets = [0, 0, 0], sizes = [16, 18, 4], strides = [1, 1, 1]} : vector<18x18x4xf32> to vector<16x18x4xf32>
    %7 = vector.extract_strided_slice %5 {offsets = [1, 0, 0], sizes = [16, 18, 4], strides = [1, 1, 1]} : vector<18x18x4xf32> to vector<16x18x4xf32>
    %8 = vector.extract_strided_slice %5 {offsets = [2, 0, 0], sizes = [16, 18, 4], strides = [1, 1, 1]} : vector<18x18x4xf32> to vector<16x18x4xf32>
    %9 = tpu.concatenate %6, %7, %8 in 2 : vector<16x18x4xf32>, vector<16x18x4xf32>, vector<16x18x4xf32> -> vector<16x18x12xf32>
    %10 = vector.extract_strided_slice %9 {offsets = [0, 0, 0], sizes = [16, 16, 12], strides = [1, 1, 1]} : vector<16x18x12xf32> to vector<16x16x12xf32>
    %11 = vector.extract_strided_slice %9 {offsets = [0, 1, 0], sizes = [16, 16, 12], strides = [1, 1, 1]} : vector<16x18x12xf32> to vector<16x16x12xf32>
    %12 = vector.extract_strided_slice %9 {offsets = [0, 2, 0], sizes = [16, 16, 12], strides = [1, 1, 1]} : vector<16x18x12xf32> to vector<16x16x12xf32>
    %cst = arith.constant 0.000000e+00 : f32
    %13 = vector.broadcast %cst : f32 to vector<16x16x4xf32>
    %14 = tpu.concatenate %10, %11, %12, %13 in 2 : vector<16x16x12xf32>, vector<16x16x12xf32>, vector<16x16x12xf32>, vector<16x16x4xf32> -> vector<16x16x40xf32>
    %15 = vector.shape_cast %14 : vector<16x16x40xf32> to vector<256x40xf32>
    %16 = arith.truncf %15 : vector<256x40xf32> to vector<256x40xbf16>
    %c0_2 = arith.constant 0 : index
    %c0_3 = arith.constant 0 : index
    %17 = vector.load %arg3[%c0_2, %c0_3] : memref<40x128xbf16, #tpu.memory_space<vmem>>, vector<40x128xbf16>
    %cst_4 = arith.constant dense<0.000000e+00> : vector<256x128xf32>
    %18 = tpu.matmul %16, %17, %cst_4 {dimension_numbers = #tpu.dot_dimension_numbers<[1], [0], [0], [1], [0, 0, 1, 1], [], []>} : vector<256x40xbf16>, vector<40x128xbf16>, vector<256x128xf32> -> vector<256x128xf32>
    %c0_5 = arith.constant 0 : index
    %c0_6 = arith.constant 0 : index
    %19 = vector.load %arg4[%c0_5, %c0_6] : memref<1x128xf32, #tpu.memory_space<vmem>>, vector<1x128xf32>
    %20 = vector.broadcast %19 : vector<1x128xf32> to vector<256x128xf32>
    %21 = arith.addf %18, %20 : vector<256x128xf32>
    %22 = vector.shape_cast %21 : vector<256x128xf32> to vector<16x16x128xf32>
    %23 = arith.truncf %22 : vector<16x16x128xf32> to vector<16x16x128xbf16>
    %c0_7 = arith.constant 0 : index
    %c0_8 = arith.constant 0 : index
    %c0_9 = arith.constant 0 : index
    %c0_10 = arith.constant 0 : index
    %24 = vector.load %arg7[%c0_7, %c0_8, %c0_9, %c0_10] : memref<1x16x16x128xbf16, #tpu.memory_space<vmem>>, vector<1x16x16x128xbf16>
    %25 = vector.shape_cast %24 : vector<1x16x16x128xbf16> to vector<16x16x128xbf16>
    %26 = vector.shape_cast %23 : vector<16x16x128xbf16> to vector<1x16x16x128xbf16>
    tpu.vector_store %arg7[%c0_7, %c0_8, %c0_9, %c0_10], %26 {strides = array<i32>} : memref<1x16x16x128xbf16, #tpu.memory_space<vmem>>, vector<1x16x16x128xbf16>,
    return
  }
  func.func @transform_0(%arg0: i32, %arg1: i32) -> (i32, i32, i32, i32) {
    %c0_i32 = arith.constant 0 : i32
    %c0_i32_0 = arith.constant 0 : i32
    %c0_i32_1 = arith.constant 0 : i32
    %c0_i32_2 = arith.constant 0 : i32
    return %arg0, %c0_i32, %c0_i32_0, %c0_i32_1 : i32, i32, i32, i32
  }
  func.func @transform_1(%arg0: i32, %arg1: i32) -> (i32, i32) {
    %c0_i32 = arith.constant 0 : i32
    %c0_i32_0 = arith.constant 0 : i32
    %c0_i32_1 = arith.constant 0 : i32
    return %c0_i32, %c0_i32_0 : i32, i32
  }
  func.func @transform_2(%arg0: i32, %arg1: i32) -> (i32, i32) {
    %c0_i32 = arith.constant 0 : i32
    %c0_i32_0 = arith.constant 0 : i32
    %c0_i32_1 = arith.constant 0 : i32
    return %c0_i32, %c0_i32_0 : i32, i32
  }
  func.func @transform_3(%arg0: i32, %arg1: i32) -> (i32, i32) {
    %c0_i32 = arith.constant 0 : i32
    %c0_i32_0 = arith.constant 0 : i32
    %c0_i32_1 = arith.constant 0 : i32
    return %c0_i32, %c0_i32_0 : i32, i32
  }
  func.func @transform_4(%arg0: i32, %arg1: i32) -> (i32, i32) {
    %c0_i32 = arith.constant 0 : i32
    %c0_i32_0 = arith.constant 0 : i32
    %c0_i32_1 = arith.constant 0 : i32
    return %c0_i32, %c0_i32_0 : i32, i32
  }
  func.func @transform_5(%arg0: i32, %arg1: i32) -> (i32, i32, i32, i32) {
    %c0_i32 = arith.constant 0 : i32
    %c0_i32_0 = arith.constant 0 : i32
    %c0_i32_1 = arith.constant 0 : i32
    return %arg0, %arg1, %c0_i32, %c0_i32_0 : i32, i32, i32, i32
  }
}

module attributes {stable_mosaic.version = 11 : i64} {
  func.func @_conv3x3_kernel(%arg0: i32, %arg1: i32, %arg2: memref<1x18x18x128xbf16, #tpu.memory_space<vmem>>, %arg3: memref<72x128xbf16, #tpu.memory_space<vmem>>, %arg4: memref<1x128xf32, #tpu.memory_space<vmem>>, %arg5: memref<1x8xf32, #tpu.memory_space<vmem>>, %arg6: memref<1x8xf32, #tpu.memory_space<vmem>>, %arg7: memref<1x16x16x128xbf16, #tpu.memory_space<vmem>>) attributes {dimension_semantics = [#tpu.dimension_semantics<parallel>, #tpu.dimension_semantics<parallel>], iteration_bounds = array<i64: 2, 1>, scalar_prefetch = 0 : i64, scratch_operands = 0 : i64, tpu.core_type = #tpu.core_type<tc>, window_params = [{transform_indices = @transform_0, window_bounds = array<i64: 1, 18, 18, 128>}, {pipeline_mode = #tpu.pipeline_mode<synchronous>, transform_indices = @transform_1, window_bounds = array<i64: 72, 128>}, {pipeline_mode = #tpu.pipeline_mode<synchronous>, transform_indices = @transform_2, window_bounds = array<i64: 1, 128>}, {pipeline_mode = #tpu.pipeline_mode<synchronous>, transform_indices = @transform_3, window_bounds = array<i64: 1, 8>}, {pipeline_mode = #tpu.pipeline_mode<synchronous>, transform_indices = @transform_4, window_bounds = array<i64: 1, 8>}, {transform_indices = @transform_5, window_bounds = array<i64: 1, 16, 16, 128>}]} {
    %c16_i32 = arith.constant 16 : i32
    %0 = arith.muli %arg1, %c16_i32 : i32
    %1 = tpu.assume_multiple %0, 16 : i32
    %c0 = arith.constant 0 : index
    %2 = arith.index_cast %1 : i32 to index
    %c0_0 = arith.constant 0 : index
    %c0_1 = arith.constant 0 : index
    %3 = vector.load %arg2[%c0, %2, %c0_0, %c0_1] : memref<1x18x18x128xbf16, #tpu.memory_space<vmem>>, vector<1x18x18x128xbf16>
    %4 = vector.shape_cast %3 : vector<1x18x18x128xbf16> to vector<18x18x128xbf16>
    %5 = vector.extract_strided_slice %4 {offsets = [0, 0, 0], sizes = [18, 18, 8], strides = [1, 1, 1]} : vector<18x18x128xbf16> to vector<18x18x8xbf16>
    %6 = arith.extf %5 : vector<18x18x8xbf16> to vector<18x18x8xf32>
    %c0_2 = arith.constant 0 : index
    %c0_3 = arith.constant 0 : index
    %7 = vector.load %arg5[%c0_2, %c0_3] : memref<1x8xf32, #tpu.memory_space<vmem>>, vector<1x8xf32>
    %8 = vector.shape_cast %7 : vector<1x8xf32> to vector<1x1x8xf32>
    %c0_4 = arith.constant 0 : index
    %c0_5 = arith.constant 0 : index
    %9 = vector.load %arg6[%c0_4, %c0_5] : memref<1x8xf32, #tpu.memory_space<vmem>>, vector<1x8xf32>
    %10 = vector.shape_cast %9 : vector<1x8xf32> to vector<1x1x8xf32>
    %11 = vector.broadcast %8 : vector<1x1x8xf32> to vector<18x18x8xf32>
    %12 = arith.mulf %6, %11 : vector<18x18x8xf32>
    %13 = vector.broadcast %10 : vector<1x1x8xf32> to vector<18x18x8xf32>
    %14 = arith.addf %12, %13 : vector<18x18x8xf32>
    %cst = arith.constant 0.000000e+00 : f32
    %15 = vector.broadcast %cst : f32 to vector<18x18x8xf32>
    %16 = arith.maximumf %14, %15 : vector<18x18x8xf32>
    %17 = tpu.iota {dimensions = array<i32: 0>} : vector<18x1xi32>
    %18 = vector.broadcast %1 : i32 to vector<18x1xi32>
    %19 = arith.addi %17, %18 : vector<18x1xi32>
    %20 = tpu.iota {dimensions = array<i32: 1>} : vector<1x18xi32>
    %c1_i32 = arith.constant 1 : i32
    %21 = vector.broadcast %c1_i32 : i32 to vector<18x1xi32>
    %22 = arith.cmpi sge, %19, %21 : vector<18x1xi32>
    %c16_i32_6 = arith.constant 16 : i32
    %23 = vector.broadcast %c16_i32_6 : i32 to vector<18x1xi32>
    %24 = arith.cmpi sle, %19, %23 : vector<18x1xi32>
    %25 = arith.andi %22, %24 : vector<18x1xi1>
    %26 = arith.extui %25 : vector<18x1xi1> to vector<18x1xi32>
    %27 = arith.sitofp %26 : vector<18x1xi32> to vector<18x1xf32>
    %c1_i32_7 = arith.constant 1 : i32
    %28 = vector.broadcast %c1_i32_7 : i32 to vector<1x18xi32>
    %29 = arith.cmpi sge, %20, %28 : vector<1x18xi32>
    %c16_i32_8 = arith.constant 16 : i32
    %30 = vector.broadcast %c16_i32_8 : i32 to vector<1x18xi32>
    %31 = arith.cmpi sle, %20, %30 : vector<1x18xi32>
    %32 = arith.andi %29, %31 : vector<1x18xi1>
    %33 = arith.extui %32 : vector<1x18xi1> to vector<1x18xi32>
    %34 = arith.sitofp %33 : vector<1x18xi32> to vector<1x18xf32>
    %35 = vector.broadcast %27 : vector<18x1xf32> to vector<18x18xf32>
    %36 = vector.broadcast %34 : vector<1x18xf32> to vector<18x18xf32>
    %37 = arith.mulf %35, %36 : vector<18x18xf32>
    %38 = vector.shape_cast %37 : vector<18x18xf32> to vector<18x18x1xf32>
    %39 = vector.broadcast %38 : vector<18x18x1xf32> to vector<18x18x8xf32>
    %40 = arith.mulf %16, %39 : vector<18x18x8xf32>
    %41 = vector.extract_strided_slice %40 {offsets = [0, 0, 0], sizes = [16, 18, 8], strides = [1, 1, 1]} : vector<18x18x8xf32> to vector<16x18x8xf32>
    %42 = vector.extract_strided_slice %40 {offsets = [1, 0, 0], sizes = [16, 18, 8], strides = [1, 1, 1]} : vector<18x18x8xf32> to vector<16x18x8xf32>
    %43 = vector.extract_strided_slice %40 {offsets = [2, 0, 0], sizes = [16, 18, 8], strides = [1, 1, 1]} : vector<18x18x8xf32> to vector<16x18x8xf32>
    %44 = tpu.concatenate %41, %42, %43 in 2 : vector<16x18x8xf32>, vector<16x18x8xf32>, vector<16x18x8xf32> -> vector<16x18x24xf32>
    %45 = vector.extract_strided_slice %44 {offsets = [0, 0, 0], sizes = [16, 16, 24], strides = [1, 1, 1]} : vector<16x18x24xf32> to vector<16x16x24xf32>
    %46 = vector.extract_strided_slice %44 {offsets = [0, 1, 0], sizes = [16, 16, 24], strides = [1, 1, 1]} : vector<16x18x24xf32> to vector<16x16x24xf32>
    %47 = vector.extract_strided_slice %44 {offsets = [0, 2, 0], sizes = [16, 16, 24], strides = [1, 1, 1]} : vector<16x18x24xf32> to vector<16x16x24xf32>
    %48 = tpu.concatenate %45, %46, %47 in 2 : vector<16x16x24xf32>, vector<16x16x24xf32>, vector<16x16x24xf32> -> vector<16x16x72xf32>
    %49 = vector.shape_cast %48 : vector<16x16x72xf32> to vector<256x72xf32>
    %50 = arith.truncf %49 : vector<256x72xf32> to vector<256x72xbf16>
    %c0_9 = arith.constant 0 : index
    %c0_10 = arith.constant 0 : index
    %51 = vector.load %arg3[%c0_9, %c0_10] : memref<72x128xbf16, #tpu.memory_space<vmem>>, vector<72x128xbf16>
    %cst_11 = arith.constant dense<0.000000e+00> : vector<256x128xf32>
    %52 = tpu.matmul %50, %51, %cst_11 {dimension_numbers = #tpu.dot_dimension_numbers<[1], [0], [0], [1], [0, 0, 1, 1], [], []>} : vector<256x72xbf16>, vector<72x128xbf16>, vector<256x128xf32> -> vector<256x128xf32>
    %c0_12 = arith.constant 0 : index
    %c0_13 = arith.constant 0 : index
    %53 = vector.load %arg4[%c0_12, %c0_13] : memref<1x128xf32, #tpu.memory_space<vmem>>, vector<1x128xf32>
    %54 = vector.broadcast %53 : vector<1x128xf32> to vector<256x128xf32>
    %55 = arith.addf %52, %54 : vector<256x128xf32>
    %56 = vector.shape_cast %55 : vector<256x128xf32> to vector<16x16x128xf32>
    %57 = arith.truncf %56 : vector<16x16x128xf32> to vector<16x16x128xbf16>
    %c0_14 = arith.constant 0 : index
    %c0_15 = arith.constant 0 : index
    %c0_16 = arith.constant 0 : index
    %c0_17 = arith.constant 0 : index
    %58 = vector.load %arg7[%c0_14, %c0_15, %c0_16, %c0_17] : memref<1x16x16x128xbf16, #tpu.memory_space<vmem>>, vector<1x16x16x128xbf16>
    %59 = vector.shape_cast %58 : vector<1x16x16x128xbf16> to vector<16x16x128xbf16>
    %60 = vector.shape_cast %57 : vector<16x16x128xbf16> to vector<1x16x16x128xbf16>
    tpu.vector_store %arg7[%c0_14, %c0_15, %c0_16, %c0_17], %60 {strides = array<i32>} : memref<1x16x16x128xbf16, #tpu.memory_space<vmem>>, vector<1x16x16x128xbf16>,
    return
  }
  func.func @transform_0(%arg0: i32, %arg1: i32) -> (i32, i32, i32, i32) {
    %c0_i32 = arith.constant 0 : i32
    %c0_i32_0 = arith.constant 0 : i32
    %c0_i32_1 = arith.constant 0 : i32
    %c0_i32_2 = arith.constant 0 : i32
    return %arg0, %c0_i32, %c0_i32_0, %c0_i32_1 : i32, i32, i32, i32
  }
  func.func @transform_1(%arg0: i32, %arg1: i32) -> (i32, i32) {
    %c0_i32 = arith.constant 0 : i32
    %c0_i32_0 = arith.constant 0 : i32
    %c0_i32_1 = arith.constant 0 : i32
    return %c0_i32, %c0_i32_0 : i32, i32
  }
  func.func @transform_2(%arg0: i32, %arg1: i32) -> (i32, i32) {
    %c0_i32 = arith.constant 0 : i32
    %c0_i32_0 = arith.constant 0 : i32
    %c0_i32_1 = arith.constant 0 : i32
    return %c0_i32, %c0_i32_0 : i32, i32
  }
  func.func @transform_3(%arg0: i32, %arg1: i32) -> (i32, i32) {
    %c0_i32 = arith.constant 0 : i32
    %c0_i32_0 = arith.constant 0 : i32
    %c0_i32_1 = arith.constant 0 : i32
    return %c0_i32, %c0_i32_0 : i32, i32
  }
  func.func @transform_4(%arg0: i32, %arg1: i32) -> (i32, i32) {
    %c0_i32 = arith.constant 0 : i32
    %c0_i32_0 = arith.constant 0 : i32
    %c0_i32_1 = arith.constant 0 : i32
    return %c0_i32, %c0_i32_0 : i32, i32
  }
  func.func @transform_5(%arg0: i32, %arg1: i32) -> (i32, i32, i32, i32) {
    %c0_i32 = arith.constant 0 : i32
    %c0_i32_0 = arith.constant 0 : i32
    %c0_i32_1 = arith.constant 0 : i32
    return %arg0, %arg1, %c0_i32, %c0_i32_0 : i32, i32, i32, i32
  }
}

module attributes {stable_mosaic.version = 11 : i64} {
  func.func @_affine_relu_kernel(%arg0: i32, %arg1: memref<512x128xbf16, #tpu.memory_space<vmem>>, %arg2: memref<1x128xf32, #tpu.memory_space<vmem>>, %arg3: memref<1x128xf32, #tpu.memory_space<vmem>>, %arg4: memref<512x128xf32, #tpu.memory_space<vmem>>) attributes {dimension_semantics = [#tpu.dimension_semantics<parallel>], iteration_bounds = array<i64: 1>, scalar_prefetch = 0 : i64, scratch_operands = 0 : i64, tpu.core_type = #tpu.core_type<tc>, window_params = [{transform_indices = @transform_0, window_bounds = array<i64: 512, 128>}, {pipeline_mode = #tpu.pipeline_mode<synchronous>, transform_indices = @transform_1, window_bounds = array<i64: 1, 128>}, {pipeline_mode = #tpu.pipeline_mode<synchronous>, transform_indices = @transform_2, window_bounds = array<i64: 1, 128>}, {transform_indices = @transform_3, window_bounds = array<i64: 512, 128>}]} {
    %c0 = arith.constant 0 : index
    %c0_0 = arith.constant 0 : index
    %0 = vector.load %arg1[%c0, %c0_0] : memref<512x128xbf16, #tpu.memory_space<vmem>>, vector<512x128xbf16>
    %1 = arith.extf %0 : vector<512x128xbf16> to vector<512x128xf32>
    %c0_1 = arith.constant 0 : index
    %c0_2 = arith.constant 0 : index
    %2 = vector.load %arg2[%c0_1, %c0_2] : memref<1x128xf32, #tpu.memory_space<vmem>>, vector<1x128xf32>
    %3 = vector.broadcast %2 : vector<1x128xf32> to vector<512x128xf32>
    %4 = arith.mulf %1, %3 : vector<512x128xf32>
    %c0_3 = arith.constant 0 : index
    %c0_4 = arith.constant 0 : index
    %5 = vector.load %arg3[%c0_3, %c0_4] : memref<1x128xf32, #tpu.memory_space<vmem>>, vector<1x128xf32>
    %6 = vector.broadcast %5 : vector<1x128xf32> to vector<512x128xf32>
    %7 = arith.addf %4, %6 : vector<512x128xf32>
    %cst = arith.constant 0.000000e+00 : f32
    %8 = vector.broadcast %cst : f32 to vector<512x128xf32>
    %9 = arith.maximumf %7, %8 : vector<512x128xf32>
    %c0_5 = arith.constant 0 : index
    %c0_6 = arith.constant 0 : index
    %10 = vector.load %arg4[%c0_5, %c0_6] : memref<512x128xf32, #tpu.memory_space<vmem>>, vector<512x128xf32>
    tpu.vector_store %arg4[%c0_5, %c0_6], %9 {strides = array<i32>} : memref<512x128xf32, #tpu.memory_space<vmem>>, vector<512x128xf32>,
    return
  }
  func.func @transform_0(%arg0: i32) -> (i32, i32) {
    %c0_i32 = arith.constant 0 : i32
    %c0_i32_0 = arith.constant 0 : i32
    return %arg0, %c0_i32 : i32, i32
  }
  func.func @transform_1(%arg0: i32) -> (i32, i32) {
    %c0_i32 = arith.constant 0 : i32
    %c0_i32_0 = arith.constant 0 : i32
    %c0_i32_1 = arith.constant 0 : i32
    return %c0_i32, %c0_i32_0 : i32, i32
  }
  func.func @transform_2(%arg0: i32) -> (i32, i32) {
    %c0_i32 = arith.constant 0 : i32
    %c0_i32_0 = arith.constant 0 : i32
    %c0_i32_1 = arith.constant 0 : i32
    return %c0_i32, %c0_i32_0 : i32, i32
  }
  func.func @transform_3(%arg0: i32) -> (i32, i32) {
    %c0_i32 = arith.constant 0 : i32
    %c0_i32_0 = arith.constant 0 : i32
    return %arg0, %c0_i32 : i32, i32
  }
}

</mosaic_0001>

<bundles_post_ra>
// kernel: conv_forward.5
= control target key start
LH: loop header
LB: loop body
LE: loop exit
PB: predicated region body
PF: predicated region fallthrough
CT: control target
= control target key end

     0   :  { %s1023_s0 = inlined_call_operand.vmem [shape: bf16[512,128], index: 0, kind: input, shape index: {}]   ;;  %s1024_s1 = inlined_call_operand.vmem [shape: f32[1,128], index: 1, kind: input, shape index: {}]   ;;  %s1025_s2 = inlined_call_operand.vmem [shape: f32[1,128], index: 2, kind: input, shape index: {}]   ;;  %s1026_s3 = inlined_call_operand.vmem [shape: f32[512,128], index: 3, kind: output, shape index: {}]  }
   0x1   :  { %v419_v0 = vld [vmem:[%s1023_s0] sm:$0xff]   ;;  %v546_v4 = vld [vmem:[%s1023_s0 + $0x8] sm:$0xff]   ;;  %v547_v5 = vld [vmem:[%s1023_s0 + $0x10] sm:$0xff]  }
   0x2   :  { %v603_v1 = vld [vmem:[%s1024_s1] ss:$0 sm:$0xff]  ;;  %v420_v2 = vunpack.c.l.bf16 %v419_v0  ;;  %v421_v3 = vunpack.c.h.bf16 %v419_v0  ;;  %v548_v6 = vld [vmem:[%s1023_s0 + $0x18] sm:$0xff]   ;;  %v424_v8 = vunpack.c.l.bf16 %v546_v4  ;;  %v425_v9 = vunpack.c.h.bf16 %v546_v4  ;;  %v550_v33 = vld [vmem:[%s1023_s0 + $0x28] sm:$0xff]  }
   0x3   :  { %v617_v7 = vld [vmem:[%s1025_s2] ss:$0 sm:$0xff]  ;;  %v428_v10 = vunpack.c.l.bf16 %v547_v5  ;;  %v429_v11 = vunpack.c.h.bf16 %v547_v5  ;;  %v432_v14 = vunpack.c.l.bf16 %v548_v6  ;;  %v433_v15 = vunpack.c.h.bf16 %v548_v6  ;;  %v551_v34 = vld [vmem:[%s1023_s0 + $0x30] sm:$0xff]   ;;  %v552_v39 = vld [vmem:[%s1023_s0 + $0x38] sm:$0xff]  }
   0x4   :  { %v149_v12 = vmul.f32 %v420_v2, %v603_v1  ;;  %v150_v13 = vmul.f32 %v421_v3, %v603_v1  ;;  %v151_v16 = vmul.f32 %v424_v8, %v603_v1  ;;  %v152_v17 = vmul.f32 %v425_v9, %v603_v1  ;;  %v549_v28 = vld [vmem:[%s1023_s0 + $0x20] sm:$0xff]   ;;  %v554_v6 = vld [vmem:[%s1023_s0 + $0x48] sm:$0xff]   ;;  %v555_v8 = vld [vmem:[%s1023_s0 + $0x50] sm:$0xff]  }
   0x5   :  { %v153_v18 = vmul.f32 %v428_v10, %v603_v1  ;;  %v154_v19 = vmul.f32 %v429_v11, %v603_v1  ;;  %v155_v22 = vmul.f32 %v432_v14, %v603_v1  ;;  %v156_v23 = vmul.f32 %v433_v15, %v603_v1  ;;  %v553_v0 = vld [vmem:[%s1023_s0 + $0x40] sm:$0xff]  }
   0x6   :  { %v220_v20 = vadd.f32 %v617_v7, %v149_v12  ;;  %v221_v21 = vadd.f32 %v617_v7, %v150_v13  ;;  %v222_v24 = vadd.f32 %v617_v7, %v151_v16  ;;  %v223_v25 = vadd.f32 %v617_v7, %v152_v17  ;;  %v556_v13 = vld [vmem:[%s1023_s0 + $0x58] sm:$0xff]  }
   0x7   :  { %v224_v26 = vadd.f32 %v617_v7, %v153_v18  ;;  %v225_v27 = vadd.f32 %v617_v7, %v154_v19  ;;  %v226_v31 = vadd.f32 %v617_v7, %v155_v22  ;;  %v227_v32 = vadd.f32 %v617_v7, %v156_v23 }
   0x8   :  { %v284_v29 = vmax.f32 %v220_v20, 0.0  ;;  %v285_v30 = vmax.f32 %v221_v21, 0.0  ;;  %v286_v35 = vmax.f32 %v222_v24, 0.0  ;;  %v287_v36 = vmax.f32 %v223_v25, 0.0 }
   0x9   :  { %v288_v37 = vmax.f32 %v224_v26, 0.0  ;;  %v289_v38 = vmax.f32 %v225_v27, 0.0  ;;  %v290_v40 = vmax.f32 %v226_v31, 0.0  ;;  %v291_v41 = vmax.f32 %v227_v32, 0.0 }
   0xa   :  { %348 = vst [vmem:[%s1026_s3] sm:$0xff] %v284_v29  ;;  %349 = vst [vmem:[%s1026_s3 + $0x8] sm:$0xff] %v285_v30  ;;  %v436_v42 = vunpack.c.l.bf16 %v549_v28  ;;  %v437_v43 = vunpack.c.h.bf16 %v549_v28  ;;  %v440_v44 = vunpack.c.l.bf16 %v550_v33  ;;  %v441_v45 = vunpack.c.h.bf16 %v550_v33 }
   0xb   :  { %350 = vst [vmem:[%s1026_s3 + $0x10] sm:$0xff] %v286_v35  ;;  %351 = vst [vmem:[%s1026_s3 + $0x18] sm:$0xff] %v287_v36  ;;  %v444_v46 = vunpack.c.l.bf16 %v551_v34  ;;  %v445_v47 = vunpack.c.h.bf16 %v551_v34  ;;  %v448_v50 = vunpack.c.l.bf16 %v552_v39  ;;  %v449_v51 = vunpack.c.h.bf16 %v552_v39 }
   0xc   :  { %352 = vst [vmem:[%s1026_s3 + $0x20] sm:$0xff] %v288_v37  ;;  %353 = vst [vmem:[%s1026_s3 + $0x28] sm:$0xff] %v289_v38  ;;  %v157_v48 = vmul.f32 %v436_v42, %v603_v1  ;;  %v158_v49 = vmul.f32 %v437_v43, %v603_v1  ;;  %v159_v52 = vmul.f32 %v440_v44, %v603_v1  ;;  %v452_v16 = vunpack.c.l.bf16 %v553_v0  ;;  %v557_v38 = vld [vmem:[%s1023_s0 + $0x60] sm:$0xff]   ;;  %v558_v43 = vld [vmem:[%s1023_s0 + $0x68] sm:$0xff]  }
   0xd   :  { %354 = vst [vmem:[%s1026_s3 + $0x30] sm:$0xff] %v290_v40  ;;  %355 = vst [vmem:[%s1026_s3 + $0x38] sm:$0xff] %v291_v41  ;;  %v160_v53 = vmul.f32 %v441_v45, %v603_v1  ;;  %v161_v54 = vmul.f32 %v444_v46, %v603_v1  ;;  %v162_v55 = vmul.f32 %v445_v47, %v603_v1  ;;  %v453_v17 = vunpack.c.h.bf16 %v553_v0  ;;  %v559_v44 = vld [vmem:[%s1023_s0 + $0x70] sm:$0xff]  }
   0xe   :  { %v228_v56 = vadd.f32 %v617_v7, %v157_v48  ;;  %v229_v57 = vadd.f32 %v617_v7, %v158_v49  ;;  %v163_v58 = vmul.f32 %v448_v50, %v603_v1  ;;  %v164_v59 = vmul.f32 %v449_v51, %v603_v1  ;;  %v560_v49 = vld [vmem:[%s1023_s0 + $0x78] sm:$0xff]  }
   0xf   :  { %v230_v60 = vadd.f32 %v617_v7, %v159_v52  ;;  %v231_v61 = vadd.f32 %v617_v7, %v160_v53  ;;  %v232_v62 = vadd.f32 %v617_v7, %v161_v54  ;;  %v233_v63 = vadd.f32 %v617_v7, %v162_v55 }
  0x10   :  { %v292_v2 = vmax.f32 %v228_v56, 0.0  ;;  %v293_v3 = vmax.f32 %v229_v57, 0.0  ;;  %v234_v4 = vadd.f32 %v617_v7, %v163_v58  ;;  %v235_v5 = vadd.f32 %v617_v7, %v164_v59 }
  0x11   :  { %v294_v9 = vmax.f32 %v230_v60, 0.0  ;;  %v295_v10 = vmax.f32 %v231_v61, 0.0  ;;  %v296_v11 = vmax.f32 %v232_v62, 0.0  ;;  %v297_v12 = vmax.f32 %v233_v63, 0.0 }
  0x12   :  { %356 = vst [vmem:[%s1026_s3 + $0x40] sm:$0xff] %v292_v2  ;;  %357 = vst [vmem:[%s1026_s3 + $0x48] sm:$0xff] %v293_v3  ;;  %v298_v14 = vmax.f32 %v234_v4, 0.0  ;;  %v299_v15 = vmax.f32 %v235_v5, 0.0  ;;  %v456_v18 = vunpack.c.l.bf16 %v554_v6  ;;  %v457_v19 = vunpack.c.h.bf16 %v554_v6 }
  0x13   :  { %358 = vst [vmem:[%s1026_s3 + $0x50] sm:$0xff] %v294_v9  ;;  %359 = vst [vmem:[%s1026_s3 + $0x58] sm:$0xff] %v295_v10  ;;  %v460_v20 = vunpack.c.l.bf16 %v555_v8  ;;  %v461_v21 = vunpack.c.h.bf16 %v555_v8  ;;  %v165_v22 = vmul.f32 %v452_v16, %v603_v1  ;;  %v166_v23 = vmul.f32 %v453_v17, %v603_v1  ;;  %v562_v17 = vld [vmem:[%s1023_s0 + $0x88] sm:$0xff]  }
  0x14   :  { %360 = vst [vmem:[%s1026_s3 + $0x60] sm:$0xff] %v296_v11  ;;  %361 = vst [vmem:[%s1026_s3 + $0x68] sm:$0xff] %v297_v12  ;;  %v464_v24 = vunpack.c.l.bf16 %v556_v13  ;;  %v465_v25 = vunpack.c.h.bf16 %v556_v13  ;;  %v167_v26 = vmul.f32 %v456_v18, %v603_v1  ;;  %v168_v27 = vmul.f32 %v457_v19, %v603_v1  ;;  %v561_v12 = vld [vmem:[%s1023_s0 + $0x80] sm:$0xff]   ;;  %v563_v18 = vld [vmem:[%s1023_s0 + $0x90] sm:$0xff]  }
  0x15   :  { %362 = vst [vmem:[%s1026_s3 + $0x70] sm:$0xff] %v298_v14  ;;  %363 = vst [vmem:[%s1026_s3 + $0x78] sm:$0xff] %v299_v15  ;;  %v169_v28 = vmul.f32 %v460_v20, %v603_v1  ;;  %v170_v29 = vmul.f32 %v461_v21, %v603_v1  ;;  %v236_v30 = vadd.f32 %v617_v7, %v165_v22  ;;  %v468_v52 = vunpack.c.l.bf16 %v557_v38 }
  0x16   :  { %v237_v31 = vadd.f32 %v617_v7, %v166_v23  ;;  %v171_v32 = vmul.f32 %v464_v24, %v603_v1  ;;  %v172_v33 = vmul.f32 %v465_v25, %v603_v1  ;;  %v238_v34 = vadd.f32 %v617_v7, %v167_v26  ;;  %v564_v23 = vld [vmem:[%s1023_s0 + $0x98] sm:$0xff]  }
  0x17   :  { %v239_v35 = vadd.f32 %v617_v7, %v168_v27  ;;  %v240_v36 = vadd.f32 %v617_v7, %v169_v28  ;;  %v241_v37 = vadd.f32 %v617_v7, %v170_v29  ;;  %v300_v39 = vmax.f32 %v236_v30, 0.0 }
  0x18   :  { %v301_v40 = vmax.f32 %v237_v31, 0.0  ;;  %v242_v41 = vadd.f32 %v617_v7, %v171_v32  ;;  %v243_v42 = vadd.f32 %v617_v7, %v172_v33  ;;  %v302_v45 = vmax.f32 %v238_v34, 0.0 }
  0x19   :  { %v303_v46 = vmax.f32 %v239_v35, 0.0  ;;  %v304_v47 = vmax.f32 %v240_v36, 0.0  ;;  %v305_v48 = vmax.f32 %v241_v37, 0.0  ;;  %364 = vst [vmem:[%s1026_s3 + $0x80] sm:$0xff] %v300_v39  ;;  %v469_v53 = vunpack.c.h.bf16 %v557_v38 }
  0x1a   :  { %365 = vst [vmem:[%s1026_s3 + $0x88] sm:$0xff] %v301_v40  ;;  %v306_v50 = vmax.f32 %v242_v41, 0.0  ;;  %v307_v51 = vmax.f32 %v243_v42, 0.0  ;;  %366 = vst [vmem:[%s1026_s3 + $0x90] sm:$0xff] %v302_v45  ;;  %v472_v54 = vunpack.c.l.bf16 %v558_v43  ;;  %v473_v55 = vunpack.c.h.bf16 %v558_v43 }
  0x1b   :  { %367 = vst [vmem:[%s1026_s3 + $0x98] sm:$0xff] %v303_v46  ;;  %368 = vst [vmem:[%s1026_s3 + $0xa0] sm:$0xff] %v304_v47  ;;  %v476_v56 = vunpack.c.l.bf16 %v559_v44  ;;  %v477_v57 = vunpack.c.h.bf16 %v559_v44  ;;  %v173_v58 = vmul.f32 %v468_v52, %v603_v1  ;;  %v174_v59 = vmul.f32 %v469_v53, %v603_v1  ;;  %v566_v53 = vld [vmem:[%s1023_s0 + $0xa8] sm:$0xff]  }
  0x1c   :  { %369 = vst [vmem:[%s1026_s3 + $0xa8] sm:$0xff] %v305_v48  ;;  %370 = vst [vmem:[%s1026_s3 + $0xb0] sm:$0xff] %v306_v50  ;;  %v480_v60 = vunpack.c.l.bf16 %v560_v49  ;;  %v481_v61 = vunpack.c.h.bf16 %v560_v49  ;;  %v175_v62 = vmul.f32 %v472_v54, %v603_v1  ;;  %v176_v63 = vmul.f32 %v473_v55, %v603_v1  ;;  %v565_v48 = vld [vmem:[%s1023_s0 + $0xa0] sm:$0xff]   ;;  %v567_v54 = vld [vmem:[%s1023_s0 + $0xb0] sm:$0xff]  }
  0x1d   :  { %371 = vst [vmem:[%s1026_s3 + $0xb8] sm:$0xff] %v307_v51  ;;  %v177_v0 = vmul.f32 %v476_v56, %v603_v1  ;;  %v178_v2 = vmul.f32 %v477_v57, %v603_v1  ;;  %v244_v3 = vadd.f32 %v617_v7, %v173_v58  ;;  %v245_v4 = vadd.f32 %v617_v7, %v174_v59  ;;  %v568_v59 = vld [vmem:[%s1023_s0 + $0xb8] sm:$0xff]  }
  0x1e   :  { %v179_v5 = vmul.f32 %v480_v60, %v603_v1  ;;  %v180_v6 = vmul.f32 %v481_v61, %v603_v1  ;;  %v246_v8 = vadd.f32 %v617_v7, %v175_v62  ;;  %v247_v9 = vadd.f32 %v617_v7, %v176_v63 }
  0x1f   :  { %v248_v10 = vadd.f32 %v617_v7, %v177_v0  ;;  %v249_v11 = vadd.f32 %v617_v7, %v178_v2  ;;  %v308_v13 = vmax.f32 %v244_v3, 0.0  ;;  %v309_v14 = vmax.f32 %v245_v4, 0.0 }
  0x20   :  { %v250_v15 = vadd.f32 %v617_v7, %v179_v5  ;;  %v251_v16 = vadd.f32 %v617_v7, %v180_v6  ;;  %v310_v19 = vmax.f32 %v246_v8, 0.0  ;;  %v311_v20 = vmax.f32 %v247_v9, 0.0 }
  0x21   :  { %v312_v21 = vmax.f32 %v248_v10, 0.0  ;;  %v313_v22 = vmax.f32 %v249_v11, 0.0  ;;  %372 = vst [vmem:[%s1026_s3 + $0xc0] sm:$0xff] %v308_v13  ;;  %373 = vst [vmem:[%s1026_s3 + $0xc8] sm:$0xff] %v309_v14  ;;  %v484_v26 = vunpack.c.l.bf16 %v561_v12  ;;  %v485_v27 = vunpack.c.h.bf16 %v561_v12 }
  0x22   :  { %v314_v24 = vmax.f32 %v250_v15, 0.0  ;;  %v315_v25 = vmax.f32 %v251_v16, 0.0  ;;  %374 = vst [vmem:[%s1026_s3 + $0xd0] sm:$0xff] %v310_v19  ;;  %375 = vst [vmem:[%s1026_s3 + $0xd8] sm:$0xff] %v311_v20  ;;  %v488_v28 = vunpack.c.l.bf16 %v562_v17  ;;  %v489_v29 = vunpack.c.h.bf16 %v562_v17 }
  0x23   :  { %376 = vst [vmem:[%s1026_s3 + $0xe0] sm:$0xff] %v312_v21  ;;  %377 = vst [vmem:[%s1026_s3 + $0xe8] sm:$0xff] %v313_v22  ;;  %v492_v30 = vunpack.c.l.bf16 %v563_v18  ;;  %v493_v31 = vunpack.c.h.bf16 %v563_v18  ;;  %v181_v32 = vmul.f32 %v484_v26, %v603_v1  ;;  %v182_v33 = vmul.f32 %v485_v27, %v603_v1  ;;  %v569_v22 = vld [vmem:[%s1023_s0 + $0xc0] sm:$0xff]   ;;  %v570_v27 = vld [vmem:[%s1023_s0 + $0xc8] sm:$0xff]  }
  0x24   :  { %378 = vst [vmem:[%s1026_s3 + $0xf0] sm:$0xff] %v314_v24  ;;  %379 = vst [vmem:[%s1026_s3 + $0xf8] sm:$0xff] %v315_v25  ;;  %v496_v34 = vunpack.c.l.bf16 %v564_v23  ;;  %v497_v35 = vunpack.c.h.bf16 %v564_v23  ;;  %v183_v36 = vmul.f32 %v488_v28, %v603_v1  ;;  %v184_v37 = vmul.f32 %v489_v29, %v603_v1  ;;  %v571_v28 = vld [vmem:[%s1023_s0 + $0xd0] sm:$0xff]  }
  0x25   :  { %v185_v38 = vmul.f32 %v492_v30, %v603_v1  ;;  %v186_v39 = vmul.f32 %v493_v31, %v603_v1  ;;  %v252_v40 = vadd.f32 %v617_v7, %v181_v32  ;;  %v253_v41 = vadd.f32 %v617_v7, %v182_v33  ;;  %v572_v33 = vld [vmem:[%s1023_s0 + $0xd8] sm:$0xff]  }
  0x26   :  { %v187_v42 = vmul.f32 %v496_v34, %v603_v1  ;;  %v188_v43 = vmul.f32 %v497_v35, %v603_v1  ;;  %v254_v44 = vadd.f32 %v617_v7, %v183_v36  ;;  %v255_v45 = vadd.f32 %v617_v7, %v184_v37 }
  0x27   :  { %v256_v46 = vadd.f32 %v617_v7, %v185_v38  ;;  %v257_v47 = vadd.f32 %v617_v7, %v186_v39  ;;  %v316_v49 = vmax.f32 %v252_v40, 0.0  ;;  %v317_v50 = vmax.f32 %v253_v41, 0.0 }
  0x28   :  { %v258_v51 = vadd.f32 %v617_v7, %v187_v42  ;;  %v259_v52 = vadd.f32 %v617_v7, %v188_v43  ;;  %v318_v55 = vmax.f32 %v254_v44, 0.0  ;;  %v319_v56 = vmax.f32 %v255_v45, 0.0 }
  0x29   :  { %v320_v57 = vmax.f32 %v256_v46, 0.0  ;;  %v321_v58 = vmax.f32 %v257_v47, 0.0  ;;  %380 = vst [vmem:[%s1026_s3 + $0x100] sm:$0xff] %v316_v49  ;;  %381 = vst [vmem:[%s1026_s3 + $0x108] sm:$0xff] %v317_v50  ;;  %v500_v62 = vunpack.c.l.bf16 %v565_v48  ;;  %v501_v63 = vunpack.c.h.bf16 %v565_v48 }
  0x2a   :  { %v322_v60 = vmax.f32 %v258_v51, 0.0  ;;  %v323_v61 = vmax.f32 %v259_v52, 0.0  ;;  %382 = vst [vmem:[%s1026_s3 + $0x110] sm:$0xff] %v318_v55  ;;  %383 = vst [vmem:[%s1026_s3 + $0x118] sm:$0xff] %v319_v56  ;;  %v504_v0 = vunpack.c.l.bf16 %v566_v53  ;;  %v505_v2 = vunpack.c.h.bf16 %v566_v53 }
  0x2b   :  { %384 = vst [vmem:[%s1026_s3 + $0x120] sm:$0xff] %v320_v57  ;;  %385 = vst [vmem:[%s1026_s3 + $0x128] sm:$0xff] %v321_v58  ;;  %v508_v3 = vunpack.c.l.bf16 %v567_v54  ;;  %v509_v4 = vunpack.c.h.bf16 %v567_v54  ;;  %v189_v5 = vmul.f32 %v500_v62, %v603_v1  ;;  %v190_v6 = vmul.f32 %v501_v63, %v603_v1  ;;  %v573_v58 = vld [vmem:[%s1023_s0 + $0xe0] sm:$0xff]   ;;  %v574_v63 = vld [vmem:[%s1023_s0 + $0xe8] sm:$0xff]  }
  0x2c   :  { %386 = vst [vmem:[%s1026_s3 + $0x130] sm:$0xff] %v322_v60  ;;  %387 = vst [vmem:[%s1026_s3 + $0x138] sm:$0xff] %v323_v61  ;;  %v512_v8 = vunpack.c.l.bf16 %v568_v59  ;;  %v513_v9 = vunpack.c.h.bf16 %v568_v59  ;;  %v191_v10 = vmul.f32 %v504_v0, %v603_v1  ;;  %v192_v11 = vmul.f32 %v505_v2, %v603_v1  ;;  %v575_v0 = vld [vmem:[%s1023_s0 + $0xf0] sm:$0xff]  }
  0x2d   :  { %v193_v12 = vmul.f32 %v508_v3, %v603_v1  ;;  %v194_v13 = vmul.f32 %v509_v4, %v603_v1  ;;  %v260_v14 = vadd.f32 %v617_v7, %v189_v5  ;;  %v261_v15 = vadd.f32 %v617_v7, %v190_v6  ;;  %v576_v6 = vld [vmem:[%s1023_s0 + $0xf8] sm:$0xff]  }
  0x2e   :  { %v195_v16 = vmul.f32 %v512_v8, %v603_v1  ;;  %v196_v17 = vmul.f32 %v513_v9, %v603_v1  ;;  %v262_v18 = vadd.f32 %v617_v7, %v191_v10  ;;  %v263_v19 = vadd.f32 %v617_v7, %v192_v11 }
  0x2f   :  { %v264_v20 = vadd.f32 %v617_v7, %v193_v12  ;;  %v265_v21 = vadd.f32 %v617_v7, %v194_v13  ;;  %v324_v23 = vmax.f32 %v260_v14, 0.0  ;;  %v325_v24 = vmax.f32 %v261_v15, 0.0 }
  0x30   :  { %v266_v25 = vadd.f32 %v617_v7, %v195_v16  ;;  %v267_v26 = vadd.f32 %v617_v7, %v196_v17  ;;  %v326_v29 = vmax.f32 %v262_v18, 0.0  ;;  %v327_v30 = vmax.f32 %v263_v19, 0.0 }
  0x31   :  { %v328_v31 = vmax.f32 %v264_v20, 0.0  ;;  %v329_v32 = vmax.f32 %v265_v21, 0.0  ;;  %388 = vst [vmem:[%s1026_s3 + $0x140] sm:$0xff] %v324_v23  ;;  %389 = vst [vmem:[%s1026_s3 + $0x148] sm:$0xff] %v325_v24  ;;  %v516_v36 = vunpack.c.l.bf16 %v569_v22  ;;  %v517_v37 = vunpack.c.h.bf16 %v569_v22 }
  0x32   :  { %v330_v34 = vmax.f32 %v266_v25, 0.0  ;;  %v331_v35 = vmax.f32 %v267_v26, 0.0  ;;  %390 = vst [vmem:[%s1026_s3 + $0x150] sm:$0xff] %v326_v29  ;;  %391 = vst [vmem:[%s1026_s3 + $0x158] sm:$0xff] %v327_v30  ;;  %v520_v38 = vunpack.c.l.bf16 %v570_v27  ;;  %v521_v39 = vunpack.c.h.bf16 %v570_v27 }
  0x33   :  { %392 = vst [vmem:[%s1026_s3 + $0x160] sm:$0xff] %v328_v31  ;;  %393 = vst [vmem:[%s1026_s3 + $0x168] sm:$0xff] %v329_v32  ;;  %v524_v40 = vunpack.c.l.bf16 %v571_v28  ;;  %v525_v41 = vunpack.c.h.bf16 %v571_v28  ;;  %v197_v42 = vmul.f32 %v516_v36, %v603_v1  ;;  %v198_v43 = vmul.f32 %v517_v37, %v603_v1 }
  0x34   :  { %394 = vst [vmem:[%s1026_s3 + $0x170] sm:$0xff] %v330_v34  ;;  %395 = vst [vmem:[%s1026_s3 + $0x178] sm:$0xff] %v331_v35  ;;  %v528_v44 = vunpack.c.l.bf16 %v572_v33  ;;  %v529_v45 = vunpack.c.h.bf16 %v572_v33  ;;  %v199_v46 = vmul.f32 %v520_v38, %v603_v1  ;;  %v200_v47 = vmul.f32 %v521_v39, %v603_v1 }
  0x35   :  { %v201_v48 = vmul.f32 %v524_v40, %v603_v1  ;;  %v202_v49 = vmul.f32 %v525_v41, %v603_v1  ;;  %v268_v50 = vadd.f32 %v617_v7, %v197_v42  ;;  %v269_v51 = vadd.f32 %v617_v7, %v198_v43 }
  0x36   :  { %v203_v52 = vmul.f32 %v528_v44, %v603_v1  ;;  %v204_v53 = vmul.f32 %v529_v45, %v603_v1  ;;  %v270_v54 = vadd.f32 %v617_v7, %v199_v46  ;;  %v271_v55 = vadd.f32 %v617_v7, %v200_v47 }
  0x37   :  { %v272_v56 = vadd.f32 %v617_v7, %v201_v48  ;;  %v273_v57 = vadd.f32 %v617_v7, %v202_v49  ;;  %v332_v59 = vmax.f32 %v268_v50, 0.0  ;;  %v333_v60 = vmax.f32 %v269_v51, 0.0 }
  0x38   :  { %v274_v61 = vadd.f32 %v617_v7, %v203_v52  ;;  %v275_v62 = vadd.f32 %v617_v7, %v204_v53  ;;  %v334_v2 = vmax.f32 %v270_v54, 0.0  ;;  %v335_v3 = vmax.f32 %v271_v55, 0.0 }
  0x39   :  { %v336_v4 = vmax.f32 %v272_v56, 0.0  ;;  %v337_v5 = vmax.f32 %v273_v57, 0.0  ;;  %396 = vst [vmem:[%s1026_s3 + $0x180] sm:$0xff] %v332_v59  ;;  %397 = vst [vmem:[%s1026_s3 + $0x188] sm:$0xff] %v333_v60  ;;  %v532_v10 = vunpack.c.l.bf16 %v573_v58  ;;  %v533_v11 = vunpack.c.h.bf16 %v573_v58 }
  0x3a   :  { %v338_v8 = vmax.f32 %v274_v61, 0.0  ;;  %v339_v9 = vmax.f32 %v275_v62, 0.0  ;;  %398 = vst [vmem:[%s1026_s3 + $0x190] sm:$0xff] %v334_v2  ;;  %399 = vst [vmem:[%s1026_s3 + $0x198] sm:$0xff] %v335_v3  ;;  %v536_v12 = vunpack.c.l.bf16 %v574_v63  ;;  %v537_v13 = vunpack.c.h.bf16 %v574_v63 }
  0x3b   :  { %400 = vst [vmem:[%s1026_s3 + $0x1a0] sm:$0xff] %v336_v4  ;;  %401 = vst [vmem:[%s1026_s3 + $0x1a8] sm:$0xff] %v337_v5  ;;  %v540_v14 = vunpack.c.l.bf16 %v575_v0  ;;  %v541_v15 = vunpack.c.h.bf16 %v575_v0  ;;  %v205_v16 = vmul.f32 %v532_v10, %v603_v1  ;;  %v206_v17 = vmul.f32 %v533_v11, %v603_v1 }
  0x3c   :  { %402 = vst [vmem:[%s1026_s3 + $0x1b0] sm:$0xff] %v338_v8  ;;  %403 = vst [vmem:[%s1026_s3 + $0x1b8] sm:$0xff] %v339_v9  ;;  %v544_v18 = vunpack.c.l.bf16 %v576_v6  ;;  %v545_v19 = vunpack.c.h.bf16 %v576_v6  ;;  %v207_v20 = vmul.f32 %v536_v12, %v603_v1  ;;  %v208_v21 = vmul.f32 %v537_v13, %v603_v1 }
  0x3d   :  { %v209_v22 = vmul.f32 %v540_v14, %v603_v1  ;;  %v210_v23 = vmul.f32 %v541_v15, %v603_v1  ;;  %v276_v24 = vadd.f32 %v617_v7, %v205_v16  ;;  %v277_v25 = vadd.f32 %v617_v7, %v206_v17 }
  0x3e   :  { %v211_v26 = vmul.f32 %v544_v18, %v603_v1  ;;  %v212_v27 = vmul.f32 %v545_v19, %v603_v1  ;;  %v278_v28 = vadd.f32 %v617_v7, %v207_v20  ;;  %v279_v29 = vadd.f32 %v617_v7, %v208_v21 }
  0x3f   :  { %v280_v30 = vadd.f32 %v617_v7, %v209_v22  ;;  %v281_v31 = vadd.f32 %v617_v7, %v210_v23  ;;  %v340_v32 = vmax.f32 %v276_v24, 0.0  ;;  %v341_v33 = vmax.f32 %v277_v25, 0.0 }
  0x40   :  { %v282_v34 = vadd.f32 %v617_v7, %v211_v26  ;;  %v283_v35 = vadd.f32 %v617_v7, %v212_v27  ;;  %v342_v36 = vmax.f32 %v278_v28, 0.0  ;;  %v343_v37 = vmax.f32 %v279_v29, 0.0 }
  0x41   :  { %v344_v38 = vmax.f32 %v280_v30, 0.0  ;;  %v345_v39 = vmax.f32 %v281_v31, 0.0  ;;  %404 = vst [vmem:[%s1026_s3 + $0x1c0] sm:$0xff] %v340_v32  ;;  %405 = vst [vmem:[%s1026_s3 + $0x1c8] sm:$0xff] %v341_v33 }
  0x42   :  { %v346_v1 = vmax.f32 %v282_v34, 0.0  ;;  %v347_v40 = vmax.f32 %v283_v35, 0.0  ;;  %406 = vst [vmem:[%s1026_s3 + $0x1d0] sm:$0xff] %v342_v36  ;;  %407 = vst [vmem:[%s1026_s3 + $0x1d8] sm:$0xff] %v343_v37 }
  0x43   :  { %408 = vst [vmem:[%s1026_s3 + $0x1e0] sm:$0xff] %v344_v38  ;;  %409 = vst [vmem:[%s1026_s3 + $0x1e8] sm:$0xff] %v345_v39 }
  0x44   :  { %410 = vst [vmem:[%s1026_s3 + $0x1f0] sm:$0xff] %v346_v1  ;;  %411 = vst [vmem:[%s1026_s3 + $0x1f8] sm:$0xff] %v347_v40 }

// kernel: conv_forward.3
= control target key start
LH: loop header
LB: loop body
LE: loop exit
PB: predicated region body
PF: predicated region fallthrough
CT: control target
= control target key end

     0   :  { %s2596_s18 = smov 0   ;;  %s2598_s19 = smov 0   ;;  %s3619_s0 = inlined_call_operand.vmem [shape: bf16[2,18,18,4], index: 0, kind: input, shape index: {}]   ;;  %s3620_s1 = inlined_call_operand.vmem [shape: bf16[40,128], index: 1, kind: input, shape index: {}]   ;;  %s3621_s2 = inlined_call_operand.vmem [shape: f32[1,128], index: 2, kind: input, shape index: {}]   ;;  %s3622_s3 = inlined_call_operand.vmem [shape: f32[1,4], index: 3, kind: input, shape index: {}, may-alias: {3,4}]   ;;  %s3623_s4 = inlined_call_operand.vmem [shape: f32[1,4], index: 4, kind: input, shape index: {}, may-alias: {3,4}]   ;;  %s3624_s5 = inlined_call_operand.vmem [shape: bf16[2,16,16,128], index: 5, kind: output, shape index: {}]  }
   0x1   :  { %s2600_s20 = smov 0  }
   0x2 LB: > { %s27_s3 = sadd.s32 1, %s2556_s19  ;;  %p1811_p0 = scmp.ge.s32.totalorder %s2560_s20, 1  ;;  %s2560_s20 = sphi %s2600_s20, %s15_s20   ;;  %s2556_s19 = sphi %s2598_s19, %s3719_s19   ;;  %s2552_s18 = sphi %s2596_s18, %s3718_s18  }
   0x3   : > { %p29_p1 = scmp.ge.s32.totalorder %s27_s3, 2  ;;  %p201_p2 = scmp.lt.s32.totalorder %s2560_s20, 3 }
   0x5   : > { %s3721_s3 = smov (%p29_p1, %s27_s3), 0  ;;  %p202_p3 = pnand %p1811_p0, %p201_p2 }
   0x7   : > { %205 = sbr.rel (%p202_p3) target bundleno = 602 (0x25a), region = 40 }
   0xe   : > { %p234_p4 = scmp.lt.s32.totalorder %s2552_s18, 1  ;;  %s2562_s24 = smov 4   ;;  %vm702_vm0 = vcmask 31744   ;;  %vm751_vm1 = vcmask 64512   ;;  %vm848_vm2 = vcmask 1046528   ;;  %vm1025_vm3 = vcmask 1045504  }
   0xf   : > { %s2563_s25 = smov 8   ;;  %s2564_s28 = smov 12   ;;  %vm1393_vm4 = vcmask 1043456   ;;  %vm1202_vm5 = vcmask 97280   ;;  %vm1235_vm6 = vcmask 195584   ;;  %vm1268_vm7 = vcmask 293888  }
  0x10   : > { %s3723_s18 = smov (!%p234_p4, %s2552_s18), 1  ;;  %s2565_s6 = smov 24   ;;  %vm1344_vm8 = vcmask 326656  }
  0x11   : > { %s2106_s4 = smul.u32 216, %s3723_s18  ;;  %s1869_s11 = sshll.u32 %s3723_s18, 7 }
  0x12   : > { %s3564_s14 = scalar_lea.vmem %s3624_s5, %s1869_s11 }
  0x13   : > { %s2620_s23 = scalar_lea.vmem %s3619_s0, %s2106_s4 }
  0x14   : > { %v283_v0 = vld [vmem:[%s2620_s23 + $0x6c] sm:$0xff]   ;;  %v284_v1 = vld [vmem:[%s2620_s23 + $0x74] sm:$0x1]  ;;  %v2634_v7 = vld [vmem:[%s2620_s23 + $0x18] sm:$0xff]  }
  0x15   : > { %v2625_v2 = vld [vmem:[%s2620_s23 + $0xc] sm:$0xff]   ;;  %v2627_v3 = vunpack.c.h.bf16 %v283_v0  ;;  %v2629_v4 = vunpack.c.l.bf16 %v284_v1  ;;  %v2637_v8 = vld [vmem:[%s2620_s23 + $0x14] sm:$0x1]  ;;  %v2640_v9 = vld [vmem:[%s2620_s23 + $0x78] sm:$0xff]   ;;  %v3657_v10 = vunpack.c.l.bf16 %v2634_v7  ;;  %v3658_v11 = vunpack.c.h.bf16 %v2634_v7 }
  0x16   : > { %v312_v5 = vunpack.c.l.bf16 %v2625_v2  ;;  %v313_v6 = vunpack.c.h.bf16 %v2625_v2  ;;  %v314_v12 = vunpack.c.l.bf16 %v2637_v8  ;;  %v2645_v13 = vunpack.c.l.bf16 %v283_v0  ;;  %v2648_v14 = vld [vmem:[%s2620_s23 + $0x80] sm:$0x1]  ;;  %v2683_v26 = vld [vmem:[%s2620_s23 + $0x24] sm:$0xff]   ;;  %v2693_v30 = vld [vmem:[%s2620_s23 + $0x8c] sm:$0x1] }
  0x17   : > { %v2651_v15 = vld [vmem:[%s2620_s23 + $0x20] sm:$0x1]  ;;  %v2145_v16 = vpack.i.bf16 %v2629_v4, %v2627_v3  ;;  %v3653_v18 = vunpack.c.h.bf16 %v2640_v9  ;;  %v3654_v19 = vunpack.c.l.bf16 %v2648_v14  ;;  %v2150_v20 = vpack.i.bf16 %v3658_v11, %v3657_v10  ;;  %v2690_v29 = vld [vmem:[%s2620_s23 + $0x84] sm:$0xff]   ;;  %v2696_v31 = vld [vmem:[%s2620_s23 + $0x2c] sm:$0x1] }
  0x18   : > { %v2135_v17 = vpack.i.bf16 %v313_v6, %v312_v5  ;;  %v2140_v21 = vpack.i.bf16 %v2645_v13, %v314_v12  ;;  %v3660_v22 = vunpack.c.l.bf16 %v2640_v9  ;;  %v3659_v23 = vunpack.c.l.bf16 %v2651_v15  ;;  %v2719_v39 = vld [vmem:[%s2620_s23 + $0x30] sm:$0xff]   ;;  %v2729_v43 = vld [vmem:[%s2620_s23 + $0x98] sm:$0x1]  ;;  %v2755_v52 = vld [vmem:[%s2620_s23 + $0x3c] sm:$0xff]  }
  0x19   : > { %2146 = vrot.lane.b32.xlu1 %v2145_v16, %s2562_s24  ;;  %v2160_v24 = vpack.i.bf16 %v3654_v19, %v3653_v18  ;;  %v3655_v27 = vunpack.c.l.bf16 %v2683_v26  ;;  %v3656_v28 = vunpack.c.h.bf16 %v2683_v26  ;;  %v3651_v32 = vunpack.c.h.bf16 %v2690_v29  ;;  %v2726_v42 = vld [vmem:[%s2620_s23 + $0x90] sm:$0xff]   ;;  %v2732_v44 = vld [vmem:[%s2620_s23 + $0x38] sm:$0x1]  ;;  %v2762_v55 = vld [vmem:[%s2620_s23 + $0x9c] sm:$0xff]  }
  0x1a   : > { %2136 = vrot.lane.b32.xlu0 %v2135_v17, %s2562_s24  ;;  %v2155_v25 = vpack.i.bf16 %v3660_v22, %v3659_v23  ;;  %v3652_v34 = vunpack.c.l.bf16 %v2693_v30  ;;  %v3649_v35 = vunpack.c.l.bf16 %v2696_v31  ;;  %v3650_v36 = vunpack.c.l.bf16 %v2690_v29  ;;  %v2765_v56 = vld [vmem:[%s2620_s23 + $0xa4] sm:$0x1]  ;;  %v2791_v1 = vld [vmem:[%s2620_s23 + $0x48] sm:$0xff]  }
  0x1b   : > { %v2180_v33 = vpack.i.bf16 %v3656_v28, %v3655_v27  ;;  %v3645_v40 = vunpack.c.l.bf16 %v2719_v39  ;;  %v3646_v41 = vunpack.c.h.bf16 %v2719_v39  ;;  %v3639_v45 = vunpack.c.h.bf16 %v2726_v42  ;;  %v2768_v57 = vld [vmem:[%s2620_s23 + $0x44] sm:$0x1] }
  0x1c   : > { %v2190_v37 = vpack.i.bf16 %v3652_v34, %v3651_v32  ;;  %v2185_v38 = vpack.i.bf16 %v3650_v36, %v3649_v35  ;;  %v3642_v46 = vunpack.c.l.bf16 %v2729_v43  ;;  %v3648_v48 = vunpack.c.l.bf16 %v2726_v42 }
  0x1d   : > { %2151 = vrot.lane.b32.xlu1 %v2150_v20, %s2562_s24  ;;  %v2210_v47 = vpack.i.bf16 %v3646_v41, %v3645_v40  ;;  %v3647_v49 = vunpack.c.l.bf16 %v2732_v44  ;;  %v3643_v53 = vunpack.c.l.bf16 %v2755_v52  ;;  %v3644_v54 = vunpack.c.h.bf16 %v2755_v52 }
  0x1e   : > { %2141 = vrot.lane.b32.xlu0 %v2140_v21, %s2562_s24  ;;  %v2220_v50 = vpack.i.bf16 %v3642_v46, %v3639_v45  ;;  %v3635_v58 = vunpack.c.h.bf16 %v2762_v55  ;;  %v3636_v60 = vunpack.c.l.bf16 %v2765_v56  ;;  %v3631_v61 = vunpack.c.l.bf16 %v2768_v57  ;;  %v2801_v21 = vld [vmem:[%s2620_s23 + $0xb0] sm:$0x1] }
  0x1f   : > { %v2215_v51 = vpack.i.bf16 %v3648_v48, %v3647_v49  ;;  %v2240_v59 = vpack.i.bf16 %v3644_v54, %v3643_v53  ;;  %v3632_v62 = vunpack.c.l.bf16 %v2762_v55  ;;  %v3625_v16 = vunpack.c.l.bf16 %v2791_v1  ;;  %v1903_v49 = vld [vmem:[%s2620_s23] sm:$0xff]  }
  0x20   : > { %v2250_v63 = vpack.i.bf16 %v3636_v60, %v3635_v58  ;;  %v3626_v17 = vunpack.c.h.bf16 %v2791_v1  ;;  %v2025_v58 = vld [vmem:[%s2620_s23 + $0xc0] sm:$0xff]   ;;  %v305_v60 = vld [vmem:[%s2620_s23 + $0xc8] sm:$0x1] }
  0x21   : > { %2161 = vrot.lane.b32.xlu1 %v2160_v24, %s2562_s24  ;;  %v2245_v0 = vpack.i.bf16 %v3632_v62, %v3631_v61  ;;  %v359_v45 = vunpack.c.l.bf16 %v305_v60  ;;  %v307_v60 = vld [vmem:[%s2620_s23 + $0xcc] sm:$0xff]  }
  0x22   : > { %2156 = vrot.lane.b32.xlu0 %v2155_v25, %s2562_s24 }
  0x25   : > { %2171 = vrot.lane.b32.xlu1 %v2155_v25, %s2563_s25 }
  0x26   : > { %2166 = vrot.lane.b32.xlu0 %v2150_v20, %s2563_s25  ;;  %v2798_v20 = vld [vmem:[%s2620_s23 + $0xa8] sm:$0xff]  }
  0x27   : > { %v3627_v25 = vunpack.c.h.bf16 %v2798_v20 }
  0x29   : > { %2181 = vrot.lane.b32.xlu1 %v2180_v33, %s2563_s25 }
  0x2a   : > { %2176 = vrot.lane.b32.xlu0 %v2160_v24, %s2563_s25  ;;  %v2804_v24 = vld [vmem:[%s2620_s23 + $0x50] sm:$0x1] }
  0x2d   : > { %2191 = vrot.lane.b32.xlu1 %v2190_v37, %s2563_s25 }
  0x2e   : > { %2186 = vrot.lane.b32.xlu0 %v2185_v38, %s2563_s25 }
  0x31   : > { %2201 = vrot.lane.b32.xlu1 %v2185_v38, %s2562_s24  ;;  %v3630_v38 = vunpack.c.l.bf16 %v2798_v20 }
  0x32   : > { %2196 = vrot.lane.b32.xlu0 %v2180_v33, %s2562_s24  ;;  %v2270_v33 = vpack.i.bf16 %v3626_v17, %v3625_v16  ;;  %v2834_v16 = vld [vmem:[%s2620_s23 + $0xb4] sm:$0xff]   ;;  %v2837_v17 = vld [vmem:[%s2620_s23 + $0xbc] sm:$0x1] }
  0x33   : > { %v3641_v62 = vunpack.c.l.bf16 %v2834_v16 }
  0x35   : > { %2211 = vrot.lane.b32.xlu1 %v2210_v47, %s2562_s24 }
  0x36   : > { %2206 = vrot.lane.b32.xlu0 %v2190_v37, %s2562_s24  ;;  %v3628_v37 = vunpack.c.l.bf16 %v2801_v21 }
  0x39   : > { %2221 = vrot.lane.b32.xlu1 %v2220_v50, %s2562_s24 }
  0x3a   : > { %2216 = vrot.lane.b32.xlu0 %v2215_v51, %s2562_s24 }
  0x3d   : > { %2231 = vrot.lane.b32.xlu1 %v2215_v51, %s2563_s25 }
  0x3e   : > { %2226 = vrot.lane.b32.xlu0 %v2210_v47, %s2563_s25  ;;  %v3629_v47 = vunpack.c.l.bf16 %v2804_v24 }
  0x40   : > { %v2275_v51 = vpack.i.bf16 %v3630_v38, %v3629_v47  ;;  %v3638_v38 = vunpack.c.l.bf16 %v2837_v17 }
  0x41   : > { %2241 = vrot.lane.b32.xlu1 %v2240_v59, %s2563_s25 }
  0x42   : > { %2236 = vrot.lane.b32.xlu0 %v2220_v50, %s2563_s25  ;;  %v2280_v50 = vpack.i.bf16 %v3628_v37, %v3627_v25  ;;  %v2840_v25 = vld [vmem:[%s2620_s23 + $0x5c] sm:$0x1]  ;;  %v3637_v37 = vunpack.c.h.bf16 %v2834_v16 }
  0x43   : > { %v3640_v61 = vunpack.c.l.bf16 %v2840_v25 }
  0x45   : > { %2251 = vrot.lane.b32.xlu1 %v2250_v63, %s2563_s25 }
  0x46   : > { %2246 = vrot.lane.b32.xlu0 %v2245_v0, %s2563_s25 }
  0x49   : > { %2261 = vrot.lane.b32.xlu1 %v2245_v0, %s2562_s24 }
  0x4a   : > { %2256 = vrot.lane.b32.xlu0 %v2240_v59, %s2562_s24  ;;  %v2827_v59 = vld [vmem:[%s2620_s23 + $0x54] sm:$0xff]  }
  0x4b   : > { %v3633_v0 = vunpack.c.l.bf16 %v2827_v59 }
  0x4d   : > { %2271 = vrot.lane.b32.xlu1 %v2270_v33, %s2562_s24 }
  0x4e   : > { %2266 = vrot.lane.b32.xlu0 %v2250_v63, %s2562_s24  ;;  %v3634_v63 = vunpack.c.h.bf16 %v2827_v59 }
  0x50   : > { %v2300_v47 = vpack.i.bf16 %v3634_v63, %v3633_v0  ;;  %v2863_v0 = vld [vmem:[%s2620_s23 + $0x60] sm:$0xff]  }
  0x51   : > { %2281 = vrot.lane.b32.xlu1 %v2280_v50, %s2562_s24  ;;  %v1920_v63 = vunpack.c.l.bf16 %v2863_v0 }
  0x52   : > { %2276 = vrot.lane.b32.xlu0 %v2275_v51, %s2562_s24 }
  0x55   : > { %2291 = vrot.lane.b32.xlu1 %v2275_v51, %s2563_s25  ;;  %v2305_v51 = vpack.i.bf16 %v3641_v62, %v3640_v61  ;;  %v1936_v62 = vunpack.c.l.bf16 %v2025_v58 }
  0x56   : > { %2286 = vrot.lane.b32.xlu0 %v2270_v33, %s2563_s25  ;;  %v2310_v33 = vpack.i.bf16 %v3638_v38, %v3637_v37  ;;  %v2872_v37 = vld [vmem:[%s2620_s23 + $0x68] sm:$0x1]  ;;  %v1937_v38 = vunpack.c.h.bf16 %v2025_v58  ;;  %v361_v58 = vunpack.c.h.bf16 %v307_v60 }
  0x57   : > { %v335_v46 = vunpack.c.l.bf16 %v2872_v37 }
  0x58   : > { %v2340_v53 = vpack.i.bf16 %v359_v45, %v1937_v38 }
  0x59   : > { %2301 = vrot.lane.b32.xlu1 %v2300_v47, %s2563_s25  ;;  %v2335_v54 = vpack.i.bf16 %v1936_v62, %v335_v46 }
  0x5a   : > { %2296 = vrot.lane.b32.xlu0 %v2280_v50, %s2563_s25  ;;  %v1921_v50 = vunpack.c.h.bf16 %v2863_v0 }
  0x5c   : > { %v2330_v61 = vpack.i.bf16 %v1921_v50, %v1920_v63 }
  0x5d   : > { %2311 = vrot.lane.b32.xlu1 %v2310_v33, %s2563_s25 }
  0x5e   : > { %2306 = vrot.lane.b32.xlu0 %v2305_v51, %s2563_s25 }
  0x61   : > { %2321 = vrot.lane.b32.xlu1 %v2305_v51, %s2562_s24  ;;  %v308_v51 = vld [vmem:[%s2620_s23 + $0xd4] sm:$0x1] }
  0x62   : > { %2316 = vrot.lane.b32.xlu0 %v2300_v47, %s2562_s24  ;;  %v2360_v47 = vpack.i.bf16 %v2627_v3, %v2645_v13  ;;  %v362_v37 = vunpack.c.l.bf16 %v308_v51 }
  0x64   : > { %v2370_v45 = vpack.i.bf16 %v362_v37, %v361_v58  ;;  %v1905_v58 = vunpack.c.h.bf16 %v1903_v49 }
  0x65   : > { %2331 = vrot.lane.b32.xlu1 %v2330_v61, %s2562_s24 }
  0x66   : > { %2326 = vrot.lane.b32.xlu0 %v2310_v33, %s2562_s24  ;;  %v360_v33 = vunpack.c.l.bf16 %v307_v60  ;;  %v1904_v60 = vunpack.c.l.bf16 %v1903_v49 }
  0x68   : > { %v2365_v62 = vpack.i.bf16 %v360_v33, %v2629_v4 }
  0x69   : > { %2341 = vrot.lane.b32.xlu1 %v2340_v53, %s2562_s24 }
  0x6a   : > { %2336 = vrot.lane.b32.xlu0 %v2335_v54, %s2562_s24 }
  0x6d   : > { %2351 = vrot.lane.b32.xlu1 %v2335_v54, %s2563_s25 }
  0x6e   : > { %2346 = vrot.lane.b32.xlu0 %v2330_v61, %s2563_s25  ;;  %v257_v61 = vld [vmem:[%s2620_s23 + $0x8] sm:$0x1] }
  0x6f   : > { %v311_v33 = vunpack.c.l.bf16 %v257_v61 }
  0x71   : > { %2361 = vrot.lane.b32.xlu1 %v2360_v47, %s2563_s25 }
  0x72   : > { %2356 = vrot.lane.b32.xlu0 %v2340_v53, %s2563_s25 }
  0x75   : > { %2371 = vrot.lane.b32.xlu1 %v2370_v45, %s2563_s25 }
  0x76   : > { %2366 = vrot.lane.b32.xlu0 %v2365_v62, %s2563_s25 }
  0x8b   : > { %v2147_v38 = vpop.permute.xlu1 %2146 }
  0x8c   : > { %v2137_v40 = vpop.permute.xlu0 %2136  ;;  %v2148_v48 = vunpack.i.l.bf16 %v2147_v38  ;;  %v2149_v45 = vunpack.i.h.bf16 %v2147_v38 }
  0x8d   : > { %v2138_v51 = vunpack.i.l.bf16 %v2137_v40  ;;  %v2139_v53 = vunpack.i.h.bf16 %v2137_v40 }
  0x8e   : > { %v728_v62 = vsel %vm702_vm0, %v1921_v50, %v2148_v48 }
  0x8f   : > { %v2152_v54 = vpop.permute.xlu1 %2151  ;;  %v703_v36 = vsel %vm702_vm0, %v1904_v60, %v2138_v51  ;;  %v704_v11 = vsel %vm702_vm0, %v1905_v58, %v2139_v53 }
  0x90   : > { %v2142_v41 = vpop.permute.xlu0 %2141  ;;  %v2153_v32 = vunpack.i.l.bf16 %v2152_v54  ;;  %v2154_v19 = vunpack.i.h.bf16 %v2152_v54  ;;  %v729_v54 = vsel %vm702_vm0, %v335_v46, %v2149_v45 }
  0x91   : > { %v2143_v37 = vunpack.i.l.bf16 %v2142_v41  ;;  %v2144_v40 = vunpack.i.h.bf16 %v2142_v41 }
  0x93   : > { %v2162_v35 = vpop.permute.xlu1 %2161  ;;  %v705_v49 = vsel %vm702_vm0, %v311_v33, %v2143_v37 }
  0x94   : > { %v2896_v47 = vpop.permute.xlu0 %2156  ;;  %v2164_v61 = vunpack.i.h.bf16 %v2162_v35  ;;  %v2163_v23 = vunpack.i.l.bf16 %v2162_v35 }
  0x95   : > { %v2159_v41 = vunpack.i.h.bf16 %v2896_v47 }
  0x96   : > { %v731_v2 = vsel %vm702_vm0, %v2627_v3, %v2163_v23 }
  0x97   : > { %v2172_v34 = vpop.permute.xlu1 %2171 }
  0x98   : > { %v2167_v18 = vpop.permute.xlu0 %2166  ;;  %v2173_v27 = vunpack.i.l.bf16 %v2172_v34  ;;  %v2174_v51 = vunpack.i.h.bf16 %v2172_v34  ;;  %v732_v34 = vsel %vm702_vm0, %v2629_v4, %v2164_v61 }
  0x99   : > { %v2169_v28 = vunpack.i.h.bf16 %v2167_v18  ;;  %v2168_v10 = vunpack.i.l.bf16 %v2167_v18  ;;  %v706_v18 = vsel %vm702_vm0, %v312_v5, %v2153_v32  ;;  %v727_v32 = vsel %vm702_vm0, %v1920_v63, %v2144_v40 }
  0x9a   : > { %v2903_v38 = vsel %vm751_vm1, %v705_v49, %v2173_v27  ;;  %v2933_v58 = vsel %vm751_vm1, %v727_v32, %v2174_v51  ;;  %v2536_v32 = vld [vmem:[%s3620_s1 + $0x8] sm:$0xff]  }
  0x9b   : > { %v2906_v48 = vsel %vm751_vm1, %v703_v36, %v2168_v10  ;;  %v2909_v50 = vsel %vm751_vm1, %v704_v11, %v2169_v28  ;;  %v2182_v60 = vpop.permute.xlu1 %2181  ;;  %v707_v10 = vsel %vm702_vm0, %v313_v6, %v2154_v19  ;;  %v852_v27 = vrot.slane %v2903_v38, 1 }
  0x9c   : > { %v2177_v35 = vpop.permute.xlu0 %2176  ;;  %v849_v11 = vrot.slane %v2906_v48, 1  ;;  %v850_v28 = vrot.slane %v2909_v50, 1  ;;  %v2184_v36 = vunpack.i.h.bf16 %v2182_v60  ;;  %v2183_v46 = vunpack.i.l.bf16 %v2182_v60 }
  0x9d   : > { %v2179_v53 = vunpack.i.h.bf16 %v2177_v35  ;;  %v2178_v5 = vunpack.i.l.bf16 %v2177_v35  ;;  %v2158_v6 = vunpack.i.l.bf16 %v2896_v47  ;;  %v730_v19 = vsel %vm702_vm0, %v2645_v13, %v2159_v41 }
  0x9e   : > { %v1026_v4 = vrot.slane %v2906_v48, 2  ;;  %v1027_v3 = vrot.slane %v2909_v50, 2  ;;  %v851_v23 = vsel %vm848_vm2, %v849_v11, %v850_v28  ;;  %v853_v47 = vsel %vm848_vm2, %v850_v28, %v852_v27  ;;  %v2535_v11 = vld [vmem:[%s3620_s1] sm:$0xff]  }
  0x9f   : > { %v2936_v37 = vsel %vm751_vm1, %v729_v54, %v2179_v53  ;;  %v2939_v0 = vsel %vm751_vm1, %v728_v62, %v2178_v5  ;;  %v2192_v63 = vpop.permute.xlu1 %2191  ;;  %v2946_v13 = vsel %vm751_vm1, %v706_v18, %v2183_v46  ;;  %v2949_v45 = vsel %vm751_vm1, %v707_v10, %v2184_v36  ;;  %2060 = vmatprep.subr.bf16.mxu0 %v2535_v11 }
  0xa0   : > { %v2187_v33 = vpop.permute.xlu0 %2186  ;;  %3666 = vst [vmem:[#allocation2_spill] sm:$0xff] %v2946_v13  ;;  %3667 = vst [vmem:[#allocation3_spill] sm:$0xff] %v2949_v45  ;;  %v892_v40 = vrot.slane %v2936_v37, 1  ;;  %v890_v62 = vrot.slane %v2939_v0, 1  ;;  %v2194_v49 = vunpack.i.h.bf16 %v2192_v63  ;;  %v2193_v61 = vunpack.i.l.bf16 %v2192_v63  ;;  %2098 = vmatprep.subr.bf16.mxu1 %v2535_v11  ;;  %2061 = vmatpush3.bf16.msra.mxu0 %v2535_v11 }
  0xa1   : > { %v2189_v54 = vunpack.i.h.bf16 %v2187_v33  ;;  %v2188_v41 = vunpack.i.l.bf16 %v2187_v33  ;;  %v708_v51 = vsel %vm702_vm0, %v314_v12, %v2158_v6  ;;  %v889_v60 = vrot.slane %v2933_v58, 1  ;;  %2101 = vmatpush3.bf16.msra.mxu1 %v2535_v11  ;;  %2062 = vmatprep.subr.bf16.mxu0 %v2536_v32 }
  0xa2   : > { %v1029_v18 = vrot.slane %v2903_v38, 2  ;;  %v2375_v35 = vpack.i.bf16 %v853_v47, %v851_v23  ;;  %v2964_v28 = vsel %vm751_vm1, %v731_v2, %v2193_v61  ;;  %v2967_v36 = vsel %vm751_vm1, %v732_v34, %v2194_v49  ;;  %2099 = vmatprep.subr.bf16.mxu1 %v2536_v32 }
  0xa3   : > { %v2202_v27 = vpop.permute.xlu1 %2201  ;;  %v2970_v8 = vsel %vm751_vm1, %v708_v51, %v2188_v41  ;;  %v2973_v12 = vsel %vm751_vm1, %v730_v19, %v2189_v54  ;;  %v854_v38 = vrot.slane %v2946_v13, 1  ;;  %v855_v46 = vrot.slane %v2949_v45, 1 }
  0xa4   : > { %v2958_v10 = vpop.permute.xlu0 %2196  ;;  %2376 = vrot.lane.b32.xlu0 %v2375_v35, %s2564_s28  ;;  %v891_v53 = vsel %vm848_vm2, %v889_v60, %v890_v62  ;;  %v893_v5 = vsel %vm848_vm2, %v890_v62, %v892_v40  ;;  %v1066_v34 = vrot.slane %v2933_v58, 2  ;;  %v2985_v2 = vsel %vm1025_vm3, %v1026_v4, %v1027_v3  ;;  %2063 = vmatpush3.bf16.msra.mxu0 %v2536_v32 }
  0xa5   : > { %v895_v6 = vrot.slane %v2964_v28, 1  ;;  %v897_v19 = vrot.slane %v2967_v36, 1  ;;  %v857_v63 = vrot.slane %v2970_v8, 1  ;;  %v894_v33 = vrot.slane %v2973_v12, 1  ;;  %2102 = vmatpush3.bf16.msra.mxu1 %v2536_v32 }
  0xa6   : > { %v1031_v40 = vrot.slane %v2946_v13, 2  ;;  %v1067_v4 = vrot.slane %v2939_v0, 2  ;;  %v2380_v62 = vpack.i.bf16 %v893_v5, %v891_v53  ;;  %v1030_v49 = vsel %vm1025_vm3, %v1027_v3, %v1029_v18 }
  0xa7   : > { %v2212_v23 = vpop.permute.xlu1 %2211  ;;  %v1032_v61 = vrot.slane %v2949_v45, 2  ;;  %v1069_v54 = vrot.slane %v2936_v37, 2  ;;  %v2204_v41 = vunpack.i.h.bf16 %v2202_v27  ;;  %v856_v51 = vsel %vm848_vm2, %v854_v38, %v855_v46 }
  0xa8   : > { %v2991_v47 = vpop.permute.xlu0 %2206  ;;  %v2203_v60 = vunpack.i.l.bf16 %v2202_v27  ;;  %v2199_v35 = vunpack.i.h.bf16 %v2958_v10  ;;  %v2198_v11 = vunpack.i.l.bf16 %v2958_v10  ;;  %2381 = vrot.lane.b32.xlu1 %v2380_v62, %s2564_s28  ;;  %v2214_v22 = vunpack.i.h.bf16 %v2212_v23 }
  0xa9   : > { %v2213_v53 = vunpack.i.l.bf16 %v2212_v23  ;;  %v896_v3 = vsel %vm848_vm2, %v894_v33, %v895_v6  ;;  %v898_v18 = vsel %vm848_vm2, %v895_v6, %v897_v19  ;;  %v858_v5 = vsel %vm848_vm2, %v855_v46, %v857_v63 }
  0xaa   : > { %v1072_v27 = vrot.slane %v2964_v28, 2  ;;  %v2390_v38 = vpack.i.bf16 %v898_v18, %v896_v3  ;;  %v2385_v45 = vpack.i.bf16 %v858_v5, %v856_v51  ;;  %v1068_v10 = vsel %vm1025_vm3, %v1066_v34, %v1067_v4 }
  0xab   : > { %v2222_v37 = vpop.permute.xlu1 %2221  ;;  %v1074_v62 = vrot.slane %v2967_v36, 2  ;;  %v1034_v23 = vrot.slane %v2970_v8, 2  ;;  %v1071_v33 = vrot.slane %v2973_v12, 2  ;;  %v1070_v6 = vsel %vm1025_vm3, %v1067_v4, %v1069_v54 }
  0xac   : > { %v3005_v13 = vpop.permute.xlu0 %2216  ;;  %v3668_v46 = vunpack.c.l.bf16 %v2640_v9  ;;  %v3669_v32 = vunpack.c.l.bf16 %v2651_v15  ;;  %v3670_v51 = vunpack.c.h.bf16 %v2634_v7  ;;  %v2209_v36 = vunpack.i.h.bf16 %v2991_v47  ;;  %2391 = vrot.lane.b32.xlu1 %v2390_v38, %s2564_s28  ;;  %2386 = vrot.lane.b32.xlu0 %v2385_v45, %s2564_s28 }
  0xad   : > { %v3671_v8 = vunpack.c.l.bf16 %v2634_v7  ;;  %v3672_v54 = vunpack.c.h.bf16 %v2683_v26  ;;  %v2395_v5 = vpack.i.bf16 %v1030_v49, %v2985_v2  ;;  %v2208_v7 = vunpack.i.l.bf16 %v2991_v47 }
  0xae   : > { %v733_v19 = vsel %vm702_vm0, %v3668_v46, %v2204_v41  ;;  %v711_v63 = vsel %vm702_vm0, %v3669_v32, %v2203_v60  ;;  %v710_v34 = vsel %vm702_vm0, %v3670_v51, %v2199_v35  ;;  %v3673_v41 = vunpack.c.l.bf16 %v2683_v26 }
  0xaf   : > { %v709_v4 = vsel %vm702_vm0, %v3671_v8, %v2198_v11  ;;  %v713_v15 = vsel %vm702_vm0, %v3672_v54, %v2214_v22  ;;  %v2400_v35 = vpack.i.bf16 %v1070_v6, %v1068_v10  ;;  %v2232_v3 = vpop.permute.xlu1 %2231  ;;  %v1073_v32 = vsel %vm1025_vm3, %v1071_v33, %v1072_v27 }
  0xb0   : > { %v3034_v60 = vsel %vm702_vm0, %v3673_v41, %v2213_v53  ;;  %v2227_v18 = vpop.permute.xlu0 %2226  ;;  %v2233_v38 = vunpack.i.l.bf16 %v2232_v3  ;;  %v2234_v11 = vunpack.i.h.bf16 %v2232_v3  ;;  %v1075_v22 = vsel %vm1025_vm3, %v1072_v27, %v1074_v62  ;;  %2396 = vrot.lane.b32.xlu0 %v2395_v5, %s2565_s6 }
  0xb1   : > { %v2229_v45 = vunpack.i.h.bf16 %v2227_v18  ;;  %v2228_v46 = vunpack.i.l.bf16 %v2227_v18  ;;  %v2224_v51 = vunpack.i.h.bf16 %v2222_v37  ;;  %2401 = vrot.lane.b32.xlu1 %v2400_v35, %s2565_s6  ;;  %v1035_v49 = vsel %vm1025_vm3, %v1032_v61, %v1034_v23 }
  0xb2   : > { %v3043_v26 = vsel %vm751_vm1, %v711_v63, %v2233_v38  ;;  %v2223_v47 = vunpack.i.l.bf16 %v2222_v37  ;;  %v2219_v53 = vunpack.i.h.bf16 %v3005_v13  ;;  %v2218_v10 = vunpack.i.l.bf16 %v3005_v13  ;;  %v3060_v37 = vld [vmem:[%s3620_s1 + $0x10] ss:$0 sps:$4 sm:$0xff]  }
  0xb3   : > { %v3046_v2 = vsel %vm751_vm1, %v709_v4, %v2228_v46  ;;  %v1033_v27 = vsel %vm1025_vm3, %v1031_v40, %v1032_v61  ;;  %v2242_v62 = vpop.permute.xlu1 %2241  ;;  %v862_v6 = vrot.slane %v3043_v26, 1  ;;  %v3054_v8 = vsel %vm751_vm1, %v710_v34, %v2229_v45  ;;  %2104 = vmatprep.subr.msk.bf16.mxu0 %vm1393_vm4, %v3060_v37  ;;  %2105 = vmatprep.subr.msk.bf16.mxu1 %vm1393_vm4, %v3060_v37 }
  0xb4   : > { %3674 = vst [vmem:[#allocation4_spill] sm:$0xff] %v3046_v2  ;;  %v2237_v33 = vpop.permute.xlu0 %2236  ;;  %v859_v63 = vrot.slane %v3046_v2, 1  ;;  %v2410_v4 = vpack.i.bf16 %v1075_v22, %v1073_v32  ;;  %v3675_v23 = vunpack.c.l.bf16 %v2648_v14  ;;  %v3066_v40 = vsel %vm751_vm1, %v733_v19, %v2234_v11 }
  0xb5   : > { %3676 = vst [vmem:[#allocation5_spill] sm:$0xff] %v3066_v40  ;;  %v860_v61 = vrot.slane %v3054_v8, 1  ;;  %v2405_v54 = vpack.i.bf16 %v1035_v49, %v1033_v27  ;;  %v2244_v34 = vunpack.i.h.bf16 %v2242_v62  ;;  %v2239_v41 = vunpack.i.h.bf16 %v2237_v33 }
  0xb6   : > { %v735_v13 = vsel %vm702_vm0, %v3675_v23, %v2209_v36  ;;  %2411 = vrot.lane.b32.xlu1 %v2410_v4, %s2565_s6  ;;  %v2238_v35 = vunpack.i.l.bf16 %v2237_v33  ;;  %v3677_v3 = vunpack.c.h.bf16 %v2640_v9  ;;  %v3678_v14 = vunpack.c.l.bf16 %v2693_v30 }
  0xb7   : > { %v3679_v19 = vunpack.c.h.bf16 %v2690_v29  ;;  %v3680_v38 = vunpack.c.l.bf16 %v2690_v29  ;;  %2406 = vrot.lane.b32.xlu0 %v2405_v54, %s2565_s6  ;;  %v2252_v46 = vpop.permute.xlu1 %2251  ;;  %v3681_v9 = vunpack.c.l.bf16 %v2696_v31  ;;  %v2243_v32 = vunpack.i.l.bf16 %v2242_v62 }
  0xb8   : > { %v734_v18 = vsel %vm702_vm0, %v3677_v3, %v2208_v7  ;;  %v738_v36 = vsel %vm702_vm0, %v3678_v14, %v2224_v51  ;;  %v2247_v11 = vpop.permute.xlu0 %2246  ;;  %v861_v30 = vsel %vm848_vm2, %v859_v63, %v860_v61  ;;  %v863_v22 = vsel %vm848_vm2, %v860_v61, %v862_v6 }
  0xb9   : > { %v737_v5 = vsel %vm702_vm0, %v3679_v19, %v2223_v47  ;;  %v736_v45 = vsel %vm702_vm0, %v3680_v38, %v2219_v53  ;;  %v714_v7 = vsel %vm702_vm0, %v3681_v9, %v2218_v10  ;;  %v899_v29 = vrot.slane %v3066_v40, 1 }
  0xba   : > { %v1036_v51 = vrot.slane %v3046_v2, 2  ;;  %v1037_v49 = vrot.slane %v3054_v8, 2  ;;  %v3096_v31 = vsel %vm751_vm1, %v734_v18, %v2238_v35  ;;  %v1039_v47 = vrot.slane %v3043_v26, 2 }
  0xbb   : > { %3682 = vst [vmem:[#allocation6_spill] sm:$0xff] %v3096_v31  ;;  %v3100_v53 = vsel %vm751_vm1, %v713_v15, %v2244_v34  ;;  %v3103_v10 = vsel %vm751_vm1, %v735_v13, %v2239_v41  ;;  %v2254_v27 = vunpack.i.h.bf16 %v2252_v46  ;;  %v2253_v62 = vunpack.i.l.bf16 %v2252_v46  ;;  %v2262_v4 = vpop.permute.xlu1 %2261 }
  0xbc   : > { %v2249_v33 = vunpack.i.h.bf16 %v2247_v11  ;;  %v2248_v6 = vunpack.i.l.bf16 %v2247_v11  ;;  %v2415_v63 = vpack.i.bf16 %v863_v22, %v861_v30  ;;  %v2257_v23 = vpop.permute.xlu0 %2256  ;;  %v1076_v61 = vrot.slane %v3066_v40, 2 }
  0xbd   : > { %v3108_v54 = vsel %vm751_vm1, %v3034_v60, %v2243_v32  ;;  %v900_v26 = vrot.slane %v3096_v31, 1  ;;  %v3112_v15 = vsel %vm751_vm1, %v738_v36, %v2254_v27  ;;  %v902_v13 = vrot.slane %v3103_v10, 1 }
  0xbe   : > { %v3116_v34 = vsel %vm751_vm1, %v737_v5, %v2253_v62  ;;  %v3119_v41 = vsel %vm751_vm1, %v714_v7, %v2248_v6  ;;  %2416 = vrot.lane.b32.xlu0 %v2415_v63, %s2564_s28  ;;  %v3123_v35 = vsel %vm1025_vm3, %v1036_v51, %v1037_v49  ;;  %v865_v60 = vrot.slane %v3100_v53, 1 }
  0xbf   : > { %v905_v18 = vrot.slane %v3116_v34, 1  ;;  %v3129_v14 = vsel %vm751_vm1, %v736_v45, %v2249_v33  ;;  %v864_v36 = vrot.slane %v3108_v54, 1  ;;  %v907_v5 = vrot.slane %v3112_v15, 1  ;;  %v2272_v46 = vpop.permute.xlu1 %2271 }
  0xc0   : > { %v904_v38 = vrot.slane %v3129_v14, 1  ;;  %v2267_v11 = vpop.permute.xlu0 %2266  ;;  %v1077_v9 = vrot.slane %v3096_v31, 2  ;;  %v1079_v7 = vrot.slane %v3103_v10, 2  ;;  %v867_v32 = vrot.slane %v3119_v41, 1 }
  0xc1   : > { %v901_v30 = vsel %vm848_vm2, %v899_v29, %v900_v26  ;;  %v2264_v45 = vunpack.i.h.bf16 %v2262_v4  ;;  %v2263_v22 = vunpack.i.l.bf16 %v2262_v4  ;;  %v2259_v51 = vunpack.i.h.bf16 %v2257_v23 }
  0xc2   : > { %v903_v27 = vsel %vm848_vm2, %v900_v26, %v902_v13  ;;  %v1082_v62 = vrot.slane %v3116_v34, 2  ;;  %v1084_v33 = vrot.slane %v3112_v15, 2  ;;  %v906_v63 = vsel %vm848_vm2, %v904_v38, %v905_v18 }
  0xc3   : > { %v2420_v6 = vpack.i.bf16 %v903_v27, %v901_v30  ;;  %v2258_v19 = vunpack.i.l.bf16 %v2257_v23  ;;  %v2274_v3 = vunpack.i.h.bf16 %v2272_v46  ;;  %v2273_v40 = vunpack.i.l.bf16 %v2272_v46  ;;  %v2282_v31 = vpop.permute.xlu1 %2281 }
  0xc4   : > { %v908_v10 = vsel %vm848_vm2, %v905_v18, %v907_v5  ;;  %v2277_v2 = vpop.permute.xlu0 %2276  ;;  %v2269_v29 = vunpack.i.h.bf16 %v2267_v11  ;;  %v866_v26 = vsel %vm848_vm2, %v864_v36, %v865_v60  ;;  %v868_v13 = vsel %vm848_vm2, %v865_v60, %v867_v32 }
  0xc5   : > { %2421 = vrot.lane.b32.xlu1 %v2420_v6, %s2564_s28  ;;  %v2430_v4 = vpack.i.bf16 %v908_v10, %v906_v63  ;;  %v1044_v15 = vrot.slane %v3119_v41, 2  ;;  %v1081_v30 = vrot.slane %v3129_v14, 2  ;;  %v3683_v23 = vunpack.c.l.bf16 %v2726_v42 }
  0xc6   : > { %v2425_v46 = vpack.i.bf16 %v868_v13, %v866_v26  ;;  %v3684_v18 = vunpack.c.l.bf16 %v2732_v44  ;;  %v3685_v27 = vunpack.c.h.bf16 %v2719_v39  ;;  %v2268_v36 = vunpack.i.l.bf16 %v2267_v11 }
  0xc7   : > { %v739_v38 = vsel %vm702_vm0, %v3683_v23, %v2264_v45  ;;  %v1040_v60 = vsel %vm1025_vm3, %v1037_v49, %v1039_v47  ;;  %v3686_v41 = vunpack.c.l.bf16 %v2719_v39  ;;  %v2284_v63 = vunpack.i.h.bf16 %v2282_v31  ;;  %v2292_v10 = vpop.permute.xlu1 %2291 }
  0xc8   : > { %v717_v5 = vsel %vm702_vm0, %v3684_v18, %v2263_v22  ;;  %v716_v6 = vsel %vm702_vm0, %v3685_v27, %v2259_v51  ;;  %2426 = vrot.lane.b32.xlu0 %v2425_v46, %s2564_s28  ;;  %v1078_v45 = vsel %vm1025_vm3, %v1076_v61, %v1077_v9  ;;  %v1080_v44 = vsel %vm1025_vm3, %v1077_v9, %v1079_v7  ;;  %v2287_v22 = vpop.permute.xlu0 %2286 }
  0xc9   : > { %v715_v32 = vsel %vm702_vm0, %v3686_v41, %v2258_v19  ;;  %v3687_v26 = vunpack.c.h.bf16 %v2755_v52  ;;  %v3688_v11 = vunpack.c.l.bf16 %v2755_v52  ;;  %v3689_v39 = vunpack.c.l.bf16 %v2729_v43  ;;  %2431 = vrot.lane.b32.xlu1 %v2430_v4, %s2564_s28 }
  0xca   : > { %v2293_v19 = vunpack.i.l.bf16 %v2292_v10  ;;  %v2435_v61 = vpack.i.bf16 %v1040_v60, %v3123_v35  ;;  %v2294_v9 = vunpack.i.h.bf16 %v2292_v10  ;;  %v2289_v7 = vunpack.i.h.bf16 %v2287_v22 }
  0xcb   : > { %v719_v51 = vsel %vm702_vm0, %v3687_v26, %v2274_v3  ;;  %v718_v49 = vsel %vm702_vm0, %v3688_v11, %v2273_v40  ;;  %v741_v47 = vsel %vm702_vm0, %v3689_v39, %v2269_v29  ;;  %v2288_v13 = vunpack.i.l.bf16 %v2287_v22  ;;  %v2302_v35 = vpop.permute.xlu1 %2301 }
  0xcc   : > { %v3690_v23 = vunpack.c.h.bf16 %v2726_v42  ;;  %v2440_v46 = vpack.i.bf16 %v1080_v44, %v1078_v45  ;;  %v1083_v52 = vsel %vm1025_vm3, %v1081_v30, %v1082_v62  ;;  %v1085_v40 = vsel %vm1025_vm3, %v1082_v62, %v1084_v33  ;;  %2436 = vrot.lane.b32.xlu0 %v2435_v61, %s2565_s6  ;;  %v2297_v60 = vpop.permute.xlu0 %2296 }
  0xcd   : > { %v3691_v43 = vunpack.c.l.bf16 %v2765_v56  ;;  %v2283_v4 = vunpack.i.l.bf16 %v2282_v31  ;;  %v2279_v18 = vunpack.i.h.bf16 %v2277_v2  ;;  %v2278_v27 = vunpack.i.l.bf16 %v2277_v2 }
  0xce   : > { %v740_v3 = vsel %vm702_vm0, %v3690_v23, %v2268_v36  ;;  %2441 = vrot.lane.b32.xlu1 %v2440_v46, %s2565_s6  ;;  %v3187_v42 = vsel %vm751_vm1, %v717_v5, %v2293_v19  ;;  %v3190_v30 = vsel %vm751_vm1, %v715_v32, %v2288_v13  ;;  %v3193_v62 = vsel %vm751_vm1, %v716_v6, %v2289_v7 }
  0xcf   : > { %v744_v29 = vsel %vm702_vm0, %v3691_v43, %v2284_v63  ;;  %v3692_v56 = vrot.slane %v3100_v53, 2  ;;  %v3199_v2 = vsel %vm751_vm1, %v739_v38, %v2294_v9  ;;  %v2450_v33 = vpack.i.bf16 %v1085_v40, %v1083_v52  ;;  %v2312_v39 = vpop.permute.xlu1 %2311 }
  0xd0   : > { %v3694_v41 = vrot.slane %v3108_v54, 2  ;;  %v2304_v63 = vunpack.i.h.bf16 %v2302_v35  ;;  %v869_v32 = vrot.slane %v3190_v30, 1  ;;  %v870_v6 = vrot.slane %v3193_v62, 1  ;;  %v2307_v19 = vpop.permute.xlu0 %2306 }
  0xd1   : > { %v1045_v31 = vsel %vm1025_vm3, %v3692_v56, %v1044_v15  ;;  %v3693_v36 = vmov %v3692_v56  ;;  %v2299_v44 = vunpack.i.h.bf16 %v2297_v60  ;;  %v3695_v10 = vunpack.c.h.bf16 %v2762_v55 }
  0xd2   : > { %v1043_v5 = vsel %vm1025_vm3, %v3694_v41, %v3693_v36  ;;  %v3696_v38 = vunpack.c.l.bf16 %v2762_v55  ;;  %v2303_v26 = vunpack.i.l.bf16 %v2302_v35  ;;  %v2298_v11 = vunpack.i.l.bf16 %v2297_v60  ;;  %2451 = vrot.lane.b32.xlu1 %v2450_v33, %s2565_s6 }
  0xd3   : > { %v2445_v45 = vpack.i.bf16 %v1045_v31, %v1043_v5  ;;  %v743_v15 = vsel %vm702_vm0, %v3695_v10, %v2283_v4  ;;  %v3697_v61 = vunpack.c.l.bf16 %v2768_v57  ;;  %v872_v7 = vrot.slane %v3187_v42, 1 }
  0xd4   : > { %v742_v22 = vsel %vm702_vm0, %v3696_v38, %v2279_v18  ;;  %v2314_v13 = vunpack.i.h.bf16 %v2312_v39  ;;  %v2313_v23 = vunpack.i.l.bf16 %v2312_v39  ;;  %v909_v55 = vrot.slane %v3199_v2, 1  ;;  %v2317_v56 = vpop.permute.xlu0 %2316 }
  0xd5   : > { %v720_v9 = vsel %vm702_vm0, %v3697_v61, %v2278_v27  ;;  %2446 = vrot.lane.b32.xlu0 %v2445_v45, %s2565_s6  ;;  %v1049_v46 = vrot.slane %v3187_v42, 2  ;;  %v3223_v52 = vsel %vm751_vm1, %v740_v3, %v2298_v11  ;;  %v790_v40 = vsel %vm751_vm1, %v741_v47, %v2299_v44  ;;  %v2322_v47 = vpop.permute.xlu1 %2321 }
  0xd6   : > { %v1086_v57 = vrot.slane %v3199_v2, 2  ;;  %v1046_v43 = vrot.slane %v3190_v30, 2  ;;  %v3229_v4 = vsel %vm751_vm1, %v719_v51, %v2304_v63  ;;  %v871_v18 = vsel %vm848_vm2, %v869_v32, %v870_v6 }
  0xd7   : > { %v3233_v27 = vsel %vm751_vm1, %v718_v49, %v2303_v26  ;;  %v3236_v35 = vsel %vm751_vm1, %v743_v15, %v2313_v23  ;;  %v3239_v3 = vsel %vm751_vm1, %v744_v29, %v2314_v13  ;;  %v2309_v60 = vunpack.i.h.bf16 %v2307_v19 }
  0xd8   : > { %v910_v31 = vrot.slane %v3223_v52, 1  ;;  %v912_v33 = vrot.slane %v790_v40, 1  ;;  %v2308_v36 = vunpack.i.l.bf16 %v2307_v19  ;;  %v873_v51 = vsel %vm848_vm2, %v870_v6, %v872_v7  ;;  %v3259_v26 = vpop.permute.xlu0 %2326 }
  0xd9   : > { %v1047_v41 = vrot.slane %v3193_v62, 2  ;;  %v875_v49 = vrot.slane %v3229_v4, 1  ;;  %v3246_v5 = vsel %vm751_vm1, %v742_v22, %v2309_v60  ;;  %v2455_v63 = vpack.i.bf16 %v873_v51, %v871_v18  ;;  %v2332_v22 = vpop.permute.xlu1 %2331 }
  0xda   : > { %v915_v29 = vrot.slane %v3236_v35, 1  ;;  %v917_v32 = vrot.slane %v3239_v3, 1  ;;  %v3251_v45 = vsel %vm751_vm1, %v720_v9, %v2308_v36  ;;  %v914_v44 = vrot.slane %v3246_v5, 1 }
  0xdb   : > { %v874_v10 = vrot.slane %v3233_v27, 1  ;;  %v1087_v38 = vrot.slane %v3223_v52, 2  ;;  %2456 = vrot.lane.b32.xlu0 %v2455_v63, %s2564_s28  ;;  %v1089_v11 = vrot.slane %v790_v40, 2  ;;  %v877_v39 = vrot.slane %v3251_v45, 1 }
  0xdc   : > { %v911_v19 = vsel %vm848_vm2, %v909_v55, %v910_v31  ;;  %v913_v61 = vsel %vm848_vm2, %v910_v31, %v912_v33  ;;  %v1092_v9 = vrot.slane %v3236_v35, 2  ;;  %v2324_v7 = vunpack.i.h.bf16 %v2322_v47  ;;  %v2337_v31 = vpop.permute.xlu0 %2336 }
  0xdd   : > { %v2323_v13 = vunpack.i.l.bf16 %v2322_v47  ;;  %v2460_v23 = vpack.i.bf16 %v913_v61, %v911_v19  ;;  %v1094_v18 = vrot.slane %v3239_v3, 2  ;;  %v2319_v60 = vunpack.i.h.bf16 %v2317_v56  ;;  %v2342_v15 = vpop.permute.xlu1 %2341 }
  0xde   : > { %v916_v36 = vsel %vm848_vm2, %v914_v44, %v915_v29  ;;  %v918_v51 = vsel %vm848_vm2, %v915_v29, %v917_v32  ;;  %v2318_v63 = vunpack.i.l.bf16 %v2317_v56  ;;  %v2334_v40 = vunpack.i.h.bf16 %v2332_v22 }
  0xdf   : > { %2461 = vrot.lane.b32.xlu1 %v2460_v23, %s2564_s28  ;;  %v2333_v6 = vunpack.i.l.bf16 %v2332_v22  ;;  %v2470_v55 = vpack.i.bf16 %v918_v51, %v916_v36  ;;  %v1091_v33 = vrot.slane %v3246_v5, 2  ;;  %v2329_v47 = vunpack.i.h.bf16 %v3259_v26 }
  0xe0   : > { %v876_v19 = vsel %vm848_vm2, %v874_v10, %v875_v49  ;;  %v878_v3 = vsel %vm848_vm2, %v875_v49, %v877_v39  ;;  %v1054_v44 = vrot.slane %v3251_v45, 2  ;;  %v3698_v29 = vunpack.c.l.bf16 %v2798_v20 }
  0xe1   : > { %v3699_v32 = vunpack.c.l.bf16 %v2804_v24  ;;  %v2465_v61 = vpack.i.bf16 %v878_v3, %v876_v19  ;;  %v3700_v23 = vunpack.c.h.bf16 %v2791_v1  ;;  %v1088_v51 = vsel %vm1025_vm3, %v1086_v57, %v1087_v38  ;;  %v2352_v57 = vpop.permute.xlu1 %2351 }
  0xe2   : > { %v745_v56 = vsel %vm702_vm0, %v3698_v29, %v2324_v7  ;;  %v1090_v10 = vsel %vm1025_vm3, %v1087_v38, %v1089_v11  ;;  %v1048_v49 = vsel %vm1025_vm3, %v1046_v43, %v1047_v41  ;;  %v3701_v45 = vunpack.c.l.bf16 %v2791_v1  ;;  %v2347_v43 = vpop.permute.xlu0 %2346 }
  0xe3   : > { %v723_v22 = vsel %vm702_vm0, %v3699_v32, %v2323_v13  ;;  %v722_v36 = vsel %vm702_vm0, %v3700_v23, %v2319_v60  ;;  %v3702_v7 = vunpack.c.h.bf16 %v2827_v59  ;;  %v3703_v13 = vunpack.c.l.bf16 %v2827_v59  ;;  %2471 = vrot.lane.b32.xlu1 %v2470_v55, %s2564_s28  ;;  %2466 = vrot.lane.b32.xlu0 %v2465_v61, %s2564_s28 }
  0xe4   : > { %v721_v39 = vsel %vm702_vm0, %v3701_v45, %v2318_v63  ;;  %v2328_v60 = vunpack.i.l.bf16 %v3259_v26  ;;  %v3704_v1 = vunpack.c.l.bf16 %v2801_v21  ;;  %v1050_v11 = vsel %vm1025_vm3, %v1047_v41, %v1049_v46 }
  0xe5   : > { %v725_v24 = vsel %vm702_vm0, %v3702_v7, %v2334_v40  ;;  %v724_v19 = vsel %vm702_vm0, %v3703_v13, %v2333_v6  ;;  %v2354_v63 = vunpack.i.h.bf16 %v2352_v57  ;;  %v2353_v59 = vunpack.i.l.bf16 %v2352_v57  ;;  %v2362_v46 = vpop.permute.xlu1 %2361 }
  0xe6   : > { %v747_v38 = vsel %vm702_vm0, %v3704_v1, %v2329_v47  ;;  %v2480_v40 = vpack.i.bf16 %v1090_v10, %v1088_v51  ;;  %v2475_v6 = vpack.i.bf16 %v1050_v11, %v1048_v49  ;;  %v2349_v3 = vunpack.i.h.bf16 %v2347_v43  ;;  %v2357_v41 = vpop.permute.xlu0 %2356 }
  0xe7   : > { %v2348_v26 = vunpack.i.l.bf16 %v2347_v43  ;;  %v2344_v29 = vunpack.i.h.bf16 %v2342_v15  ;;  %v3305_v55 = vsel %vm751_vm1, %v723_v22, %v2353_v59  ;;  %v1093_v32 = vsel %vm1025_vm3, %v1091_v33, %v1092_v9 }
  0xe8   : > { %v1095_v21 = vsel %vm1025_vm3, %v1092_v9, %v1094_v18  ;;  %v2343_v61 = vunpack.i.l.bf16 %v2342_v15  ;;  %v2339_v47 = vunpack.i.h.bf16 %v2337_v31  ;;  %v2338_v23 = vunpack.i.l.bf16 %v2337_v31  ;;  %2481 = vrot.lane.b32.xlu1 %v2480_v40, %s2565_s6  ;;  %2476 = vrot.lane.b32.xlu0 %v2475_v6, %s2565_s6 }
  0xe9   : > { %v3312_v42 = vsel %vm751_vm1, %v745_v56, %v2354_v63  ;;  %v3315_v51 = vsel %vm751_vm1, %v721_v39, %v2348_v26  ;;  %v3318_v22 = vsel %vm751_vm1, %v722_v36, %v2349_v3  ;;  %v3705_v9 = vrot.slane %v3229_v4, 2  ;;  %v2372_v40 = vpop.permute.xlu1 %2371 }
  0xea   : > { %v3706_v15 = vrot.slane %v3233_v27, 2  ;;  %v882_v56 = vrot.slane %v3305_v55, 1  ;;  %v879_v10 = vrot.slane %v3315_v51, 1  ;;  %v880_v49 = vrot.slane %v3318_v22, 1 }
  0xeb   : > { %v3707_v31 = vmov %v3705_v9  ;;  %v2490_v45 = vpack.i.bf16 %v1095_v21, %v1093_v32  ;;  %v2364_v36 = vunpack.i.h.bf16 %v2362_v46  ;;  %v2363_v7 = vunpack.i.l.bf16 %v2362_v46 }
  0xec   : > { %v1053_v18 = vsel %vm1025_vm3, %v3706_v15, %v3705_v9  ;;  %v1055_v33 = vsel %vm1025_vm3, %v3707_v31, %v1054_v44  ;;  %v2359_v13 = vunpack.i.h.bf16 %v2357_v41  ;;  %v3708_v57 = vunpack.c.h.bf16 %v2798_v20 }
  0xed   : > { %v2485_v39 = vpack.i.bf16 %v1055_v33, %v1053_v18  ;;  %v3709_v1 = vunpack.c.l.bf16 %v2837_v17  ;;  %v3710_v44 = vunpack.c.h.bf16 %v2834_v16  ;;  %2491 = vrot.lane.b32.xlu1 %v2490_v45, %s2565_s6  ;;  %v2358_v59 = vunpack.i.l.bf16 %v2357_v41 }
  0xee   : > { %v746_v43 = vsel %vm702_vm0, %v3708_v57, %v2328_v60  ;;  %v3711_v6 = vunpack.c.l.bf16 %v2834_v16  ;;  %v3712_v20 = vunpack.c.l.bf16 %v2840_v25  ;;  %v796_v17 = vsel %vm751_vm1, %v747_v38, %v2359_v13 }
  0xef   : > { %v750_v11 = vsel %vm702_vm0, %v3709_v1, %v2344_v29  ;;  %v749_v63 = vsel %vm702_vm0, %v3710_v44, %v2343_v61  ;;  %2486 = vrot.lane.b32.xlu0 %v2485_v39, %s2565_s6  ;;  %v2374_v26 = vunpack.i.h.bf16 %v2372_v40  ;;  %v2367_v29 = vpop.permute.xlu0 %2366  ;;  %v919_v32 = vrot.slane %v3312_v42, 1 }
  0xf0   : > { %v748_v3 = vsel %vm702_vm0, %v3711_v6, %v2339_v47  ;;  %v726_v60 = vsel %vm702_vm0, %v3712_v20, %v2338_v23  ;;  %v1059_v21 = vrot.slane %v3305_v55, 2  ;;  %v3352_v61 = vsel %vm751_vm1, %v724_v19, %v2363_v7 }
  0xf1   : > { %v881_v16 = vsel %vm848_vm2, %v879_v10, %v880_v49  ;;  %v3356_v47 = vsel %vm751_vm1, %v725_v24, %v2364_v36  ;;  %v3359_v25 = vsel %vm751_vm1, %v746_v43, %v2358_v59  ;;  %v2373_v23 = vunpack.i.l.bf16 %v2372_v40 }
  0xf2   : > { %v883_v38 = vsel %vm848_vm2, %v880_v49, %v882_v56  ;;  %v920_v46 = vrot.slane %v3359_v25, 1  ;;  %v922_v41 = vrot.slane %v796_v17, 1  ;;  %v799_v9 = vsel %vm751_vm1, %v750_v11, %v2374_v26 }
  0xf3   : > { %v2369_v55 = vunpack.i.h.bf16 %v2367_v29  ;;  %v884_v19 = vrot.slane %v3352_v61, 1  ;;  %v3366_v15 = vsel %vm751_vm1, %v749_v63, %v2373_v23  ;;  %v927_v18 = vrot.slane %v799_v9, 1 }
  0xf4   : > { %v2368_v24 = vunpack.i.l.bf16 %v2367_v29  ;;  %v885_v31 = vrot.slane %v3356_v47, 1  ;;  %v925_v33 = vrot.slane %v3366_v15, 1  ;;  %v2495_v56 = vpack.i.bf16 %v883_v38, %v881_v16 }
  0xf5   : > { %v3371_v10 = vsel %vm751_vm1, %v748_v3, %v2369_v55  ;;  %v1056_v49 = vrot.slane %v3315_v51, 2  ;;  %v921_v36 = vsel %vm848_vm2, %v919_v32, %v920_v46  ;;  %v1057_v7 = vrot.slane %v3318_v22, 2 }
  0xf6   : > { %v775_v45 = vsel %vm751_vm1, %v726_v60, %v2368_v24  ;;  %v924_v39 = vrot.slane %v3371_v10, 1  ;;  %2496 = vrot.lane.b32.xlu0 %v2495_v56, %s2564_s28  ;;  %v923_v57 = vsel %vm848_vm2, %v920_v46, %v922_v41  ;;  %v928_v43 = vsel %vm848_vm2, %v925_v33, %v927_v18 }
  0xf7   : > { %v887_v13 = vrot.slane %v775_v45, 1  ;;  %v2500_v1 = vpack.i.bf16 %v923_v57, %v921_v36  ;;  %v1097_v44 = vrot.slane %v3359_v25, 2  ;;  %v1099_v63 = vrot.slane %v796_v17, 2 }
  0xf8   : > { %v926_v11 = vsel %vm848_vm2, %v924_v39, %v925_v33  ;;  %v886_v59 = vsel %vm848_vm2, %v884_v19, %v885_v31  ;;  %v1096_v6 = vrot.slane %v3312_v42, 2  ;;  %v1064_v60 = vrot.slane %v775_v45, 2 }
  0xf9   : > { %v888_v40 = vsel %vm848_vm2, %v885_v31, %v887_v13  ;;  %2501 = vrot.lane.b32.xlu1 %v2500_v1, %s2564_s28  ;;  %v2510_v3 = vpack.i.bf16 %v928_v43, %v926_v11  ;;  %v1058_v26 = vsel %vm1025_vm3, %v1056_v49, %v1057_v7  ;;  %v1060_v29 = vsel %vm1025_vm3, %v1057_v7, %v1059_v21 }
  0xfa   : > { %v2505_v20 = vpack.i.bf16 %v888_v40, %v886_v59  ;;  %v1395_v32 = vsel %vm1393_vm4, %v3060_v37, 0  ;;  %v1061_v17 = vrot.slane %v3352_v61, 2  ;;  %v1062_v16 = vrot.slane %v3356_v47, 2 }
  0xfb   : > { %v1104_v23 = vrot.slane %v799_v9, 2  ;;  %2065 = vmatpush3.bf16.msra.mxu0 %v1395_v32  ;;  %v1102_v38 = vrot.slane %v3366_v15, 2  ;;  %v1101_v46 = vrot.slane %v3371_v10, 2  ;;  %v1098_v41 = vsel %vm1025_vm3, %v1096_v6, %v1097_v44  ;;  %2103 = vmatpush3.bf16.msra.mxu1 %v1395_v32 }
  0xfc   : > { %2506 = vrot.lane.b32.xlu0 %v2505_v20, %s2564_s28  ;;  %v1100_v55 = vsel %vm1025_vm3, %v1097_v44, %v1099_v63  ;;  %v2515_v37 = vpack.i.bf16 %v1060_v29, %v1058_v26  ;;  %v1065_v21 = vsel %vm1025_vm3, %v1062_v16, %v1064_v60  ;;  %v1063_v24 = vsel %vm1025_vm3, %v1061_v17, %v1062_v16 }
  0xfd   : > { %2511 = vrot.lane.b32.xlu1 %v2510_v3, %s2564_s28  ;;  %v2520_v19 = vpack.i.bf16 %v1100_v55, %v1098_v41  ;;  %v1103_v9 = vsel %vm1025_vm3, %v1101_v46, %v1102_v38  ;;  %v1105_v18 = vsel %vm1025_vm3, %v1102_v38, %v1104_v23  ;;  %v2525_v31 = vpack.i.bf16 %v1065_v21, %v1063_v24 }
  0xfe   : > { %v2530_v33 = vpack.i.bf16 %v1105_v18, %v1103_v9  ;;  %v3713_v18 = vld [vmem:[#allocation3_spill] sm:$0xff] }
 0x100   : > { %2516 = vrot.lane.b32.xlu0 %v2515_v37, %s2565_s6 }
 0x101   : > { %2521 = vrot.lane.b32.xlu1 %v2520_v19, %s2565_s6 }
 0x104   : > { %2526 = vrot.lane.b32.xlu0 %v2525_v31, %s2565_s6 }
 0x105   : > { %2531 = vrot.lane.b32.xlu1 %v2530_v33, %s2565_s6 }
 0x116   : > { %v2377_v56 = vpop.permute.xlu0 %2376 }
 0x117   : > { %v2379_v45 = vunpack.i.h.bf16 %v2377_v56  ;;  %v2378_v39 = vunpack.i.l.bf16 %v2377_v56  ;;  %v3714_v56 = vld [vmem:[#allocation2_spill] sm:$0xff] }
 0x119   : > { %v1203_v44 = vsel %vm1202_vm5, %v2906_v48, %v2378_v39  ;;  %v1204_v63 = vsel %vm1202_vm5, %v2909_v50, %v2379_v45 }
 0x11a   : > { %v2382_v49 = vpop.permute.xlu1 %2381 }
 0x11b   : > { %v2384_v36 = vunpack.i.h.bf16 %v2382_v49  ;;  %v2383_v7 = vunpack.i.l.bf16 %v2382_v49 }
 0x11d   : > { %v1219_v59 = vsel %vm1202_vm5, %v2933_v58, %v2383_v7  ;;  %v1220_v40 = vsel %vm1202_vm5, %v2939_v0, %v2384_v36 }
 0x11e   : > { %v2392_v13 = vpop.permute.xlu1 %2391  ;;  %v2387_v57 = vpop.permute.xlu0 %2386 }
 0x11f   : > { %v2394_v43 = vunpack.i.h.bf16 %v2392_v13  ;;  %v2393_v29 = vunpack.i.l.bf16 %v2392_v13  ;;  %v2389_v32 = vunpack.i.h.bf16 %v2387_v57  ;;  %v2388_v17 = vunpack.i.l.bf16 %v2387_v57 }
 0x121   : > { %v1222_v26 = vsel %vm1202_vm5, %v2964_v28, %v2394_v43  ;;  %v1221_v9 = vsel %vm1202_vm5, %v2973_v12, %v2393_v29  ;;  %v1206_v24 = vsel %vm1202_vm5, %v3713_v18, %v2389_v32  ;;  %v1205_v49 = vsel %vm1202_vm5, %v3714_v56, %v2388_v17  ;;  %v3715_v29 = vld [vmem:[#allocation4_spill] sm:$0xff] }
 0x122   : > { %v2397_v11 = vpop.permute.xlu0 %2396 }
 0x123   : > { %v2402_v1 = vpop.permute.xlu1 %2401  ;;  %v2399_v20 = vunpack.i.h.bf16 %v2397_v11  ;;  %v2398_v60 = vunpack.i.l.bf16 %v2397_v11 }
 0x124   : > { %v2404_v6 = vunpack.i.h.bf16 %v2402_v1  ;;  %v2403_v3 = vunpack.i.l.bf16 %v2402_v1 }
 0x125   : > { %v1236_v48 = vsel %vm1235_vm6, %v1203_v44, %v2398_v60  ;;  %v1237_v50 = vsel %vm1235_vm6, %v1204_v63, %v2399_v20 }
 0x126   : > { %v1252_v16 = vsel %vm1235_vm6, %v1219_v59, %v2403_v3  ;;  %v1253_v58 = vsel %vm1235_vm6, %v1220_v40, %v2404_v6  ;;  %v1269_v0 = vsel %vm1268_vm7, %v1236_v48, 0.0  ;;  %v1270_v38 = vsel %vm1268_vm7, %v1237_v50, 0.0  ;;  %v3716_v48 = vld [vmem:[#allocation6_spill] sm:$0xff] }
 0x127   : > { %v1285_v46 = vsel %vm1268_vm7, %v1252_v16, 0.0  ;;  %v1286_v28 = vsel %vm1268_vm7, %v1253_v58, 0.0  ;;  %v1301_v21 = vpack.c.bf16 %v1270_v38, %v1269_v0  ;;  %v3717_v38 = vld [vmem:[#allocation5_spill] sm:$0xff] }
 0x128   : > { %v2412_v23 = vpop.permute.xlu1 %2411  ;;  %v1309_v19 = vpack.c.bf16 %v1286_v28, %v1285_v46 }
 0x129   : > { %v2414_v41 = vunpack.i.h.bf16 %v2412_v23  ;;  %v2413_v55 = vunpack.i.l.bf16 %v2412_v23  ;;  %v2407_v37 = vpop.permute.xlu0 %2406  ;;  %2066 = vmatprep.mubr.msk.bf16.mxu0 %vm1344_vm8, %v1301_v21 }
 0x12a   : > { %v2409_v31 = vunpack.i.h.bf16 %v2407_v37  ;;  %v2408_v33 = vunpack.i.l.bf16 %v2407_v37  ;;  %2082 = vmatprep.mubr.msk.bf16.mxu1 %vm1344_vm8, %v1309_v19 }
 0x12b   : > { %v1254_v45 = vsel %vm1235_vm6, %v1221_v9, %v2413_v55  ;;  %v1255_v39 = vsel %vm1235_vm6, %v1222_v26, %v2414_v41 }
 0x12c   : > { %v1287_v36 = vsel %vm1268_vm7, %v1254_v45, 0.0  ;;  %v1288_v12 = vsel %vm1268_vm7, %v1255_v39, 0.0  ;;  %v1238_v7 = vsel %vm1235_vm6, %v1205_v49, %v2408_v33  ;;  %v1239_v13 = vsel %vm1235_vm6, %v1206_v24, %v2409_v31 }
 0x12d   : > { %v1271_v57 = vsel %vm1268_vm7, %v1238_v7, 0.0  ;;  %v1272_v43 = vsel %vm1268_vm7, %v1239_v13, 0.0  ;;  %v1310_v1 = vpack.c.bf16 %v1288_v12, %v1287_v36 }
 0x12e   : > { %v1302_v11 = vpack.c.bf16 %v1272_v43, %v1271_v57 }
 0x12f   : > { %2083 = vmatmul.mubr.msk.bf16.vlgmr.msra.gmra.mrb[0].mxu1 %vm1344_vm8, %v1310_v1 }
 0x130   : > { %2067 = vmatmul.mubr.msk.bf16.vlgmr.msra.gmra.mrb[0].mxu0 %vm1344_vm8, %v1302_v11  ;;  %v2417_v44 = vpop.permute.xlu0 %2416 }
 0x131   : > { %v2419_v59 = vunpack.i.h.bf16 %v2417_v44  ;;  %v2418_v40 = vunpack.i.l.bf16 %v2417_v44 }
 0x133   : > { %v1208_v26 = vsel %vm1202_vm5, %v3054_v8, %v2419_v59  ;;  %v1207_v32 = vsel %vm1202_vm5, %v3715_v29, %v2418_v40 }
 0x137   : > { %v2422_v63 = vpop.permute.xlu1 %2421 }
 0x138   : > { %v2424_v3 = vunpack.i.h.bf16 %v2422_v63  ;;  %v2423_v60 = vunpack.i.l.bf16 %v2422_v63 }
 0x13a   : > { %v2427_v6 = vpop.permute.xlu0 %2426  ;;  %v1224_v50 = vsel %vm1202_vm5, %v3716_v48, %v2424_v3  ;;  %v1223_v46 = vsel %vm1202_vm5, %v3717_v38, %v2423_v60 }
 0x13b   : > { %v2432_v20 = vpop.permute.xlu1 %2431  ;;  %v2429_v16 = vunpack.i.h.bf16 %v2427_v6  ;;  %v2428_v28 = vunpack.i.l.bf16 %v2427_v6 }
 0x13c   : > { %v2434_v37 = vunpack.i.h.bf16 %v2432_v20  ;;  %v2433_v21 = vunpack.i.l.bf16 %v2432_v20 }
 0x13d   : > { %v1210_v33 = vsel %vm1202_vm5, %v3100_v53, %v2429_v16  ;;  %v1209_v53 = vsel %vm1202_vm5, %v3108_v54, %v2428_v28 }
 0x13e   : > { %v2437_v17 = vpop.permute.xlu0 %2436  ;;  %v1226_v43 = vsel %vm1202_vm5, %v3116_v34, %v2434_v37  ;;  %v1225_v1 = vsel %vm1202_vm5, %v3129_v14, %v2433_v21 }
 0x13f   : > { %v2439_v23 = vunpack.i.h.bf16 %v2437_v17  ;;  %v2438_v0 = vunpack.i.l.bf16 %v2437_v17 }
 0x140   : > { %v2442_v58 = vpop.permute.xlu1 %2441 }
 0x141   : > { %v2444_v41 = vunpack.i.h.bf16 %v2442_v58  ;;  %v2443_v55 = vunpack.i.l.bf16 %v2442_v58  ;;  %v1240_v8 = vsel %vm1235_vm6, %v1207_v32, %v2438_v0  ;;  %v1241_v19 = vsel %vm1235_vm6, %v1208_v26, %v2439_v23 }
 0x142   : > { %v1273_v24 = vsel %vm1268_vm7, %v1240_v8, 0.0  ;;  %v1274_v31 = vsel %vm1268_vm7, %v1241_v19, 0.0 }
 0x143   : > { %v1256_v9 = vsel %vm1235_vm6, %v1223_v46, %v2443_v55  ;;  %v1257_v18 = vsel %vm1235_vm6, %v1224_v50, %v2444_v41  ;;  %v1303_v36 = vpack.c.bf16 %v1274_v31, %v1273_v24 }
 0x144   : > { %v1289_v56 = vsel %vm1268_vm7, %v1256_v9, 0.0  ;;  %v1290_v49 = vsel %vm1268_vm7, %v1257_v18, 0.0  ;;  %v2452_v45 = vpop.permute.xlu1 %2451 }
 0x145   : > { %v2454_v12 = vunpack.i.h.bf16 %v2452_v45  ;;  %v2453_v7 = vunpack.i.l.bf16 %v2452_v45  ;;  %2070 = vmatprep.mubr.msk.bf16.mxu0 %vm1344_vm8, %v1303_v36  ;;  %v1311_v11 = vpack.c.bf16 %v1290_v49, %v1289_v56 }
 0x147   : > { %v2447_v39 = vpop.permute.xlu0 %2446  ;;  %v1258_v44 = vsel %vm1235_vm6, %v1225_v1, %v2453_v7  ;;  %v1259_v63 = vsel %vm1235_vm6, %v1226_v43, %v2454_v12  ;;  %2086 = vmatprep.mubr.msk.bf16.mxu1 %vm1344_vm8, %v1311_v11 }
 0x148   : > { %v2449_v13 = vunpack.i.h.bf16 %v2447_v39  ;;  %v2448_v57 = vunpack.i.l.bf16 %v2447_v39  ;;  %v1291_v6 = vsel %vm1268_vm7, %v1258_v44, 0.0  ;;  %v1292_v34 = vsel %vm1268_vm7, %v1259_v63, 0.0 }
 0x149   : > { %v1312_v20 = vpack.c.bf16 %v1292_v34, %v1291_v6 }
 0x14a   : > { %v1242_v59 = vsel %vm1235_vm6, %v1209_v53, %v2448_v57  ;;  %v1243_v40 = vsel %vm1235_vm6, %v1210_v33, %v2449_v13 }
 0x14b   : > { %v1275_v14 = vsel %vm1268_vm7, %v1242_v59, 0.0  ;;  %v1276_v3 = vsel %vm1268_vm7, %v1243_v40, 0.0  ;;  %2087 = vmatmul.mubr.msk.bf16.gmra.mrb[4].mxu1 %vm1344_vm8, %v1312_v20 }
 0x14c   : > { %v1304_v54 = vpack.c.bf16 %v1276_v3, %v1275_v14 }
 0x14d   : > { %v2457_v60 = vpop.permute.xlu0 %2456 }
 0x14e   : > { %2071 = vmatmul.mubr.msk.bf16.gmra.mrb[4].mxu0 %vm1344_vm8, %v1304_v54  ;;  %v2459_v29 = vunpack.i.h.bf16 %v2457_v60  ;;  %v2458_v32 = vunpack.i.l.bf16 %v2457_v60 }
 0x150   : > { %v1212_v23 = vsel %vm1202_vm5, %v3193_v62, %v2459_v29  ;;  %v1211_v0 = vsel %vm1202_vm5, %v3190_v30, %v2458_v32 }
 0x151   : > { %v2462_v26 = vpop.permute.xlu1 %2461 }
 0x152   : > { %v2464_v17 = vunpack.i.h.bf16 %v2462_v26  ;;  %v2463_v48 = vunpack.i.l.bf16 %v2462_v26 }
 0x154   : > { %v1228_v38 = vsel %vm1202_vm5, %v3223_v52, %v2464_v17  ;;  %v1227_v46 = vsel %vm1202_vm5, %v3199_v2, %v2463_v48 }
 0x155   : > { %v2472_v50 = vpop.permute.xlu1 %2471  ;;  %v2467_v16 = vpop.permute.xlu0 %2466 }
 0x156   : > { %v2474_v58 = vunpack.i.h.bf16 %v2472_v50  ;;  %v2473_v9 = vunpack.i.l.bf16 %v2472_v50  ;;  %v2469_v62 = vunpack.i.h.bf16 %v2467_v16  ;;  %v2468_v18 = vunpack.i.l.bf16 %v2467_v16 }
 0x158   : > { %v1230_v19 = vsel %vm1202_vm5, %v3236_v35, %v2474_v58  ;;  %v1229_v13 = vsel %vm1202_vm5, %v3246_v5, %v2473_v9  ;;  %v1214_v57 = vsel %vm1202_vm5, %v3229_v4, %v2469_v62  ;;  %v1213_v53 = vsel %vm1202_vm5, %v3233_v27, %v2468_v18 }
 0x15a   : > { %v2482_v28 = vpop.permute.xlu1 %2481  ;;  %v2477_v41 = vpop.permute.xlu0 %2476 }
 0x15b   : > { %v2484_v55 = vunpack.i.h.bf16 %v2482_v28  ;;  %v2483_v37 = vunpack.i.l.bf16 %v2482_v28  ;;  %v2479_v21 = vunpack.i.h.bf16 %v2477_v41  ;;  %v2478_v8 = vunpack.i.l.bf16 %v2477_v41 }
 0x15d   : > { %v1260_v30 = vsel %vm1235_vm6, %v1227_v46, %v2483_v37  ;;  %v1261_v24 = vsel %vm1235_vm6, %v1228_v38, %v2484_v55  ;;  %v1244_v52 = vsel %vm1235_vm6, %v1211_v0, %v2478_v8  ;;  %v1245_v2 = vsel %vm1235_vm6, %v1212_v23, %v2479_v21 }
 0x15e   : > { %v1293_v31 = vsel %vm1268_vm7, %v1260_v30, 0.0  ;;  %v1294_v33 = vsel %vm1268_vm7, %v1261_v24, 0.0  ;;  %v1277_v56 = vsel %vm1268_vm7, %v1244_v52, 0.0  ;;  %v1278_v49 = vsel %vm1268_vm7, %v1245_v2, 0.0 }
 0x15f   : > { %v2492_v35 = vpop.permute.xlu1 %2491  ;;  %v1305_v12 = vpack.c.bf16 %v1278_v49, %v1277_v56  ;;  %v1313_v7 = vpack.c.bf16 %v1294_v33, %v1293_v31 }
 0x160   : > { %v2494_v45 = vunpack.i.h.bf16 %v2492_v35  ;;  %v2493_v39 = vunpack.i.l.bf16 %v2492_v35 }
 0x161   : > { %v2487_v36 = vpop.permute.xlu0 %2486  ;;  %2074 = vmatprep.mubr.msk.bf16.mxu0 %vm1344_vm8, %v1305_v12  ;;  %2090 = vmatprep.mubr.msk.bf16.mxu1 %vm1344_vm8, %v1313_v7 }
 0x162   : > { %v2489_v43 = vunpack.i.h.bf16 %v2487_v36  ;;  %v2488_v1 = vunpack.i.l.bf16 %v2487_v36  ;;  %v1262_v11 = vsel %vm1235_vm6, %v1229_v13, %v2493_v39  ;;  %v1263_v44 = vsel %vm1235_vm6, %v1230_v19, %v2494_v45 }
 0x163   : > { %v1295_v63 = vsel %vm1268_vm7, %v1262_v11, 0.0  ;;  %v1296_v5 = vsel %vm1268_vm7, %v1263_v44, 0.0 }
 0x164   : > { %v1246_v59 = vsel %vm1235_vm6, %v1213_v53, %v2488_v1  ;;  %v1247_v4 = vsel %vm1235_vm6, %v1214_v57, %v2489_v43  ;;  %v1314_v6 = vpack.c.bf16 %v1296_v5, %v1295_v63  ;;  %v3554_v1 = vld [vmem:[%s3621_s2] ss:$0 sm:$0xff] }
 0x165   : > { %v1279_v40 = vsel %vm1268_vm7, %v1246_v59, 0.0  ;;  %v1280_v27 = vsel %vm1268_vm7, %v1247_v4, 0.0 }
 0x166   : > { %v1306_v34 = vpack.c.bf16 %v1280_v27, %v1279_v40  ;;  %2091 = vmatmul.mubr.msk.bf16.gmra.mrb[8].mxu1 %vm1344_vm8, %v1314_v6 }
 0x168   : > { %2075 = vmatmul.mubr.msk.bf16.gmra.mrb[8].mxu0 %vm1344_vm8, %v1306_v34  ;;  %v2497_v14 = vpop.permute.xlu0 %2496 }
 0x169   : > { %v2499_v20 = vunpack.i.h.bf16 %v2497_v14  ;;  %v2498_v60 = vunpack.i.l.bf16 %v2497_v14 }
 0x16b   : > { %v2502_v3 = vpop.permute.xlu1 %2501  ;;  %v1216_v16 = vsel %vm1202_vm5, %v3318_v22, %v2499_v20  ;;  %v1215_v58 = vsel %vm1202_vm5, %v3315_v51, %v2498_v60 }
 0x16c   : > { %v2504_v26 = vunpack.i.h.bf16 %v2502_v3  ;;  %v2503_v29 = vunpack.i.l.bf16 %v2502_v3 }
 0x16e   : > { %v2507_v54 = vpop.permute.xlu0 %2506  ;;  %v1232_v38 = vsel %vm1202_vm5, %v3359_v25, %v2504_v26  ;;  %v1231_v46 = vsel %vm1202_vm5, %v3312_v42, %v2503_v29 }
 0x16f   : > { %v2512_v32 = vpop.permute.xlu1 %2511  ;;  %v2509_v17 = vunpack.i.h.bf16 %v2507_v54  ;;  %v2508_v48 = vunpack.i.l.bf16 %v2507_v54 }
 0x170   : > { %v2514_v28 = vunpack.i.h.bf16 %v2512_v32  ;;  %v2513_v41 = vunpack.i.l.bf16 %v2512_v32 }
 0x171   : > { %v1218_v51 = vsel %vm1202_vm5, %v3356_v47, %v2509_v17  ;;  %v1217_v19 = vsel %vm1202_vm5, %v3352_v61, %v2508_v48 }
 0x172   : > { %v2517_v50 = vpop.permute.xlu0 %2516  ;;  %v1234_v52 = vsel %vm1202_vm5, %v3366_v15, %v2514_v28  ;;  %v1233_v45 = vsel %vm1202_vm5, %v3371_v10, %v2513_v41 }
 0x173   : > { %v2519_v23 = vunpack.i.h.bf16 %v2517_v50  ;;  %v2518_v0 = vunpack.i.l.bf16 %v2517_v50  ;;  %v2522_v55 = vpop.permute.xlu1 %2521 }
 0x174   : > { %v2524_v37 = vunpack.i.h.bf16 %v2522_v55  ;;  %v2523_v21 = vunpack.i.l.bf16 %v2522_v55 }
 0x175   : > { %v1248_v8 = vsel %vm1235_vm6, %v1215_v58, %v2518_v0  ;;  %v1249_v22 = vsel %vm1235_vm6, %v1216_v16, %v2519_v23 }
 0x176   : > { %v1281_v25 = vsel %vm1268_vm7, %v1248_v8, 0.0  ;;  %v1282_v9 = vsel %vm1268_vm7, %v1249_v22, 0.0  ;;  %v2527_v42 = vpop.permute.xlu0 %2526  ;;  %v1264_v62 = vsel %vm1235_vm6, %v1231_v46, %v2523_v21  ;;  %v1265_v18 = vsel %vm1235_vm6, %v1232_v38, %v2524_v37 }
 0x177   : > { %v2529_v30 = vunpack.i.h.bf16 %v2527_v42  ;;  %v2528_v24 = vunpack.i.l.bf16 %v2527_v42  ;;  %v1297_v2 = vsel %vm1268_vm7, %v1264_v62, 0.0  ;;  %v1298_v47 = vsel %vm1268_vm7, %v1265_v18, 0.0  ;;  %v2532_v31 = vpop.permute.xlu1 %2531 }
 0x178   : > { %v1307_v61 = vpack.c.bf16 %v1282_v9, %v1281_v25  ;;  %v2534_v33 = vunpack.i.h.bf16 %v2532_v31  ;;  %v2533_v56 = vunpack.i.l.bf16 %v2532_v31  ;;  %v1315_v15 = vpack.c.bf16 %v1298_v47, %v1297_v2 }
 0x179   : > { %v1250_v49 = vsel %vm1235_vm6, %v1217_v19, %v2528_v24  ;;  %v1251_v35 = vsel %vm1235_vm6, %v1218_v51, %v2529_v30 }
 0x17a   : > { %v1283_v39 = vsel %vm1268_vm7, %v1250_v49, 0.0  ;;  %v1284_v36 = vsel %vm1268_vm7, %v1251_v35, 0.0  ;;  %2078 = vmatprep.mubr.msk.bf16.mxu0 %vm1344_vm8, %v1307_v61  ;;  %v1266_v12 = vsel %vm1235_vm6, %v1233_v45, %v2533_v56  ;;  %v1267_v7 = vsel %vm1235_vm6, %v1234_v52, %v2534_v33  ;;  %2094 = vmatprep.mubr.msk.bf16.mxu1 %vm1344_vm8, %v1315_v15 }
 0x17b   : > { %v1308_v13 = vpack.c.bf16 %v1284_v36, %v1283_v39  ;;  %v1299_v57 = vsel %vm1268_vm7, %v1266_v12, 0.0  ;;  %v1300_v43 = vsel %vm1268_vm7, %v1267_v7, 0.0 }
 0x17c   : > { %v1316_v10 = vpack.c.bf16 %v1300_v43, %v1299_v57 }
 0x17d   : > { %2079 = vmatmul.mubr.msk.bf16.gmra.mrb[12].mxu0 %vm1344_vm8, %v1308_v13 }
 0x17e   : > { %2095 = vmatmul.mubr.msk.bf16.gmra.mrb[12].mxu1 %vm1344_vm8, %v1316_v10 }
 0x202   : > { %v2084_v53 = vpop.f32.mrb[0].mxu1 }
 0x203   : > { %v2068_v11 = vpop.f32.mrb[0].mxu0  ;;  %v1495_v44 = vpop.f32.mrb[1].mxu1  ;;  %v1504_v59 = vadd.f32 %v2084_v53, %v3554_v1 }
 0x204   : > { %v1431_v63 = vpop.f32.mrb[1].mxu0  ;;  %v2085_v5 = vpop.f32.mrb[2].mxu1  ;;  %v1440_v6 = vadd.f32 %v2068_v11, %v3554_v1  ;;  %v1496_v34 = vadd.f32 %v3554_v1, %v1495_v44 }
 0x205   : > { %v2069_v4 = vpop.f32.mrb[2].mxu0  ;;  %v1507_v40 = vadd.f32 %v2085_v5, %v3554_v1  ;;  %v1498_v27 = vpop.f32.mrb[3].mxu1  ;;  %v1432_v20 = vadd.f32 %v3554_v1, %v1431_v63 }
 0x206   : > { %v1443_v14 = vadd.f32 %v2069_v4, %v3554_v1  ;;  %v1434_v3 = vpop.f32.mrb[3].mxu0  ;;  %v1499_v54 = vadd.f32 %v3554_v1, %v1498_v27 }
 0x207   : > { %v1986_v60 = vpack.c.bf16 %v1507_v40, %v1504_v59  ;;  %v1435_v26 = vadd.f32 %v3554_v1, %v1434_v3 }
 0x208   : > { %v1946_v29 = vpack.c.bf16 %v1443_v14, %v1440_v6  ;;  %v1981_v32 = vpack.c.bf16 %v1499_v54, %v1496_v34 }
 0x209   : > { %2034 = vst [vmem:[%s3564_s14 + $0x48] sm:$0xff] %v1986_v60   ;;  %v1941_v17 = vpack.c.bf16 %v1435_v26, %v1432_v20 }
 0x20a   : > { %2026 = vst [vmem:[%s3564_s14 + $0x8] sm:$0xff] %v1946_v29   ;;  %2033 = vst [vmem:[%s3564_s14 + $0x40] sm:$0xff] %v1981_v32  }
 0x20b   : > { %1942 = vst [vmem:[%s3564_s14] sm:$0xff] %v1941_v17  }
 0x21e   : > { %v2088_v50 = vpop.f32.mrb[4].mxu1 }
 0x21f   : > { %v1511_v58 = vpop.f32.mrb[5].mxu1  ;;  %v1520_v46 = vadd.f32 %v2088_v50, %v3554_v1 }
 0x220   : > { %v2089_v0 = vpop.f32.mrb[6].mxu1  ;;  %v1512_v8 = vadd.f32 %v3554_v1, %v1511_v58 }
 0x221   : > { %v2072_v48 = vpop.f32.mrb[4].mxu0  ;;  %v1523_v41 = vadd.f32 %v2089_v0, %v3554_v1  ;;  %v1514_v37 = vpop.f32.mrb[7].mxu1 }
 0x222   : > { %v1447_v16 = vpop.f32.mrb[5].mxu0  ;;  %v1456_v38 = vadd.f32 %v2072_v48, %v3554_v1  ;;  %v1515_v51 = vadd.f32 %v3554_v1, %v1514_v37 }
 0x223   : > { %v2073_v23 = vpop.f32.mrb[6].mxu0  ;;  %v1448_v21 = vadd.f32 %v3554_v1, %v1447_v16  ;;  %v1996_v25 = vpack.c.bf16 %v1523_v41, %v1520_v46 }
 0x224   : > { %v1459_v28 = vadd.f32 %v2073_v23, %v3554_v1  ;;  %v1450_v55 = vpop.f32.mrb[7].mxu0  ;;  %v1991_v42 = vpack.c.bf16 %v1515_v51, %v1512_v8 }
 0x225   : > { %v1451_v22 = vadd.f32 %v3554_v1, %v1450_v55  ;;  %2036 = vst [vmem:[%s3564_s14 + $0x58] sm:$0xff] %v1996_v25  }
 0x226   : > { %v1956_v19 = vpack.c.bf16 %v1459_v28, %v1456_v38  ;;  %2035 = vst [vmem:[%s3564_s14 + $0x50] sm:$0xff] %v1991_v42  }
 0x227   : > { %v1951_v9 = vpack.c.bf16 %v1451_v22, %v1448_v21 }
 0x228   : > { %2028 = vst [vmem:[%s3564_s14 + $0x18] sm:$0xff] %v1956_v19  }
 0x229   : > { %2027 = vst [vmem:[%s3564_s14 + $0x10] sm:$0xff] %v1951_v9  }
 0x239   : > { %v2092_v62 = vpop.f32.mrb[8].mxu1 }
 0x23a   : > { %v1527_v30 = vpop.f32.mrb[9].mxu1  ;;  %v1536_v2 = vadd.f32 %v2092_v62, %v3554_v1 }
 0x23b   : > { %v2076_v18 = vpop.f32.mrb[8].mxu0  ;;  %v2093_v52 = vpop.f32.mrb[10].mxu1  ;;  %v1528_v56 = vadd.f32 %v3554_v1, %v1527_v30 }
 0x23c   : > { %v1463_v24 = vpop.f32.mrb[9].mxu0  ;;  %v1539_v31 = vadd.f32 %v2093_v52, %v3554_v1  ;;  %v1530_v61 = vpop.f32.mrb[11].mxu1  ;;  %v1472_v33 = vadd.f32 %v2076_v18, %v3554_v1 }
 0x23d   : > { %v2077_v47 = vpop.f32.mrb[10].mxu0  ;;  %v1531_v45 = vadd.f32 %v3554_v1, %v1530_v61  ;;  %v1464_v39 = vadd.f32 %v3554_v1, %v1463_v24 }
 0x23e   : > { %v1475_v49 = vadd.f32 %v2077_v47, %v3554_v1  ;;  %v1466_v35 = vpop.f32.mrb[11].mxu0  ;;  %v2006_v36 = vpack.c.bf16 %v1539_v31, %v1536_v2 }
 0x23f   : > { %v1467_v15 = vadd.f32 %v3554_v1, %v1466_v35  ;;  %v2001_v7 = vpack.c.bf16 %v1531_v45, %v1528_v56 }
 0x240   : > { %v1966_v12 = vpack.c.bf16 %v1475_v49, %v1472_v33  ;;  %2038 = vst [vmem:[%s3564_s14 + $0x68] sm:$0xff] %v2006_v36  }
 0x241   : > { %v1961_v13 = vpack.c.bf16 %v1467_v15, %v1464_v39  ;;  %2037 = vst [vmem:[%s3564_s14 + $0x60] sm:$0xff] %v2001_v7  }
 0x242   : > { %2030 = vst [vmem:[%s3564_s14 + $0x28] sm:$0xff] %v1966_v12  }
 0x243   : > { %2029 = vst [vmem:[%s3564_s14 + $0x20] sm:$0xff] %v1961_v13  }
 0x250   : > { %v2080_v57 = vpop.f32.mrb[12].mxu0 }
 0x251   : > { %v1479_v43 = vpop.f32.mrb[13].mxu0  ;;  %v2096_v10 = vpop.f32.mrb[12].mxu1  ;;  %v1488_v11 = vadd.f32 %v2080_v57, %v3554_v1 }
 0x252   : > { %v2081_v53 = vpop.f32.mrb[14].mxu0  ;;  %v1543_v44 = vpop.f32.mrb[13].mxu1  ;;  %v1480_v59 = vadd.f32 %v3554_v1, %v1479_v43  ;;  %v1552_v27 = vadd.f32 %v2096_v10, %v3554_v1 }
 0x253   : > { %v1491_v63 = vadd.f32 %v2081_v53, %v3554_v1  ;;  %v1482_v5 = vpop.f32.mrb[15].mxu0  ;;  %v2097_v4 = vpop.f32.mrb[14].mxu1  ;;  %v1544_v3 = vadd.f32 %v3554_v1, %v1543_v44 }
 0x254   : > { %v1483_v40 = vadd.f32 %v3554_v1, %v1482_v5  ;;  %v1555_v34 = vadd.f32 %v2097_v4, %v3554_v1  ;;  %v1546_v14 = vpop.f32.mrb[15].mxu1 }
 0x255   : > { %v1976_v6 = vpack.c.bf16 %v1491_v63, %v1488_v11  ;;  %v1547_v20 = vadd.f32 %v3554_v1, %v1546_v14 }
 0x256   : > { %v1971_v54 = vpack.c.bf16 %v1483_v40, %v1480_v59  ;;  %v2016_v60 = vpack.c.bf16 %v1555_v34, %v1552_v27 }
 0x257   : > { %2032 = vst [vmem:[%s3564_s14 + $0x38] sm:$0xff] %v1976_v6   ;;  %v2011_v26 = vpack.c.bf16 %v1547_v20, %v1544_v3 }
 0x258   : > { %2031 = vst [vmem:[%s3564_s14 + $0x30] sm:$0xff] %v1971_v54   ;;  %2040 = vst [vmem:[%s3564_s14 + $0x78] sm:$0xff] %v2016_v60  }
 0x259   : > { %2039 = vst [vmem:[%s3564_s14 + $0x70] sm:$0xff] %v2011_v26  }
 0x25a PF: > { %s15_s20 = sadd.s32 1, %s2560_s20   ;;  %s3718_s18 = smov %s2556_s19 }
 0x25b   : > { %p12_p5 = scmp.ge.s32.totalorder %s15_s20, 4   ;;  %s3719_s19 = smov %s3721_s3 }
 0x25d   :  { %14 = sbr.rel (!%p12_p5) target bundleno = 2 (0x2), region = 71 }

// kernel: conv_forward.4
= control target key start
LH: loop header
LB: loop body
LE: loop exit
PB: predicated region body
PF: predicated region fallthrough
CT: control target
= control target key end

     0   :  { %s3133_s18 = smov 0   ;;  %s3135_s19 = smov 0   ;;  %s4261_s0 = inlined_call_operand.vmem [shape: bf16[2,18,18,128], index: 0, kind: input, shape index: {}]   ;;  %s4262_s1 = inlined_call_operand.vmem [shape: bf16[72,128], index: 1, kind: input, shape index: {}]   ;;  %s4263_s2 = inlined_call_operand.vmem [shape: f32[1,128], index: 2, kind: input, shape index: {}]   ;;  %s4264_s3 = inlined_call_operand.vmem [shape: f32[1,8], index: 3, kind: input, shape index: {}]   ;;  %s4265_s4 = inlined_call_operand.vmem [shape: f32[1,8], index: 4, kind: input, shape index: {}]   ;;  %s4266_s5 = inlined_call_operand.vmem [shape: bf16[2,16,16,128], index: 5, kind: output, shape index: {}]  }
   0x1   :  { %s3137_s20 = smov 0  }
   0x2 LB: > { %s27_s21 = sadd.s32 1, %s3092_s19  ;;  %p2327_p0 = scmp.ge.s32.totalorder %s3096_s20, 1  ;;  %s3096_s20 = sphi %s3137_s20, %s15_s20   ;;  %s3092_s19 = sphi %s3135_s19, %s4313_s19   ;;  %s3088_s18 = sphi %s3133_s18, %s4312_s18  }
   0x3   : > { %p29_p1 = scmp.ge.s32.totalorder %s27_s21, 2  ;;  %p201_p2 = scmp.lt.s32.totalorder %s3096_s20, 3 }
   0x5   : > { %s4315_s21 = smov (%p29_p1, %s27_s21), 0  ;;  %p202_p3 = pnand %p2327_p0, %p201_p2 }
   0x7   : > { %205 = sbr.rel (%p202_p3) target bundleno = 733 (0x2dd), region = 40 }
   0xe   : > { %v539_v0 = vlaneseq  ;;  %v3098_v4 = vmov 0.0   ;;  %p234_p4 = scmp.lt.s32.totalorder %s3088_s18, 1  ;;  %v3196_v40 = vld [vmem:[%s4264_s3] ss:$0 sm:$0xff]  ;;  %s3099_s30 = smov 8   ;;  %vm1235_vm5 = vcmask 64512  }
   0xf   : > { %v3205_v43 = vld [vmem:[%s4265_s4] ss:$0 sm:$0xff]  ;;  %s3100_s6 = smov 16   ;;  %vm1284_vm6 = vcmask 130048   ;;  %vm1381_vm7 = vcmask 1046528   ;;  %vm1558_vm8 = vcmask 1045504  }
  0x10   : > { %v3153_v1 = vshrl.u32 %v539_v0, 7  ;;  %v548_v2 = vand.u32 127, %v539_v0  ;;  %s4317_s18 = smov (!%p234_p4, %s3088_s18), 1  ;;  %s3101_s15 = smov 24   ;;  %vm1909_vm9 = vcmask 1043456   ;;  %vm1735_vm10 = vcmask 195584  }
  0x11   : > { %s2639_s22 = smul.u32 216, %s4317_s18  ;;  %vm1768_vm11 = vcmask 392192   ;;  %vm1860_vm12 = vcmask 588800  }
  0x12   : > { %vm564_vm0 = vcmp.ge.s32.totalorder %v548_v2, 1  ;;  %vm565_vm1 = vcmp.le.s32.totalorder %v548_v2, 16  ;;  %v589_v3 = vsub.s32 1, %v3153_v1  ;;  %vm549_vm2 = vcmp.ge.s32.totalorder %v3153_v1, 1 }
  0x13   : > { %vm566_vm3 = vmand %vm564_vm0, %vm565_vm1  ;;  %v2333_v5 = vsel %vm549_vm2, 1.0, %v3098_v4  ;;  %v679_v7 = vsub.s32 7, %v3153_v1  ;;  %v574_v12 = vsub.s32 0, %v3153_v1  ;;  %v542_v15 = vadd.s32 16, %v3153_v1  ;;  %s3185_s25 = scalar_lea.vmem %s4261_s0, %s2639_s22  ;;  %s3102_s22 = smov 48  }
  0x14   : > { %v2335_v6 = vsel %vm566_vm3, 1.0, %v3098_v4  ;;  %v604_v17 = vsub.s32 2, %v3153_v1  ;;  %v619_v24 = vsub.s32 3, %v3153_v1  ;;  %v634_v27 = vsub.s32 4, %v3153_v1  ;;  %v3188_v36 = vld [vmem:[%s3185_s25 + $0x6c] sm:$0xff]   ;;  %v2545_v53 = vld [vmem:[%s3185_s25 + $0x78] sm:$0xff]  }
  0x15   : > { %v710_v8 = vrot.slane %v2335_v6, %v589_v3  ;;  %v569_v9 = vmul.f32 %v2335_v6, %v2333_v5  ;;  %v3158_v10 = vrot.slane %v2335_v6, %v679_v7  ;;  %v3161_v14 = vrot.slane %v2335_v6, %v574_v12  ;;  %v284_v37 = vld [vmem:[%s3185_s25 + $0x74] sm:$0x1]  ;;  %v287_v50 = vld [vmem:[%s3185_s25 + $0x80] sm:$0x1]  ;;  %v258_v56 = vld [vmem:[%s3185_s25 + $0xc] sm:$0xff]  }
  0x16   : > { %vm554_vm4 = vcmp.le.s32.totalorder %v542_v15, 16  ;;  %v725_v23 = vrot.slane %v2335_v6, %v604_v17  ;;  %v740_v26 = vrot.slane %v2335_v6, %v619_v24  ;;  %v755_v29 = vrot.slane %v2335_v6, %v634_v27  ;;  %v263_v61 = vld [vmem:[%s3185_s25 + $0x20] sm:$0x1] }
  0x17   : > { %716 = vbcast.lane.b32.xlu0 %v710_v8, 264  ;;  %712 = vbcast.lane.b32.xlu1 %v710_v8, 256  ;;  %v590_v11 = vrot.slane %v569_v9, %v589_v3  ;;  %v680_v13 = vrot.slane %v569_v9, %v679_v7  ;;  %v3164_v16 = vrot.slane %v569_v9, %v574_v12  ;;  %v2334_v18 = vsel %vm554_vm4, 1.0, %v3098_v4 }
  0x18   : > { %v571_v19 = vmul.f32 %v2335_v6, %v2334_v18  ;;  %v605_v20 = vrot.slane %v569_v9, %v604_v17  ;;  %v620_v25 = vrot.slane %v569_v9, %v619_v24  ;;  %v635_v28 = vrot.slane %v569_v9, %v634_v27  ;;  %v290_v17 = vld [vmem:[%s3185_s25 + $0x8c] sm:$0x1] }
  0x19   : > { %v649_v30 = vsub.s32 5, %v3153_v1  ;;  %v664_v33 = vsub.s32 6, %v3153_v1  ;;  %v337_v38 = vunpack.c.h.bf16 %v3188_v36  ;;  %v338_v39 = vunpack.c.l.bf16 %v284_v37  ;;  %v2541_v1 = vld [vmem:[%s3185_s25 + $0x18] sm:$0xff]  }
  0x1a   : > { %v815_v21 = vrot.slane %v571_v19, %v574_v12  ;;  %v830_v22 = vrot.slane %v571_v19, %v589_v3  ;;  %v341_v57 = vunpack.c.l.bf16 %v287_v50  ;;  %v2448_v58 = vunpack.c.h.bf16 %v2545_v53 }
  0x1b   : > { %720 = vbcast.lane.b32.xlu1 %v710_v8, 272  ;;  %592 = vbcast.lane.b32.xlu0 %v590_v11, 256  ;;  %v650_v31 = vrot.slane %v569_v9, %v649_v30  ;;  %v770_v32 = vrot.slane %v2335_v6, %v649_v30  ;;  %v665_v34 = vrot.slane %v569_v9, %v664_v33  ;;  %v313_v59 = vunpack.c.h.bf16 %v258_v56  ;;  %v260_v8 = vld [vmem:[%s3185_s25 + $0x14] sm:$0x1] }
  0x1c   : > { %v785_v35 = vrot.slane %v2335_v6, %v664_v33  ;;  %v399_v41 = vmul.f32 %v3196_v40, %v337_v38  ;;  %v400_v42 = vmul.f32 %v3196_v40, %v338_v39  ;;  %v312_v62 = vunpack.c.l.bf16 %v258_v56 }
  0x1d   : > { %v403_v2 = vmul.f32 %v3196_v40, %v341_v57  ;;  %v402_v3 = vmul.f32 %v2448_v58, %v3196_v40  ;;  %v2447_v4 = vunpack.c.l.bf16 %v2545_v53  ;;  %v317_v5 = vunpack.c.l.bf16 %v263_v61 }
  0x1e   : > { %v459_v44 = vadd.f32 %v3205_v43, %v399_v41  ;;  %v460_v45 = vadd.f32 %v3205_v43, %v400_v42  ;;  %v375_v6 = vmul.f32 %v3196_v40, %v313_v59  ;;  %v374_v7 = vmul.f32 %v3196_v40, %v312_v62 }
  0x1f   : > { %600 = vbcast.lane.b32.xlu1 %v590_v11, 272  ;;  %596 = vbcast.lane.b32.xlu0 %v590_v11, 264  ;;  %v463_v12 = vadd.f32 %v3205_v43, %v403_v2  ;;  %v401_v15 = vmul.f32 %v2447_v4, %v3196_v40  ;;  %v314_v18 = vunpack.c.l.bf16 %v260_v8 }
  0x20   : > { %v513_v48 = vmax.f32 %v459_v44, 0.0  ;;  %v514_v49 = vmax.f32 %v460_v45, 0.0  ;;  %v435_v19 = vadd.f32 %v3205_v43, %v375_v6 }
  0x21   : > { %v376_v37 = vmul.f32 %v3196_v40, %v314_v18 }
  0x22   : > { %v489_v38 = vmax.f32 %v435_v19, 0.0 }
  0x23   : > { %611 = vbcast.lane.b32.xlu1 %v605_v20, 264  ;;  %607 = vbcast.lane.b32.xlu0 %v605_v20, 256 }
  0x27   : > { %727 = vbcast.lane.b32.xlu1 %v725_v23, 256  ;;  %615 = vbcast.lane.b32.xlu0 %v605_v20, 272  ;;  %v288_v20 = vld [vmem:[%s3185_s25 + $0x84] sm:$0xff]  }
  0x28   : > { %v343_v30 = vunpack.c.h.bf16 %v288_v20 }
  0x2a   : > { %v405_v53 = vmul.f32 %v3196_v40, %v343_v30 }
  0x2b   : > { %735 = vbcast.lane.b32.xlu1 %v725_v23, 272  ;;  %731 = vbcast.lane.b32.xlu0 %v725_v23, 264 }
  0x2c   : > { %v465_v6 = vadd.f32 %v3205_v43, %v405_v53 }
  0x2f   : > { %626 = vbcast.lane.b32.xlu1 %v620_v25, 264  ;;  %622 = vbcast.lane.b32.xlu0 %v620_v25, 256 }
  0x33   : > { %742 = vbcast.lane.b32.xlu1 %v740_v26, 256  ;;  %630 = vbcast.lane.b32.xlu0 %v620_v25, 272  ;;  %v266_v25 = vld [vmem:[%s3185_s25 + $0x2c] sm:$0x1] }
  0x34   : > { %v320_v39 = vunpack.c.l.bf16 %v266_v25  ;;  %v2542_v25 = vld [vmem:[%s3185_s25 + $0x30] sm:$0xff]  }
  0x36   : > { %v382_v61 = vmul.f32 %v3196_v40, %v320_v39  ;;  %v2436_v39 = vunpack.c.h.bf16 %v2542_v25 }
  0x37   : > { %750 = vbcast.lane.b32.xlu1 %v740_v26, 272  ;;  %746 = vbcast.lane.b32.xlu0 %v740_v26, 264  ;;  %v517_v26 = vmax.f32 %v463_v12, 0.0 }
  0x3b   : > { %637 = vbcast.lane.b32.xlu0 %v635_v28, 256  ;;  %641 = vbcast.lane.b32.xlu1 %v635_v28, 264 }
  0x3f   : > { %645 = vbcast.lane.b32.xlu0 %v635_v28, 272  ;;  %757 = vbcast.lane.b32.xlu1 %v755_v29, 256  ;;  %v265_v28 = vld [vmem:[%s3185_s25 + $0x24] sm:$0xff]  }
  0x43   : > { %761 = vbcast.lane.b32.xlu0 %v755_v29, 264  ;;  %765 = vbcast.lane.b32.xlu1 %v755_v29, 272  ;;  %v344_v29 = vunpack.c.l.bf16 %v290_v17  ;;  %v442_v17 = vadd.f32 %v3205_v43, %v382_v61 }
  0x47   : > { %652 = vbcast.lane.b32.xlu0 %v650_v31, 256  ;;  %656 = vbcast.lane.b32.xlu1 %v650_v31, 264 }
  0x4b   : > { %660 = vbcast.lane.b32.xlu0 %v650_v31, 272  ;;  %772 = vbcast.lane.b32.xlu1 %v770_v32, 256 }
  0x4f   : > { %776 = vbcast.lane.b32.xlu0 %v770_v32, 264  ;;  %780 = vbcast.lane.b32.xlu1 %v770_v32, 272  ;;  %v461_v32 = vadd.f32 %v3205_v43, %v401_v15 }
  0x51   : > { %v515_v56 = vmax.f32 %v461_v32, 0.0  ;;  %v496_v32 = vmax.f32 %v442_v17, 0.0 }
  0x53   : > { %667 = vbcast.lane.b32.xlu0 %v665_v34, 256  ;;  %671 = vbcast.lane.b32.xlu1 %v665_v34, 264 }
  0x57   : > { %675 = vbcast.lane.b32.xlu0 %v665_v34, 272  ;;  %787 = vbcast.lane.b32.xlu1 %v785_v35, 256  ;;  %v342_v34 = vunpack.c.l.bf16 %v288_v20 }
  0x59   : > { %v404_v58 = vmul.f32 %v3196_v40, %v342_v34 }
  0x5b   : > { %791 = vbcast.lane.b32.xlu0 %v785_v35, 264  ;;  %795 = vbcast.lane.b32.xlu1 %v785_v35, 272  ;;  %v336_v35 = vunpack.c.l.bf16 %v3188_v36  ;;  %v464_v12 = vadd.f32 %v3205_v43, %v404_v58 }
  0x5d   : > { %v398_v62 = vmul.f32 %v3196_v40, %v336_v35 }
  0x5f   : > { %682 = vbcast.lane.b32.xlu0 %v680_v13, 256  ;;  %686 = vbcast.lane.b32.xlu1 %v680_v13, 264  ;;  %v458_v18 = vadd.f32 %v3205_v43, %v398_v62 }
  0x61   : > { %v512_v34 = vmax.f32 %v458_v18, 0.0  ;;  %v270_v18 = vld [vmem:[%s3185_s25 + $0x3c] sm:$0xff]  }
  0x63   : > { %690 = vbcast.lane.b32.xlu0 %v680_v13, 272  ;;  %802 = vbcast.lane.b32.xlu1 %v3158_v10, 256  ;;  %v462_v13 = vadd.f32 %v3205_v43, %v402_v3 }
  0x65   : > { %v516_v27 = vmax.f32 %v462_v13, 0.0  ;;  %v269_v13 = vld [vmem:[%s3185_s25 + $0x38] sm:$0x1] }
  0x67   : > { %806 = vbcast.lane.b32.xlu0 %v3158_v10, 264  ;;  %810 = vbcast.lane.b32.xlu1 %v3158_v10, 272  ;;  %v2432_v10 = vunpack.c.h.bf16 %v2541_v1 }
  0x6b   : > { %697 = vbcast.lane.b32.xlu0 %v3161_v14, 256  ;;  %701 = vbcast.lane.b32.xlu1 %v3161_v14, 264 }
  0x6f   : > { %705 = vbcast.lane.b32.xlu0 %v3161_v14, 272  ;;  %817 = vbcast.lane.b32.xlu1 %v815_v21, 256  ;;  %v2431_v14 = vunpack.c.l.bf16 %v2541_v1  ;;  %v436_v1 = vadd.f32 %v3205_v43, %v376_v37 }
  0x71   : > { %v377_v31 = vmul.f32 %v2431_v14, %v3196_v40  ;;  %v2546_v14 = vld [vmem:[%s3185_s25 + $0x90] sm:$0xff]  }
  0x72   : > { %v2452_v61 = vunpack.c.h.bf16 %v2546_v14 }
  0x73   : > { %821 = vbcast.lane.b32.xlu0 %v815_v21, 264  ;;  %825 = vbcast.lane.b32.xlu1 %v815_v21, 272  ;;  %v434_v21 = vadd.f32 %v3205_v43, %v374_v7  ;;  %v437_v36 = vadd.f32 %v3205_v43, %v377_v31 }
  0x75   : > { %v488_v41 = vmax.f32 %v434_v21, 0.0  ;;  %v491_v8 = vmax.f32 %v437_v36, 0.0 }
  0x77   : > { %832 = vbcast.lane.b32.xlu0 %v830_v22, 256  ;;  %836 = vbcast.lane.b32.xlu1 %v830_v22, 264 }
  0x7b   : > { %840 = vbcast.lane.b32.xlu0 %v830_v22, 272  ;;  %577 = vbcast.lane.b32.xlu1 %v3164_v16, 256  ;;  %v378_v22 = vmul.f32 %v2432_v10, %v3196_v40 }
  0x7d   : > { %v438_v42 = vadd.f32 %v3205_v43, %v378_v22  ;;  %v519_v22 = vmax.f32 %v465_v6, 0.0  ;;  %v272_v6 = vld [vmem:[%s3185_s25 + $0x44] sm:$0x1] }
  0x7f   : > { %581 = vbcast.lane.b32.xlu0 %v3164_v16, 264  ;;  %585 = vbcast.lane.b32.xlu1 %v3164_v16, 272  ;;  %v379_v16 = vmul.f32 %v3196_v40, %v317_v5  ;;  %v492_v7 = vmax.f32 %v438_v42, 0.0 }
  0x81   : > { %v439_v33 = vadd.f32 %v3205_v43, %v379_v16 }
  0x83   : > { %v493_v57 = vmax.f32 %v439_v33, 0.0 }
  0x89   : > { %v717_v46 = vpop.permute.xlu0 %716  ;;  %v3209_v47 = vpop.permute.xlu1 %712 }
  0x8a   : > { %v3215_v54 = vmul.f32 %v717_v46, %v513_v48  ;;  %v319_v46 = vunpack.c.h.bf16 %v265_v28  ;;  %v318_v48 = vunpack.c.l.bf16 %v265_v28  ;;  %v490_v28 = vmax.f32 %v436_v1, 0.0 }
  0x8b   : > { %v3329_v62 = vmul.f32 %v3209_v47, %v512_v34 }
  0x8c   : > { %v381_v3 = vmul.f32 %v3196_v40, %v319_v46  ;;  %v380_v10 = vmul.f32 %v3196_v40, %v318_v48  ;;  %v293_v48 = vld [vmem:[%s3185_s25 + $0x98] sm:$0x1] }
  0x8d   : > { %v721_v51 = vpop.permute.xlu1 %720  ;;  %v3212_v52 = vpop.permute.xlu0 %592 }
  0x8e   : > { %v3217_v55 = vmul.f32 %v721_v51, %v514_v49  ;;  %v406_v51 = vmul.f32 %v3196_v40, %v344_v29  ;;  %v441_v29 = vadd.f32 %v3205_v43, %v381_v3 }
  0x90   : > { %v2669_v60 = vpack.i.bf16 %v3217_v55, %v3215_v54  ;;  %v466_v5 = vadd.f32 %v3205_v43, %v406_v51 }
  0x91   : > { %v3223_v63 = vpop.permute.xlu1 %600  ;;  %v597_v0 = vpop.permute.xlu0 %596 }
  0x92   : > { %2670 = vrot.lane.b32.xlu0 %v2669_v60, %s3099_s30  ;;  %v3261_v59 = vmul.f32 %v597_v0, %v489_v38  ;;  %v3274_v0 = vmul.f32 %v3212_v52, %v488_v41  ;;  %v520_v21 = vmax.f32 %v466_v5, 0.0  ;;  %v2435_v38 = vunpack.c.l.bf16 %v2542_v25 }
  0x93   : > { %v347_v5 = vunpack.c.l.bf16 %v293_v48 }
  0x94   : > { %v2689_v52 = vpack.i.bf16 %v3261_v59, %v3274_v0  ;;  %v383_v58 = vmul.f32 %v2435_v38, %v3196_v40 }
  0x95   : > { %v3232_v9 = vpop.permute.xlu1 %611  ;;  %v3234_v11 = vpop.permute.xlu0 %607 }
  0x96   : > { %v3297_v30 = vmul.f32 %v3232_v9, %v492_v7  ;;  %v3300_v31 = vmul.f32 %v3234_v11, %v491_v8  ;;  %v295_v7 = vld [vmem:[%s3185_s25 + $0x9c] sm:$0xff]  }
  0x99   : > { %v728_v23 = vpop.permute.xlu1 %727  ;;  %v616_v24 = vpop.permute.xlu0 %615 }
  0x9a   : > { %v3286_v15 = vmul.f32 %v728_v23, %v515_v56  ;;  %v3288_v16 = vmul.f32 %v616_v24, %v493_v57  ;;  %v440_v23 = vadd.f32 %v3205_v43, %v380_v10  ;;  %v518_v24 = vmax.f32 %v464_v12, 0.0 }
  0x9b   : > { %v2709_v56 = vpack.i.bf16 %v3297_v30, %v3300_v31 }
  0x9c   : > { %v3304_v33 = vpack.i.bf16 %v3286_v15, %v3288_v16  ;;  %v494_v46 = vmax.f32 %v440_v23, 0.0 }
  0x9d   : > { %v736_v44 = vpop.permute.xlu1 %735  ;;  %v732_v45 = vpop.permute.xlu0 %731 }
  0x9e   : > { %v3253_v49 = vmul.f32 %v736_v44, %v517_v26  ;;  %v3255_v50 = vmul.f32 %v732_v45, %v516_v27  ;;  %v323_v26 = vunpack.c.l.bf16 %v269_v13  ;;  %v2451_v27 = vunpack.c.l.bf16 %v2546_v14 }
  0x9f   : > { %v3315_v44 = vmul.f32 %v3223_v63, %v490_v28  ;;  %v495_v45 = vmax.f32 %v441_v29, 0.0  ;;  %v443_v13 = vadd.f32 %v3205_v43, %v383_v58 }
  0xa0   : > { %v2674_v60 = vpack.i.bf16 %v3253_v49, %v3255_v50  ;;  %v385_v9 = vmul.f32 %v3196_v40, %v323_v26  ;;  %v407_v11 = vmul.f32 %v2451_v27, %v3196_v40  ;;  %v324_v26 = vunpack.c.l.bf16 %v270_v18 }
  0xa1   : > { %v3268_v2 = vpop.permute.xlu1 %626  ;;  %v3271_v4 = vpop.permute.xlu0 %622  ;;  %v2694_v8 = vpack.i.bf16 %v3329_v62, %v3315_v44  ;;  %v325_v27 = vunpack.c.h.bf16 %v270_v18  ;;  %v497_v28 = vmax.f32 %v443_v13, 0.0  ;;  %v2547_v13 = vld [vmem:[%s3185_s25 + $0xa8] sm:$0xff]  }
  0xa2   : > { %2675 = vrot.lane.b32.xlu1 %v2674_v60, %s3099_s30  ;;  %2680 = vrot.lane.b32.xlu0 %v2674_v60, %s3100_s6  ;;  %v384_v60 = vmul.f32 %v2436_v39, %v3196_v40  ;;  %v445_v1 = vadd.f32 %v3205_v43, %v385_v9  ;;  %v467_v3 = vadd.f32 %v3205_v43, %v407_v11  ;;  %v296_v9 = vld [vmem:[%s3185_s25 + $0xa4] sm:$0x1]  ;;  %v349_v11 = vunpack.c.h.bf16 %v295_v7 }
  0xa3   : > { %v3340_v10 = vmul.f32 %v3268_v2, %v495_v45  ;;  %v3343_v47 = vmul.f32 %v3271_v4, %v494_v46  ;;  %v386_v45 = vmul.f32 %v3196_v40, %v324_v26  ;;  %v387_v46 = vmul.f32 %v3196_v40, %v325_v27 }
  0xa4   : > { %v444_v2 = vadd.f32 %v3205_v43, %v384_v60  ;;  %v521_v4 = vmax.f32 %v467_v3, 0.0 }
  0xa5   : > { %v743_v19 = vpop.permute.xlu1 %742  ;;  %v631_v20 = vpop.permute.xlu0 %630  ;;  %v2729_v25 = vpack.i.bf16 %v3340_v10, %v3343_v47 }
  0xa6   : > { %2690 = vrot.lane.b32.xlu0 %v2689_v52, %s3099_s30  ;;  %v3318_v51 = vmul.f32 %v743_v19, %v518_v24  ;;  %v3320_v53 = vmul.f32 %v631_v20, %v496_v32  ;;  %v408_v52 = vmul.f32 %v2452_v61, %v3196_v40  ;;  %v326_v19 = vunpack.c.l.bf16 %v272_v6 }
  0xa7   : > { %v348_v20 = vunpack.c.l.bf16 %v295_v7 }
  0xa8   : > { %v3347_v12 = vpack.i.bf16 %v3318_v51, %v3320_v53  ;;  %v468_v23 = vadd.f32 %v3205_v43, %v408_v52  ;;  %v388_v32 = vmul.f32 %v3196_v40, %v326_v19  ;;  %v446_v52 = vadd.f32 %v3205_v43, %v386_v45  ;;  %v2543_v19 = vld [vmem:[%s3185_s25 + $0x48] sm:$0xff]   ;;  %v299_v45 = vld [vmem:[%s3185_s25 + $0xb0] sm:$0x1] }
  0xa9   : > { %v751_v35 = vpop.permute.xlu1 %750  ;;  %v747_v37 = vpop.permute.xlu0 %746  ;;  %v410_v34 = vmul.f32 %v3196_v40, %v348_v20  ;;  %v2455_v20 = vunpack.c.l.bf16 %v2547_v13  ;;  %v2439_v27 = vunpack.c.l.bf16 %v2543_v19 }
  0xaa   : > { %v3306_v41 = vmul.f32 %v751_v35, %v520_v21  ;;  %v3308_v42 = vmul.f32 %v747_v37, %v519_v22  ;;  %2705 = vrot.lane.b32.xlu0 %v3304_v33, %s3099_s30  ;;  %v499_v21 = vmax.f32 %v445_v1, 0.0  ;;  %v409_v22 = vmul.f32 %v3196_v40, %v347_v5 }
  0xab   : > { %v498_v37 = vmax.f32 %v444_v2, 0.0  ;;  %v522_v48 = vmax.f32 %v468_v23, 0.0  ;;  %v448_v60 = vadd.f32 %v3205_v43, %v388_v32  ;;  %v350_v1 = vunpack.c.l.bf16 %v296_v9 }
  0xac   : > { %v2684_v36 = vpack.i.bf16 %v3306_v41, %v3308_v42  ;;  %v469_v39 = vadd.f32 %v3205_v43, %v409_v22  ;;  %v500_v23 = vmax.f32 %v446_v52, 0.0 }
  0xad   : > { %v638_v57 = vpop.permute.xlu0 %637  ;;  %v642_v63 = vpop.permute.xlu1 %641 }
  0xae   : > { %2685 = vrot.lane.b32.xlu1 %v2684_v36, %s3100_s6  ;;  %2710 = vrot.lane.b32.xlu0 %v2709_v56, %s3100_s6  ;;  %v3374_v3 = vmul.f32 %v638_v57, %v497_v28  ;;  %v3376_v5 = vmul.f32 %v642_v63, %v498_v37  ;;  %v523_v6 = vmax.f32 %v469_v39, 0.0  ;;  %v447_v57 = vadd.f32 %v3205_v43, %v387_v46 }
  0xaf   : > { %v2440_v28 = vunpack.c.h.bf16 %v2543_v19 }
  0xb0   : > { %v501_v39 = vmax.f32 %v447_v57, 0.0 }
  0xb1   : > { %v646_v14 = vpop.permute.xlu0 %645  ;;  %v758_v17 = vpop.permute.xlu1 %757 }
  0xb2   : > { %2695 = vrot.lane.b32.xlu1 %v2694_v8, %s3099_s30  ;;  %2725 = vrot.lane.b32.xlu0 %v3347_v12, %s3100_s6  ;;  %v3362_v35 = vmul.f32 %v646_v14, %v499_v21  ;;  %v3366_v38 = vmul.f32 %v758_v17, %v521_v4  ;;  %v275_v8 = vld [vmem:[%s3185_s25 + $0x50] sm:$0x1]  ;;  %v411_v14 = vmul.f32 %v3196_v40, %v349_v11  ;;  %v502_v17 = vmax.f32 %v448_v60, 0.0 }
  0xb3   : > { %v2759_v4 = vpack.i.bf16 %v3376_v5, %v3374_v3  ;;  %v390_v60 = vmul.f32 %v2440_v28, %v3196_v40 }
  0xb4   : > { %v3383_v7 = vpack.i.bf16 %v3366_v38, %v3362_v35  ;;  %v471_v26 = vadd.f32 %v3205_v43, %v411_v14  ;;  %v353_v14 = vunpack.c.l.bf16 %v299_v45 }
  0xb5   : > { %v762_v29 = vpop.permute.xlu0 %761  ;;  %v766_v24 = vpop.permute.xlu1 %765 }
  0xb6   : > { %2700 = vrot.lane.b32.xlu1 %v2709_v56, %s3099_s30  ;;  %2730 = vrot.lane.b32.xlu0 %v2729_v25, %s3099_s30  ;;  %v470_v56 = vadd.f32 %v3205_v43, %v410_v34  ;;  %v3392_v21 = vmul.f32 %v762_v29, %v522_v48  ;;  %v3394_v2 = vmul.f32 %v766_v24, %v523_v6  ;;  %v525_v46 = vmax.f32 %v471_v26, 0.0 }
  0xb7   : > { %v389_v48 = vmul.f32 %v2439_v27, %v3196_v40 }
  0xb8   : > { %v524_v22 = vmax.f32 %v470_v56, 0.0  ;;  %v2769_v11 = vpack.i.bf16 %v3394_v2, %v3392_v21  ;;  %v2456_v56 = vunpack.c.h.bf16 %v2547_v13 }
  0xb9   : > { %v653_v58 = vpop.permute.xlu0 %652  ;;  %v657_v61 = vpop.permute.xlu1 %656  ;;  %v449_v19 = vadd.f32 %v3205_v43, %v389_v48 }
  0xba   : > { %2715 = vrot.lane.b32.xlu1 %v3304_v33, %s3100_s6  ;;  %2740 = vrot.lane.b32.xlu0 %v2684_v36, %s3099_s30  ;;  %v412_v33 = vmul.f32 %v3196_v40, %v350_v1  ;;  %v329_v36 = vunpack.c.l.bf16 %v275_v8  ;;  %v3419_v52 = vmul.f32 %v653_v58, %v500_v23  ;;  %v3421_v57 = vmul.f32 %v657_v61, %v501_v39 }
  0xbb   : > { %v414_v58 = vmul.f32 %v2456_v56, %v3196_v40  ;;  %v503_v48 = vmax.f32 %v449_v19, 0.0 }
  0xbc   : > { %v472_v24 = vadd.f32 %v3205_v43, %v412_v33  ;;  %v391_v34 = vmul.f32 %v3196_v40, %v329_v36  ;;  %v450_v33 = vadd.f32 %v3205_v43, %v390_v60 }
  0xbd   : > { %v661_v63 = vpop.permute.xlu0 %660  ;;  %v773_v18 = vpop.permute.xlu1 %772 }
  0xbe   : > { %2720 = vrot.lane.b32.xlu1 %v2729_v25, %s3100_s6  ;;  %2750 = vrot.lane.b32.xlu0 %v3383_v7, %s3099_s30  ;;  %v413_v25 = vmul.f32 %v2455_v20, %v3196_v40  ;;  %v3405_v37 = vmul.f32 %v661_v63, %v502_v17  ;;  %v3410_v9 = vmul.f32 %v773_v18, %v524_v22  ;;  %v526_v63 = vmax.f32 %v472_v24, 0.0  ;;  %v278_v17 = vld [vmem:[%s3185_s25 + $0x5c] sm:$0x1]  ;;  %v301_v18 = vld [vmem:[%s3185_s25 + $0xb4] sm:$0xff]  }
  0xbf   : > { %v451_v6 = vadd.f32 %v3205_v43, %v391_v34  ;;  %v276_v22 = vld [vmem:[%s3185_s25 + $0x54] sm:$0xff]   ;;  %v332_v26 = vunpack.c.l.bf16 %v278_v17  ;;  %v354_v27 = vunpack.c.l.bf16 %v301_v18  ;;  %v2789_v24 = vpack.i.bf16 %v3421_v57, %v3419_v52 }
  0xc0   : > { %v473_v8 = vadd.f32 %v3205_v43, %v413_v25  ;;  %v3427_v13 = vpack.i.bf16 %v3410_v9, %v3405_v37  ;;  %v474_v25 = vadd.f32 %v3205_v43, %v414_v58  ;;  %v330_v39 = vunpack.c.l.bf16 %v276_v22 }
  0xc1   : > { %v777_v32 = vpop.permute.xlu0 %776  ;;  %v781_v29 = vpop.permute.xlu1 %780  ;;  %v505_v61 = vmax.f32 %v451_v6, 0.0  ;;  %v331_v45 = vunpack.c.h.bf16 %v276_v22  ;;  %v504_v6 = vmax.f32 %v450_v33, 0.0  ;;  %v355_v17 = vunpack.c.h.bf16 %v301_v18 }
  0xc2   : > { %2735 = vrot.lane.b32.xlu1 %v3347_v12, %s3099_s30  ;;  %2760 = vrot.lane.b32.xlu0 %v2759_v4, %s3100_s6  ;;  %v3436_v28 = vmul.f32 %v777_v32, %v525_v46  ;;  %v3438_v23 = vmul.f32 %v781_v29, %v526_v63  ;;  %v527_v34 = vmax.f32 %v473_v8, 0.0  ;;  %v394_v46 = vmul.f32 %v3196_v40, %v332_v26  ;;  %v302_v63 = vld [vmem:[%s3185_s25 + $0xbc] sm:$0x1] }
  0xc3   : > { %v528_v19 = vmax.f32 %v474_v25, 0.0  ;;  %v392_v58 = vmul.f32 %v3196_v40, %v330_v39  ;;  %v2548_v25 = vld [vmem:[%s3185_s25 + $0xc0] sm:$0xff]   ;;  %v417_v39 = vmul.f32 %v3196_v40, %v355_v17 }
  0xc4   : > { %4283 = vst [vmem:[#allocation2_spill] sm:$0xff] %v3436_v28 }
  0xc5   : > { %v668_v1 = vpop.permute.xlu0 %667  ;;  %v672_v12 = vpop.permute.xlu1 %671 }
  0xc6   : > { %2745 = vrot.lane.b32.xlu1 %v2759_v4, %s3099_s30  ;;  %2770 = vrot.lane.b32.xlu0 %v2769_v11, %s3100_s6  ;;  %v415_v4 = vmul.f32 %v3196_v40, %v353_v14  ;;  %v2799_v14 = vpack.i.bf16 %v3438_v23, %v3436_v28  ;;  %v3465_v26 = vmul.f32 %v672_v12, %v504_v6 }
  0xc8   : > { %v475_v29 = vadd.f32 %v3205_v43, %v415_v4  ;;  %v3463_v4 = vmul.f32 %v668_v1, %v503_v48 }
  0xc9   : > { %v676_v36 = vpop.permute.xlu0 %675  ;;  %v788_v20 = vpop.permute.xlu1 %787 }
  0xca   : > { %2755 = vrot.lane.b32.xlu1 %v2769_v11, %s3099_s30  ;;  %2780 = vrot.lane.b32.xlu0 %v3427_v13, %s3100_s6  ;;  %v416_v11 = vmul.f32 %v3196_v40, %v354_v27  ;;  %v3449_v56 = vmul.f32 %v676_v36, %v505_v61  ;;  %v3454_v8 = vmul.f32 %v788_v20, %v527_v34  ;;  %v356_v20 = vunpack.c.l.bf16 %v302_v63  ;;  %v281_v34 = vld [vmem:[%s3185_s25 + $0x68] sm:$0x1] }
  0xcb   : > { %v393_v36 = vmul.f32 %v3196_v40, %v331_v45  ;;  %v454_v61 = vadd.f32 %v3205_v43, %v394_v46  ;;  %4286 = vst [vmem:[#allocation5_spill] sm:$0xff] %v3463_v4  ;;  %v529_v18 = vmax.f32 %v475_v29, 0.0  ;;  %v452_v45 = vadd.f32 %v3205_v43, %v392_v58 }
  0xcc   : > { %4284 = vst [vmem:[#allocation3_spill] sm:$0xff] %v3449_v56  ;;  %4285 = vst [vmem:[#allocation4_spill] sm:$0xff] %v3454_v8  ;;  %v476_v22 = vadd.f32 %v3205_v43, %v416_v11  ;;  %v3471_v27 = vpack.i.bf16 %v3454_v8, %v3449_v56  ;;  %v2544_v11 = vld [vmem:[%s3185_s25 + $0x60] sm:$0xff]   ;;  %v335_v6 = vunpack.c.l.bf16 %v281_v34  ;;  %v2459_v29 = vunpack.c.l.bf16 %v2548_v25 }
  0xcd   : > { %v792_v60 = vpop.permute.xlu0 %791  ;;  %v796_v32 = vpop.permute.xlu1 %795  ;;  %v453_v1 = vadd.f32 %v3205_v43, %v393_v36  ;;  %v508_v12 = vmax.f32 %v454_v61, 0.0  ;;  %v2819_v17 = vpack.i.bf16 %v3465_v26, %v3463_v4  ;;  %v477_v36 = vadd.f32 %v3205_v43, %v417_v39 }
  0xce   : > { %2765 = vrot.lane.b32.xlu1 %v3383_v7, %s3100_s6  ;;  %2790 = vrot.lane.b32.xlu0 %v2789_v24, %s3099_s30  ;;  %v3480_v63 = vmul.f32 %v792_v60, %v528_v19  ;;  %v3482_v56 = vmul.f32 %v796_v32, %v529_v18  ;;  %v530_v58 = vmax.f32 %v476_v22, 0.0  ;;  %v2443_v61 = vunpack.c.l.bf16 %v2544_v11 }
  0xcf   : > { %v506_v34 = vmax.f32 %v452_v45, 0.0  ;;  %v397_v19 = vmul.f32 %v3196_v40, %v335_v6  ;;  %v507_v28 = vmax.f32 %v453_v1, 0.0  ;;  %v305_v45 = vld [vmem:[%s3185_s25 + $0xc8] sm:$0x1] }
  0xd0   : > { %v2829_v39 = vpack.i.bf16 %v3482_v56, %v3480_v63 }
  0xd1   : > { %v683_v33 = vpop.permute.xlu0 %682  ;;  %v687_v7 = vpop.permute.xlu1 %686  ;;  %v457_v1 = vadd.f32 %v3205_v43, %v397_v19 }
  0xd2   : > { %2775 = vrot.lane.b32.xlu1 %v2789_v24, %s3100_s6  ;;  %2800 = vrot.lane.b32.xlu0 %v2799_v14, %s3099_s30  ;;  %v418_v24 = vmul.f32 %v3196_v40, %v356_v20  ;;  %v2444_v20 = vunpack.c.h.bf16 %v2544_v11  ;;  %v531_v11 = vmax.f32 %v477_v36, 0.0  ;;  %v3507_v4 = vmul.f32 %v683_v33, %v506_v34  ;;  %v306_v33 = vld [vmem:[%s3185_s25 + $0xcc] sm:$0xff]  }
  0xd4   : > { %v478_v32 = vadd.f32 %v3205_v43, %v418_v24  ;;  %v395_v24 = vmul.f32 %v2443_v61, %v3196_v40  ;;  %v396_v6 = vmul.f32 %v2444_v20, %v3196_v40  ;;  %4289 = vst [vmem:[#allocation8_spill] sm:$0xff] %v3507_v4  ;;  %v511_v20 = vmax.f32 %v457_v1, 0.0 }
  0xd5   : > { %v691_v48 = vpop.permute.xlu0 %690  ;;  %v803_v46 = vpop.permute.xlu1 %802 }
  0xd6   : > { %2785 = vrot.lane.b32.xlu1 %v2799_v14, %s3100_s6  ;;  %2810 = vrot.lane.b32.xlu0 %v3471_v27, %s3099_s30  ;;  %v419_v14 = vmul.f32 %v2459_v29, %v3196_v40  ;;  %v3493_v18 = vmul.f32 %v691_v48, %v508_v12  ;;  %v3498_v22 = vmul.f32 %v803_v46, %v530_v58  ;;  %v2460_v29 = vunpack.c.h.bf16 %v2548_v25 }
  0xd7   : > { %v359_v12 = vunpack.c.l.bf16 %v305_v45  ;;  %v3509_v46 = vmul.f32 %v687_v7, %v507_v28  ;;  %v532_v58 = vmax.f32 %v478_v32, 0.0  ;;  %v455_v61 = vadd.f32 %v3205_v43, %v395_v24 }
  0xd8   : > { %4287 = vst [vmem:[#allocation6_spill] sm:$0xff] %v3493_v18  ;;  %4288 = vst [vmem:[#allocation7_spill] sm:$0xff] %v3498_v22  ;;  %v2839_v36 = vpack.i.bf16 %v3498_v22, %v3493_v18  ;;  %v456_v19 = vadd.f32 %v3205_v43, %v396_v6  ;;  %v360_v24 = vunpack.c.l.bf16 %v306_v33 }
  0xd9   : > { %v807_v8 = vpop.permute.xlu0 %806  ;;  %v811_v60 = vpop.permute.xlu1 %810  ;;  %4290 = vst [vmem:[#allocation9_spill] sm:$0xff] %v3509_v46  ;;  %v421_v28 = vmul.f32 %v3196_v40, %v359_v12  ;;  %v2849_v34 = vpack.i.bf16 %v3509_v46, %v3507_v4  ;;  %v509_v6 = vmax.f32 %v455_v61, 0.0 }
  0xda   : > { %2795 = vrot.lane.b32.xlu1 %v3427_v13, %s3099_s30  ;;  %2820 = vrot.lane.b32.xlu0 %v2819_v17, %s3100_s6  ;;  %v479_v13 = vadd.f32 %v3205_v43, %v419_v14  ;;  %v420_v14 = vmul.f32 %v2460_v29, %v3196_v40  ;;  %v3520_v7 = vmul.f32 %v807_v8, %v531_v11 }
  0xdb   : > { %v481_v8 = vadd.f32 %v3205_v43, %v421_v28  ;;  %v422_v12 = vmul.f32 %v3196_v40, %v360_v24  ;;  %v361_v24 = vunpack.c.h.bf16 %v306_v33 }
  0xdc   : > { %4291 = vst [vmem:[#allocation10_spill] sm:$0xff] %v3520_v7  ;;  %v533_v32 = vmax.f32 %v479_v13, 0.0  ;;  %v480_v29 = vadd.f32 %v3205_v43, %v420_v14 }
  0xdd   : > { %v702_v48 = vpop.permute.xlu1 %701  ;;  %v698_v25 = vpop.permute.xlu0 %697 }
  0xde   : > { %2805 = vrot.lane.b32.xlu1 %v2819_v17, %s3099_s30  ;;  %2830 = vrot.lane.b32.xlu0 %v2829_v39, %s3100_s6  ;;  %v3522_v17 = vmul.f32 %v811_v60, %v532_v58  ;;  %v510_v60 = vmax.f32 %v456_v19, 0.0  ;;  %v534_v58 = vmax.f32 %v480_v29, 0.0  ;;  %v3538_v61 = vmul.f32 %v698_v25, %v509_v6  ;;  %v308_v19 = vld [vmem:[%s3185_s25 + $0xd4] sm:$0x1] }
  0xe0   : > { %4292 = vst [vmem:[#allocation11_spill] sm:$0xff] %v3522_v17  ;;  %v2859_v13 = vpack.i.bf16 %v3522_v17, %v3520_v7  ;;  %v3540_v14 = vmul.f32 %v702_v48, %v510_v60  ;;  %v423_v60 = vmul.f32 %v3196_v40, %v361_v24 }
  0xe1   : > { %v818_v45 = vpop.permute.xlu1 %817  ;;  %v706_v1 = vpop.permute.xlu0 %705 }
  0xe2   : > { %2815 = vrot.lane.b32.xlu1 %v2829_v39, %s3099_s30  ;;  %2840 = vrot.lane.b32.xlu0 %v2839_v36, %s3100_s6  ;;  %v3530_v11 = vmul.f32 %v706_v1, %v511_v20  ;;  %v890_v39 = vmul.f32 %v818_v45, %v533_v32  ;;  %v482_v45 = vadd.f32 %v3205_v43, %v422_v12  ;;  %v362_v1 = vunpack.c.l.bf16 %v308_v19 }
  0xe3   : > { %v2879_v25 = vpack.i.bf16 %v3540_v14, %v3538_v61  ;;  %v483_v33 = vadd.f32 %v3205_v43, %v423_v60 }
  0xe4   : > { %v2869_v20 = vpack.i.bf16 %v890_v39, %v3530_v11 }
  0xe5   : > { %v822_v28 = vpop.permute.xlu0 %821  ;;  %v826_v32 = vpop.permute.xlu1 %825 }
  0xe6   : > { %2825 = vrot.lane.b32.xlu1 %v3471_v27, %s3100_s6  ;;  %2850 = vrot.lane.b32.xlu0 %v2849_v34, %s3099_s30  ;;  %v535_v27 = vmax.f32 %v481_v8, 0.0  ;;  %v891_v7 = vmul.f32 %v822_v28, %v534_v58  ;;  %v424_v8 = vmul.f32 %v3196_v40, %v362_v1  ;;  %v3069_v1 = vld [vmem:[%s4262_s1] sm:$0xff]  }
  0xe7   : > { %2585 = vmatprep.subr.bf16.mxu0 %v3069_v1  ;;  %2627 = vmatprep.subr.bf16.mxu1 %v3069_v1 }
  0xe8   : > { %v892_v48 = vmul.f32 %v826_v32, %v535_v27  ;;  %v2894_v32 = vpack.i.bf16 %v3215_v54, %v3329_v62  ;;  %2586 = vmatpush3.bf16.msra.mxu0 %v3069_v1  ;;  %2632 = vmatpush3.bf16.msra.mxu1 %v3069_v1 }
  0xe9   : > { %v833_v6 = vpop.permute.xlu0 %832  ;;  %v837_v58 = vpop.permute.xlu1 %836 }
  0xea   : > { %2835 = vrot.lane.b32.xlu1 %v2849_v34, %s3100_s6  ;;  %2860 = vrot.lane.b32.xlu0 %v2859_v13, %s3099_s30  ;;  %v536_v34 = vmax.f32 %v482_v45, 0.0  ;;  %v2889_v29 = vpack.i.bf16 %v892_v48, %v891_v7  ;;  %v537_v7 = vmax.f32 %v483_v33, 0.0 }
  0xec   : > { %v893_v39 = vmul.f32 %v833_v6, %v536_v34  ;;  %v894_v28 = vmul.f32 %v837_v58, %v537_v7 }
  0xed   : > { %v841_v27 = vpop.permute.xlu0 %840  ;;  %v578_v34 = vpop.permute.xlu1 %577 }
  0xee   : > { %2845 = vrot.lane.b32.xlu1 %v2859_v13, %s3100_s6  ;;  %2870 = vrot.lane.b32.xlu0 %v2869_v20, %s3099_s30  ;;  %v484_v13 = vadd.f32 %v3205_v43, %v424_v8  ;;  %v2899_v12 = vpack.i.bf16 %v893_v39, %v3217_v55  ;;  %v257_v8 = vld [vmem:[%s3185_s25 + $0x8] sm:$0x1] }
  0xef   : > { %v311_v33 = vunpack.c.l.bf16 %v257_v8 }
  0xf1   : > { %v582_v48 = vpop.permute.xlu0 %581  ;;  %v586_v39 = vpop.permute.xlu1 %585  ;;  %v373_v58 = vmul.f32 %v3196_v40, %v311_v33 }
  0xf2   : > { %2855 = vrot.lane.b32.xlu1 %v2839_v36, %s3099_s30  ;;  %2880 = vrot.lane.b32.xlu0 %v2879_v25, %s3100_s6  ;;  %v538_v36 = vmax.f32 %v484_v13, 0.0 }
  0xf4   : > { %v895_v19 = vmul.f32 %v841_v27, %v538_v36 }
  0xf6   : > { %2865 = vrot.lane.b32.xlu1 %v2879_v25, %s3099_s30  ;;  %2890 = vrot.lane.b32.xlu0 %v2889_v29, %s3100_s6  ;;  %v2904_v45 = vpack.i.bf16 %v895_v19, %v894_v28 }
  0xfa   : > { %2875 = vrot.lane.b32.xlu1 %v2889_v29, %s3099_s30  ;;  %2900 = vrot.lane.b32.xlu0 %v2899_v12, %s3100_s6 }
  0xfe   : > { %2885 = vrot.lane.b32.xlu1 %v2869_v20, %s3100_s6  ;;  %v2426_v20 = vld [vmem:[%s3185_s25] sm:$0xff]   ;;  %s2392_s25 = sshll.u32 %s4317_s18, 7 }
  0xff   : > { %v2428_v25 = vunpack.c.h.bf16 %v2426_v20  ;;  %v2427_v6 = vunpack.c.l.bf16 %v2426_v20  ;;  %s4208_s18 = scalar_lea.vmem %s4266_s5, %s2392_s25 }
 0x101   : > { %v372_v29 = vmul.f32 %v2428_v25, %v3196_v40  ;;  %v371_v13 = vmul.f32 %v2427_v6, %v3196_v40  ;;  %v433_v6 = vadd.f32 %v3205_v43, %v373_v58 }
 0x102   : > { %2895 = vrot.lane.b32.xlu1 %v2894_v32, %s3100_s6 }
 0x103   : > { %v432_v12 = vadd.f32 %v3205_v43, %v372_v29  ;;  %v431_v7 = vadd.f32 %v3205_v43, %v371_v13  ;;  %v487_v43 = vmax.f32 %v433_v6, 0.0 }
 0x104   : > { %v2671_v24 = vpop.permute.xlu0 %2670 }
 0x105   : > { %v486_v27 = vmax.f32 %v432_v12, 0.0  ;;  %v2672_v19 = vunpack.i.l.bf16 %v2671_v24  ;;  %v485_v25 = vmax.f32 %v431_v7, 0.0 }
 0x106   : > { %2905 = vrot.lane.b32.xlu1 %v2904_v45, %s3100_s6  ;;  %v2673_v45 = vunpack.i.h.bf16 %v2671_v24 }
 0x107   : > { %v843_v8 = vmul.f32 %v582_v48, %v486_v27  ;;  %v1261_v29 = vsel %vm1235_vm5, %v3540_v14, %v2672_v19  ;;  %v842_v46 = vmul.f32 %v578_v34, %v485_v25 }
 0x108   : > { %v1262_v40 = vsel %vm1235_vm5, %v3530_v11, %v2673_v45 }
 0x114   : > { %v2681_v60 = vpop.permute.xlu0 %2680  ;;  %v2676_v28 = vpop.permute.xlu1 %2675 }
 0x115   : > { %v2682_v1 = vunpack.i.l.bf16 %v2681_v60  ;;  %v2683_v20 = vunpack.i.h.bf16 %v2681_v60  ;;  %v2678_v48 = vunpack.i.h.bf16 %v2676_v28  ;;  %v2677_v58 = vunpack.i.l.bf16 %v2676_v28 }
 0x117   : > { %v3583_v33 = vsel %vm1284_vm6, %v1261_v29, %v2682_v1  ;;  %v1311_v4 = vsel %vm1284_vm6, %v1262_v40, %v2683_v20  ;;  %v1265_v25 = vsel %vm1235_vm5, %v3217_v55, %v2678_v48 }
 0x118   : > { %v2691_v36 = vpop.permute.xlu0 %2690  ;;  %v4278_v14 = vrot.slane %v3583_v33, 1  ;;  %v1425_v11 = vrot.slane %v1311_v4, 1  ;;  %v4277_v45 = vrot.slane %v3583_v33, 2  ;;  %v1602_v20 = vrot.slane %v1311_v4, 2 }
 0x119   : > { %v2693_v12 = vunpack.i.h.bf16 %v2691_v36  ;;  %v2692_v24 = vunpack.i.l.bf16 %v2691_v36 }
 0x11b   : > { %v1236_v36 = vsel %vm1235_vm5, %v842_v46, %v2692_v24  ;;  %v1237_v1 = vsel %vm1235_vm5, %v843_v8, %v2693_v12 }
 0x11c   : > { %v2706_v32 = vpop.permute.xlu0 %2705 }
 0x11d   : > { %v2708_v29 = vunpack.i.h.bf16 %v2706_v32  ;;  %v2707_v6 = vunpack.i.l.bf16 %v2706_v32 }
 0x11f   : > { %v1263_v55 = vsel %vm1235_vm5, %v3329_v62, %v2708_v29 }
 0x120   : > { %v2686_v17 = vpop.permute.xlu1 %2685  ;;  %v2711_v13 = vpop.permute.xlu0 %2710 }
 0x121   : > { %v2713_v60 = vunpack.i.h.bf16 %v2711_v13  ;;  %v2712_v7 = vunpack.i.l.bf16 %v2711_v13  ;;  %v2688_v27 = vunpack.i.h.bf16 %v2686_v17  ;;  %v2687_v19 = vunpack.i.l.bf16 %v2686_v17 }
 0x122   : > { %v1264_v17 = vsel %vm1235_vm5, %v3215_v54, %v2677_v58  ;;  %v844_v13 = vmul.f32 %v586_v39, %v487_v43  ;;  %v3611_v54 = vsel %vm1381_vm7, %v4278_v14, %v1425_v11  ;;  %v1241_v43 = vsel %vm1235_vm5, %v3315_v44, %v2707_v6 }
 0x123   : > { %v3591_v34 = vsel %vm1284_vm6, %v1236_v36, %v2712_v7  ;;  %v3594_v28 = vsel %vm1284_vm6, %v1237_v1, %v2713_v60  ;;  %v3601_v46 = vsel %vm1284_vm6, %v1264_v17, %v2687_v19  ;;  %v1314_v4 = vsel %vm1284_vm6, %v1265_v25, %v2688_v27  ;;  %v3070_v19 = vld [vmem:[%s4262_s1 + $0x8] sm:$0xff]  }
 0x124   : > { %v2696_v18 = vpop.permute.xlu1 %2695  ;;  %v2726_v22 = vpop.permute.xlu0 %2725  ;;  %4293 = vst [vmem:[#allocation12_spill] sm:$0xff] %v3591_v34  ;;  %4294 = vst [vmem:[#allocation13_spill] sm:$0xff] %v3601_v46  ;;  %v1382_v12 = vrot.slane %v3591_v34, 1  ;;  %v1383_v24 = vrot.slane %v3594_v28, 1  ;;  %v3618_v7 = vsel %vm1558_vm8, %v4277_v45, %v1602_v20  ;;  %v1428_v48 = vrot.slane %v3601_v46, 1  ;;  %2587 = vmatprep.subr.bf16.mxu0 %v3070_v19  ;;  %2628 = vmatprep.subr.bf16.mxu1 %v3070_v19 }
 0x125   : > { %v2728_v60 = vunpack.i.h.bf16 %v2726_v22  ;;  %v2698_v39 = vunpack.i.h.bf16 %v2696_v18  ;;  %v2697_v32 = vunpack.i.l.bf16 %v2696_v18  ;;  %v1430_v58 = vrot.slane %v1314_v4, 1  ;;  %2588 = vmatpush3.bf16.msra.mxu0 %v3070_v19  ;;  %2633 = vmatpush3.bf16.msra.mxu1 %v3070_v19 }
 0x126   : > { %v2727_v27 = vunpack.i.l.bf16 %v2726_v22  ;;  %v1605_v62 = vrot.slane %v3601_v46, 2  ;;  %v1607_v11 = vrot.slane %v1314_v4, 2  ;;  %v1559_v18 = vrot.slane %v3591_v34, 2 }
 0x127   : > { %v4281_v36 = vrot.slane %v3594_v28, 2  ;;  %v3632_v44 = vsel %vm1284_vm6, %v1263_v55, %v2728_v60  ;;  %v1384_v22 = vsel %vm1381_vm7, %v1382_v12, %v1383_v24  ;;  %v1260_v25 = vsel %vm1235_vm5, %v3538_v61, %v2698_v39 }
 0x128   : > { %v2701_v8 = vpop.permute.xlu1 %2700  ;;  %v3604_v40 = vpop.permute.xlu0 %2730  ;;  %4295 = vst [vmem:[#allocation14_spill] sm:$0xff] %v3632_v44  ;;  %v1238_v6 = vsel %vm1235_vm5, %v844_v13, %v2697_v32  ;;  %v3639_v14 = vsel %vm1284_vm6, %v1241_v43, %v2727_v27  ;;  %v3648_v12 = vsel %vm1381_vm7, %v1428_v48, %v1430_v58  ;;  %v1427_v61 = vrot.slane %v3632_v44, 1  ;;  %v3071_v58 = vld [vmem:[%s4262_s1 + $0x10] sm:$0xff]  }
 0x129   : > { %v2703_v4 = vunpack.i.h.bf16 %v2701_v8  ;;  %v2702_v45 = vunpack.i.l.bf16 %v2701_v8  ;;  %v1604_v13 = vrot.slane %v3632_v44, 2  ;;  %v2733_v27 = vunpack.i.h.bf16 %v3604_v40  ;;  %2589 = vmatprep.subr.bf16.mxu0 %v3071_v58  ;;  %2629 = vmatprep.subr.bf16.mxu1 %v3071_v58 }
 0x12a   : > { %v2732_v19 = vunpack.i.l.bf16 %v3604_v40  ;;  %v3671_v44 = vsel %vm1558_vm8, %v1605_v62, %v1607_v11  ;;  %v4296_v46 = vrot.slane %v3583_v33, 1  ;;  %v1390_v11 = vrot.slane %v3639_v14, 1  ;;  %2590 = vmatpush3.bf16.msra.mxu0 %v3071_v58  ;;  %2634 = vmatpush3.bf16.msra.mxu1 %v3071_v58 }
 0x12c   : > { %v2716_v1 = vpop.permute.xlu1 %2715  ;;  %v3629_v20 = vpop.permute.xlu0 %2740 }
 0x12d   : > { %v2718_v29 = vunpack.i.h.bf16 %v2716_v1  ;;  %v2717_v17 = vunpack.i.l.bf16 %v2716_v1 }
 0x12f   : > { %v3642_v60 = vsel %vm1284_vm6, %v1238_v6, %v2717_v17  ;;  %v3645_v55 = vsel %vm1284_vm6, %v1260_v25, %v2718_v29  ;;  %v1239_v17 = vsel %vm1235_vm5, %v3274_v0, %v2702_v45  ;;  %v1240_v25 = vsel %vm1235_vm5, %v3261_v59, %v2703_v4  ;;  %v3072_v45 = vld [vmem:[%s4262_s1 + $0x18] sm:$0xff]  }
 0x130   : > { %v1385_v8 = vrot.slane %v3642_v60, 1  ;;  %v1422_v39 = vrot.slane %v3645_v55, 1  ;;  %v2721_v32 = vpop.permute.xlu1 %2720  ;;  %v3654_v43 = vpop.permute.xlu0 %2750  ;;  %v3668_v6 = vsel %vm1558_vm8, %v1559_v18, %v4281_v36  ;;  %2591 = vmatprep.subr.bf16.mxu0 %v3072_v45  ;;  %v1599_v36 = vrot.slane %v3645_v55, 2  ;;  %2630 = vmatprep.subr.bf16.mxu1 %v3072_v45 }
 0x131   : > { %v2723_v1 = vunpack.i.h.bf16 %v2721_v32  ;;  %v2722_v29 = vunpack.i.l.bf16 %v2721_v32  ;;  %2592 = vmatpush3.bf16.msra.mxu0 %v3072_v45  ;;  %2635 = vmatpush3.bf16.msra.mxu1 %v3072_v45 }
 0x132   : > { %v1424_v0 = vsel %vm1381_vm7, %v1422_v39, %v4296_v46  ;;  %v1386_v59 = vsel %vm1381_vm7, %v1383_v24, %v1385_v8  ;;  %v1567_v46 = vrot.slane %v3639_v14, 2  ;;  %v1243_v24 = vsel %vm1235_vm5, %v3297_v30, %v2733_v27 }
 0x133   : > { %v3674_v40 = vsel %vm1284_vm6, %v1239_v17, %v2722_v29  ;;  %v3677_v32 = vsel %vm1284_vm6, %v1240_v25, %v2723_v1  ;;  %v1429_v17 = vsel %vm1381_vm7, %v1427_v61, %v1428_v48  ;;  %v1242_v8 = vsel %vm1235_vm5, %v3300_v31, %v2732_v19 }
 0x134   : > { %v1387_v18 = vrot.slane %v3674_v40, 1  ;;  %v1388_v4 = vrot.slane %v3677_v32, 1  ;;  %v2736_v29 = vpop.permute.xlu1 %2735  ;;  %v2761_v1 = vpop.permute.xlu0 %2760  ;;  %v3696_v39 = vsel %vm1558_vm8, %v1604_v13, %v1605_v62  ;;  %v1562_v25 = vrot.slane %v3642_v60, 2 }
 0x135   : > { %v2909_v48 = vpack.i.bf16 %v3611_v54, %v1424_v0  ;;  %v2969_v61 = vpack.i.bf16 %v1386_v59, %v1384_v22  ;;  %v2743_v14 = vunpack.i.h.bf16 %v3629_v20  ;;  %v2762_v34 = vunpack.i.l.bf16 %v2761_v1 }
 0x136   : > { %v1389_v30 = vsel %vm1381_vm7, %v1387_v18, %v1388_v4  ;;  %v1391_v31 = vsel %vm1381_vm7, %v1388_v4, %v1390_v11  ;;  %v2742_v62 = vunpack.i.l.bf16 %v3629_v20  ;;  %v2753_v13 = vunpack.i.h.bf16 %v3654_v43 }
 0x137   : > { %2910 = vrot.lane.b32.xlu1 %v2909_v48, %s3101_s15  ;;  %2970 = vrot.lane.b32.xlu0 %v2969_v61, %s3101_s15  ;;  %v2914_v22 = vpack.i.bf16 %v3648_v12, %v1429_v17  ;;  %v2924_v27 = vpack.i.bf16 %v3671_v44, %v3696_v39  ;;  %v2752_v19 = vunpack.i.l.bf16 %v3654_v43  ;;  %v2738_v58 = vunpack.i.h.bf16 %v2736_v29 }
 0x138   : > { %v2746_v60 = vpop.permute.xlu1 %2745  ;;  %v2771_v54 = vpop.permute.xlu0 %2770  ;;  %v2737_v0 = vunpack.i.l.bf16 %v2736_v29  ;;  %v2763_v59 = vunpack.i.h.bf16 %v2761_v1  ;;  %v2974_v11 = vpack.i.bf16 %v1391_v31, %v1389_v30  ;;  %v4297_v18 = vrot.slane %v3583_v33, 2 }
 0x139   : > { %v2772_v20 = vunpack.i.l.bf16 %v2771_v54  ;;  %v4298_v48 = vrot.slane %v3594_v28, 2  ;;  %v1564_v17 = vrot.slane %v3674_v40, 2  ;;  %v1565_v44 = vrot.slane %v3677_v32, 2 }
 0x13a   : > { %v1601_v4 = vsel %vm1558_vm8, %v1599_v36, %v4297_v18  ;;  %v3721_v43 = vsel %vm1284_vm6, %v1242_v8, %v2762_v34  ;;  %v2773_v29 = vunpack.i.h.bf16 %v2771_v54  ;;  %v1268_v45 = vsel %vm1235_vm5, %v3253_v49, %v2743_v14 }
 0x13b   : > { %v1563_v12 = vsel %vm1558_vm8, %v4298_v48, %v1562_v25  ;;  %v1267_v1 = vsel %vm1235_vm5, %v3255_v50, %v2742_v62  ;;  %v3729_v36 = vsel %vm1235_vm5, %v3318_v51, %v2753_v13  ;;  %v2748_v39 = vunpack.i.h.bf16 %v2746_v60  ;;  %2915 = vrot.lane.b32.xlu1 %v2914_v22, %s3101_s15  ;;  %2975 = vrot.lane.b32.xlu0 %v2974_v11, %s3101_s15 }
 0x13c   : > { %v3733_v25 = vpop.permute.xlu1 %2755  ;;  %v2781_v34 = vpop.permute.xlu0 %2780  ;;  %v1247_v8 = vsel %vm1235_vm5, %v3320_v53, %v2752_v19  ;;  %v1266_v49 = vsel %vm1235_vm5, %v3286_v15, %v2738_v58  ;;  %v1244_v50 = vsel %vm1235_vm5, %v3288_v16, %v2737_v0  ;;  %v3742_v51 = vsel %vm1284_vm6, %v1243_v24, %v2763_v59  ;;  %v3758_v24 = vld [vmem:[%s4262_s1 + $0x20] ss:$0 sps:$4 sm:$0xff]  }
 0x13d   : > { %v1392_v61 = vrot.slane %v3721_v43, 1  ;;  %v3746_v14 = vsel %vm1284_vm6, %v1267_v1, %v2772_v20  ;;  %v2919_v30 = vpack.i.bf16 %v3618_v7, %v1601_v4  ;;  %v2979_v31 = vpack.i.bf16 %v1563_v12, %v3668_v6  ;;  %2637 = vmatprep.subr.msk.bf16.mxu0 %vm1909_vm9, %v3758_v24  ;;  %2638 = vmatprep.subr.msk.bf16.mxu1 %vm1909_vm9, %v3758_v24 }
 0x13e   : > { %v2747_v62 = vunpack.i.l.bf16 %v2746_v60  ;;  %v3751_v53 = vsel %vm1284_vm6, %v1268_v45, %v2773_v29  ;;  %v1566_v15 = vsel %vm1558_vm8, %v1564_v17, %v1565_v44  ;;  %v1568_v16 = vsel %vm1558_vm8, %v1565_v44, %v1567_v46 }
 0x13f   : > { %v1393_v13 = vrot.slane %v3742_v51, 1  ;;  %v1569_v54 = vrot.slane %v3721_v43, 2  ;;  %v1570_v7 = vrot.slane %v3742_v51, 2  ;;  %v1246_v6 = vsel %vm1235_vm5, %v3340_v10, %v2748_v39  ;;  %2920 = vrot.lane.b32.xlu1 %v2919_v30, %s3102_s22  ;;  %2980 = vrot.lane.b32.xlu0 %v2979_v31, %s3102_s22 }
 0x140   : > { %v2766_v46 = vpop.permute.xlu1 %2765  ;;  %v3767_v60 = vpop.permute.xlu0 %2790  ;;  %v1433_v22 = vrot.slane %v3746_v14, 1  ;;  %v2782_v19 = vunpack.i.l.bf16 %v2781_v34  ;;  %v1435_v59 = vrot.slane %v3751_v53, 1  ;;  %v2758_v20 = vunpack.i.h.bf16 %v3733_v25 }
 0x141   : > { %v2768_v58 = vunpack.i.h.bf16 %v2766_v46  ;;  %v2767_v0 = vunpack.i.l.bf16 %v2766_v46  ;;  %v2984_v11 = vpack.i.bf16 %v1568_v16, %v1566_v15  ;;  %v1245_v10 = vsel %vm1235_vm5, %v3343_v47, %v2747_v62 }
 0x142   : > { %v1610_v18 = vrot.slane %v3746_v14, 2  ;;  %v1612_v12 = vrot.slane %v3751_v53, 2  ;;  %v2783_v17 = vunpack.i.h.bf16 %v2781_v34  ;;  %v2757_v1 = vunpack.i.l.bf16 %v3733_v25 }
 0x143   : > { %v1293_v4 = vsel %vm1284_vm6, %v1244_v50, %v2767_v0  ;;  %v3777_v48 = vsel %vm1284_vm6, %v1266_v49, %v2768_v58  ;;  %2925 = vrot.lane.b32.xlu1 %v2924_v27, %s3102_s22  ;;  %2985 = vrot.lane.b32.xlu0 %v2984_v11, %s3102_s22  ;;  %v3789_v39 = vsel %vm1284_vm6, %v1247_v8, %v2782_v19  ;;  %v2793_v19 = vunpack.i.h.bf16 %v3767_v60 }
 0x144   : > { %v1395_v44 = vrot.slane %v1293_v4, 1  ;;  %v1432_v29 = vrot.slane %v3777_v48, 1  ;;  %v2776_v47 = vpop.permute.xlu1 %2775  ;;  %v3785_v45 = vpop.permute.xlu0 %2800  ;;  %v1271_v34 = vsel %vm1235_vm5, %v3306_v41, %v2758_v20  ;;  %v1436_v27 = vsel %vm1381_vm7, %v1433_v22, %v1435_v59 }
 0x145   : > { %v2778_v49 = vunpack.i.h.bf16 %v2776_v47  ;;  %v2777_v50 = vunpack.i.l.bf16 %v2776_v47  ;;  %v1394_v30 = vsel %vm1381_vm7, %v1392_v61, %v1393_v13  ;;  %v3800_v31 = vsel %vm1558_vm8, %v1569_v54, %v1570_v7 }
 0x146   : > { %v1434_v62 = vsel %vm1381_vm7, %v1432_v29, %v1433_v22  ;;  %v1396_v53 = vsel %vm1381_vm7, %v1393_v13, %v1395_v44  ;;  %v3812_v41 = vsel %vm1284_vm6, %v3729_v36, %v2783_v17  ;;  %v1400_v61 = vrot.slane %v3789_v39, 1 }
 0x147   : > { %v3803_v25 = vsel %vm1284_vm6, %v1245_v10, %v2777_v50  ;;  %v3806_v8 = vsel %vm1284_vm6, %v1246_v6, %v2778_v49  ;;  %v2792_v6 = vunpack.i.l.bf16 %v3767_v60  ;;  %v1270_v13 = vsel %vm1235_vm5, %v3308_v42, %v2757_v1 }
 0x148   : > { %v1397_v15 = vrot.slane %v3803_v25, 1  ;;  %v1398_v16 = vrot.slane %v3806_v8, 1  ;;  %v2786_v54 = vpop.permute.xlu1 %2785  ;;  %v2811_v46 = vpop.permute.xlu0 %2810  ;;  %v1572_v0 = vrot.slane %v1293_v4, 2  ;;  %v2929_v36 = vpack.i.bf16 %v1436_v27, %v1434_v62 }
 0x149   : > { %v2788_v58 = vunpack.i.h.bf16 %v2786_v54  ;;  %v2787_v22 = vunpack.i.l.bf16 %v2786_v54  ;;  %v2989_v59 = vpack.i.bf16 %v1396_v53, %v1394_v30  ;;  %v1437_v60 = vrot.slane %v3812_v41, 1 }
 0x14a   : > { %v1399_v10 = vsel %vm1381_vm7, %v1397_v15, %v1398_v16  ;;  %v1401_v17 = vsel %vm1381_vm7, %v1398_v16, %v1400_v61  ;;  %v1609_v44 = vrot.slane %v3777_v48, 2  ;;  %2930 = vrot.lane.b32.xlu1 %v2929_v36, %s3101_s15  ;;  %v1577_v1 = vrot.slane %v3789_v39, 2 }
 0x14b   : > { %v3822_v20 = vsel %vm1284_vm6, %v1270_v13, %v2787_v22  ;;  %v3825_v11 = vsel %vm1284_vm6, %v1271_v34, %v2788_v58  ;;  %2990 = vrot.lane.b32.xlu0 %v2989_v59, %s3101_s15  ;;  %v1249_v49 = vsel %vm1235_vm5, %v3376_v5, %v2793_v19  ;;  %v1248_v50 = vsel %vm1235_vm5, %v3374_v3, %v2792_v6 }
 0x14c   : > { %v1438_v29 = vrot.slane %v3822_v20, 1  ;;  %v1440_v42 = vrot.slane %v3825_v11, 1  ;;  %v2796_v4 = vpop.permute.xlu1 %2795  ;;  %v2821_v47 = vpop.permute.xlu0 %2820  ;;  %v1613_v34 = vsel %vm1558_vm8, %v1610_v18, %v1612_v12  ;;  %v1574_v27 = vrot.slane %v3803_v25, 2 }
 0x14d   : > { %v2803_v30 = vunpack.i.h.bf16 %v3785_v45  ;;  %v2994_v62 = vpack.i.bf16 %v1401_v17, %v1399_v10  ;;  %v1573_v53 = vsel %vm1558_vm8, %v1570_v7, %v1572_v0  ;;  %v1575_v39 = vrot.slane %v3806_v8, 2 }
 0x14e   : > { %v2822_v61 = vunpack.i.l.bf16 %v2821_v47  ;;  %v1439_v5 = vsel %vm1381_vm7, %v1437_v60, %v1438_v29  ;;  %v1441_v3 = vsel %vm1381_vm7, %v1438_v29, %v1440_v42  ;;  %v2802_v15 = vunpack.i.l.bf16 %v3785_v45 }
 0x14f   : > { %v2813_v16 = vunpack.i.h.bf16 %v2811_v46  ;;  %v2812_v12 = vunpack.i.l.bf16 %v2811_v46  ;;  %2995 = vrot.lane.b32.xlu0 %v2994_v62, %s3101_s15  ;;  %v1611_v6 = vsel %vm1558_vm8, %v1609_v44, %v1610_v18  ;;  %v1615_v7 = vrot.slane %v3822_v20, 2 }
 0x150   : > { %v2806_v54 = vpop.permute.xlu1 %2805  ;;  %v2831_v19 = vpop.permute.xlu0 %2830  ;;  %v2798_v58 = vunpack.i.h.bf16 %v2796_v4  ;;  %v2823_v22 = vunpack.i.h.bf16 %v2821_v47  ;;  %v1617_v0 = vrot.slane %v3825_v11, 2  ;;  %v2797_v36 = vunpack.i.l.bf16 %v2796_v4 }
 0x151   : > { %v2832_v13 = vunpack.i.l.bf16 %v2831_v19  ;;  %v2934_v59 = vpack.i.bf16 %v1441_v3, %v1439_v5  ;;  %v2999_v45 = vpack.i.bf16 %v1573_v53, %v3800_v31  ;;  %v3860_v46 = vsel %vm1284_vm6, %v1248_v50, %v2822_v61 }
 0x152   : > { %v2833_v10 = vunpack.i.h.bf16 %v2831_v19  ;;  %v1576_v17 = vsel %vm1558_vm8, %v1574_v27, %v1575_v39  ;;  %v1578_v60 = vsel %vm1558_vm8, %v1575_v39, %v1577_v1  ;;  %v1614_v18 = vrot.slane %v3812_v41, 2 }
 0x153   : > { %v1274_v44 = vsel %vm1235_vm5, %v3394_v2, %v2803_v30  ;;  %v1273_v11 = vsel %vm1235_vm5, %v3392_v21, %v2802_v15  ;;  %v1275_v29 = vsel %vm1235_vm5, %v3410_v9, %v2813_v16  ;;  %2935 = vrot.lane.b32.xlu1 %v2934_v59, %s3101_s15  ;;  %3000 = vrot.lane.b32.xlu0 %v2999_v45, %s3102_s22  ;;  %v1402_v1 = vrot.slane %v3860_v46, 1 }
 0x154   : > { %v2816_v31 = vpop.permute.xlu1 %2815  ;;  %v2841_v42 = vpop.permute.xlu0 %2840  ;;  %v1253_v4 = vsel %vm1235_vm5, %v3405_v37, %v2812_v12  ;;  %v1272_v47 = vsel %vm1235_vm5, %v3366_v38, %v2798_v58  ;;  %v3878_v2 = vsel %vm1284_vm6, %v1249_v49, %v2823_v22  ;;  %v3881_v21 = vsel %vm1284_vm6, %v1273_v11, %v2832_v13 }
 0x155   : > { %v1250_v9 = vsel %vm1235_vm5, %v3362_v35, %v2797_v36  ;;  %v2939_v50 = vpack.i.bf16 %v1613_v34, %v1611_v6  ;;  %v3004_v27 = vpack.i.bf16 %v1578_v60, %v1576_v17  ;;  %v2808_v30 = vunpack.i.h.bf16 %v2806_v54 }
 0x156   : > { %v3887_v62 = vsel %vm1284_vm6, %v1274_v44, %v2833_v10  ;;  %v1616_v37 = vsel %vm1558_vm8, %v1614_v18, %v1615_v7  ;;  %v1618_v38 = vsel %vm1558_vm8, %v1615_v7, %v1617_v0  ;;  %v1403_v49 = vrot.slane %v3878_v2, 1 }
 0x157   : > { %v1579_v53 = vrot.slane %v3860_v46, 2  ;;  %v2807_v39 = vunpack.i.l.bf16 %v2806_v54  ;;  %v1443_v61 = vrot.slane %v3881_v21, 1  ;;  %2940 = vrot.lane.b32.xlu1 %v2939_v50, %s3102_s22  ;;  %3005 = vrot.lane.b32.xlu0 %v3004_v27, %s3102_s22  ;;  %v2843_v5 = vunpack.i.h.bf16 %v2841_v42 }
 0x158   : > { %v2826_v35 = vpop.permute.xlu1 %2825  ;;  %v3896_v34 = vpop.permute.xlu0 %2850  ;;  %v2842_v3 = vunpack.i.l.bf16 %v2841_v42  ;;  %v1445_v12 = vrot.slane %v3887_v62, 1  ;;  %v2818_v19 = vunpack.i.h.bf16 %v2816_v31  ;;  %v2817_v6 = vunpack.i.l.bf16 %v2816_v31  ;;  %v4299_v31 = vld [vmem:[#allocation2_spill] sm:$0xff] }
 0x159   : > { %v2828_v15 = vunpack.i.h.bf16 %v2826_v35  ;;  %v2827_v16 = vunpack.i.l.bf16 %v2826_v35  ;;  %v2944_v7 = vpack.i.bf16 %v1618_v38, %v1616_v37  ;;  %v1580_v54 = vrot.slane %v3878_v2, 2 }
 0x15a   : > { %v1252_v58 = vsel %vm1235_vm5, %v3421_v57, %v2808_v30  ;;  %v1251_v0 = vsel %vm1235_vm5, %v3419_v52, %v2807_v39  ;;  %v1620_v36 = vrot.slane %v3881_v21, 2  ;;  %v3914_v57 = vsel %vm1284_vm6, %v1253_v4, %v2842_v3 }
 0x15b   : > { %v1299_v22 = vsel %vm1284_vm6, %v1250_v9, %v2827_v16  ;;  %v3904_v13 = vsel %vm1284_vm6, %v1272_v47, %v2828_v15  ;;  %2945 = vrot.lane.b32.xlu1 %v2944_v7, %s3102_s22  ;;  %v3917_v60 = vsel %vm1284_vm6, %v1275_v29, %v2843_v5  ;;  %v1622_v52 = vrot.slane %v3887_v62, 2 }
 0x15c   : > { %v1405_v59 = vrot.slane %v1299_v22, 1  ;;  %v1442_v45 = vrot.slane %v3904_v13, 1  ;;  %v2836_v10 = vpop.permute.xlu1 %2835  ;;  %v3911_v17 = vpop.permute.xlu0 %2860  ;;  %v1277_v11 = vsel %vm1235_vm5, %v3438_v23, %v2818_v19  ;;  %v1276_v42 = vsel %vm1235_vm5, %v4299_v31, %v2817_v6 }
 0x15d   : > { %v2838_v18 = vunpack.i.h.bf16 %v2836_v10  ;;  %v2837_v44 = vunpack.i.l.bf16 %v2836_v10  ;;  %v1446_v47 = vsel %vm1381_vm7, %v1443_v61, %v1445_v12  ;;  %v1410_v27 = vrot.slane %v3914_v57, 1 }
 0x15e   : > { %v1444_v29 = vsel %vm1381_vm7, %v1442_v45, %v1443_v61  ;;  %v1406_v50 = vsel %vm1381_vm7, %v1403_v49, %v1405_v59  ;;  %v1447_v30 = vrot.slane %v3917_v60, 1  ;;  %v2853_v39 = vunpack.i.h.bf16 %v3896_v34 }
 0x15f   : > { %v3926_v9 = vsel %vm1284_vm6, %v1251_v0, %v2837_v44  ;;  %v3929_v4 = vsel %vm1284_vm6, %v1252_v58, %v2838_v18  ;;  %v1404_v3 = vsel %vm1381_vm7, %v1402_v1, %v1403_v49  ;;  %v1582_v15 = vrot.slane %v1299_v22, 2 }
 0x160   : > { %v1407_v23 = vrot.slane %v3926_v9, 1  ;;  %v1408_v62 = vrot.slane %v3929_v4, 1  ;;  %v2846_v37 = vpop.permute.xlu1 %2845  ;;  %v2871_v38 = vpop.permute.xlu0 %2870  ;;  %v2852_v61 = vunpack.i.l.bf16 %v3896_v34  ;;  %v2949_v16 = vpack.i.bf16 %v1446_v47, %v1444_v29 }
 0x161   : > { %v2848_v35 = vunpack.i.h.bf16 %v2846_v37  ;;  %v2847_v5 = vunpack.i.l.bf16 %v2846_v37  ;;  %v3009_v12 = vpack.i.bf16 %v1406_v50, %v1404_v3  ;;  %v1619_v0 = vrot.slane %v3904_v13, 2 }
 0x162   : > { %v1409_v7 = vsel %vm1381_vm7, %v1407_v23, %v1408_v62  ;;  %v1411_v58 = vsel %vm1381_vm7, %v1408_v62, %v1410_v27  ;;  %v2863_v59 = vunpack.i.h.bf16 %v3911_v17  ;;  %2950 = vrot.lane.b32.xlu1 %v2949_v16, %s3101_s15  ;;  %v1587_v45 = vrot.slane %v3914_v57, 2 }
 0x163   : > { %v3941_v19 = vsel %vm1284_vm6, %v1276_v42, %v2847_v5  ;;  %v3944_v6 = vsel %vm1284_vm6, %v1277_v11, %v2848_v35  ;;  %3010 = vrot.lane.b32.xlu0 %v3009_v12, %s3101_s15  ;;  %v1255_v10 = vsel %vm1235_vm5, %v3465_v26, %v2853_v39  ;;  %v1581_v18 = vsel %vm1558_vm8, %v1579_v53, %v1580_v54  ;;  %v4300_v11 = vld [vmem:[#allocation5_spill] sm:$0xff] }
 0x164   : > { %v1448_v1 = vrot.slane %v3941_v19, 1  ;;  %v1450_v49 = vrot.slane %v3944_v6, 1  ;;  %v2856_v34 = vpop.permute.xlu1 %2855  ;;  %v2881_v22 = vpop.permute.xlu0 %2880  ;;  %v1623_v44 = vsel %vm1558_vm8, %v1620_v36, %v1622_v52  ;;  %v1254_v31 = vsel %vm1235_vm5, %v4300_v11, %v2852_v61 }
 0x165   : > { %v2862_v42 = vunpack.i.l.bf16 %v3911_v17  ;;  %v3014_v47 = vpack.i.bf16 %v1411_v58, %v1409_v7  ;;  %v1583_v29 = vsel %vm1558_vm8, %v1580_v54, %v1582_v15  ;;  %v1584_v57 = vrot.slane %v3926_v9, 2  ;;  %v4301_v58 = vld [vmem:[#allocation7_spill] sm:$0xff] }
 0x166   : > { %v1585_v26 = vrot.slane %v3929_v4, 2  ;;  %v1449_v50 = vsel %vm1381_vm7, %v1447_v30, %v1448_v1  ;;  %v1451_v53 = vsel %vm1381_vm7, %v1448_v1, %v1450_v49  ;;  %v1280_v27 = vsel %vm1235_vm5, %v3482_v56, %v2863_v59  ;;  %v4302_v59 = vld [vmem:[#allocation6_spill] sm:$0xff] }
 0x167   : > { %v2873_v52 = vunpack.i.h.bf16 %v2871_v38  ;;  %v2872_v23 = vunpack.i.l.bf16 %v2871_v38  ;;  %3015 = vrot.lane.b32.xlu0 %v3014_v47, %s3101_s15  ;;  %v1621_v54 = vsel %vm1558_vm8, %v1619_v0, %v1620_v36  ;;  %v2883_v37 = vunpack.i.h.bf16 %v2881_v22 }
 0x168   : > { %v2866_v62 = vpop.permute.xlu1 %2865  ;;  %v2891_v17 = vpop.permute.xlu0 %2890  ;;  %v2882_v39 = vunpack.i.l.bf16 %v2881_v22  ;;  %v1625_v30 = vrot.slane %v3941_v19, 2  ;;  %v2858_v3 = vunpack.i.h.bf16 %v2856_v34  ;;  %v2954_v15 = vpack.i.bf16 %v1451_v53, %v1449_v50 }
 0x169   : > { %v2893_v35 = vunpack.i.h.bf16 %v2891_v17  ;;  %v2892_v5 = vunpack.i.l.bf16 %v2891_v17  ;;  %v3019_v61 = vpack.i.bf16 %v1583_v29, %v1581_v18  ;;  %v1627_v56 = vrot.slane %v3944_v6, 2 }
 0x16a   : > { %v2857_v38 = vunpack.i.l.bf16 %v2856_v34  ;;  %v1586_v16 = vsel %vm1558_vm8, %v1584_v57, %v1585_v26  ;;  %v1588_v12 = vsel %vm1558_vm8, %v1585_v26, %v1587_v45  ;;  %v1624_v7 = vrot.slane %v3917_v60, 2  ;;  %2955 = vrot.lane.b32.xlu1 %v2954_v15, %s3101_s15  ;;  %v4303_v45 = vld [vmem:[#allocation4_spill] sm:$0xff]  ;;  %v4304_v57 = vld [vmem:[#allocation3_spill] sm:$0xff] }
 0x16b   : > { %v1279_v36 = vsel %vm1235_vm5, %v3480_v63, %v2862_v42  ;;  %v1281_v0 = vsel %vm1235_vm5, %v4301_v58, %v2873_v52  ;;  %v1259_v1 = vsel %vm1235_vm5, %v4302_v59, %v2872_v23  ;;  %3020 = vrot.lane.b32.xlu0 %v3019_v61, %s3102_s22  ;;  %v3991_v49 = vsel %vm1284_vm6, %v1254_v31, %v2882_v39  ;;  %v4306_v15 = vld [vmem:[#allocation8_spill] sm:$0xff] }
 0x16c   : > { %v2876_v6 = vpop.permute.xlu1 %2875  ;;  %v3994_v34 = vsel %vm1284_vm6, %v1255_v10, %v2883_v37  ;;  %v3997_v22 = vsel %vm1284_vm6, %v1279_v36, %v2892_v5  ;;  %v4000_v63 = vsel %vm1284_vm6, %v1280_v27, %v2893_v35  ;;  %v1278_v18 = vsel %vm1235_vm5, %v4303_v45, %v2858_v3  ;;  %v2901_v42 = vpop.permute.xlu0 %2900  ;;  %v4305_v35 = vld [vmem:[#allocation9_spill] sm:$0xff] }
 0x16d   : > { %v2868_v11 = vunpack.i.h.bf16 %v2866_v62  ;;  %v2959_v47 = vpack.i.bf16 %v1623_v44, %v1621_v54  ;;  %v3024_v29 = vpack.i.bf16 %v1588_v12, %v1586_v16  ;;  %v1256_v31 = vsel %vm1235_vm5, %v4304_v57, %v2857_v38 }
 0x16e   : > { %v2867_v26 = vunpack.i.l.bf16 %v2866_v62  ;;  %v1626_v10 = vsel %vm1558_vm8, %v1624_v7, %v1625_v30  ;;  %v1628_v50 = vsel %vm1558_vm8, %v1625_v30, %v1627_v56  ;;  %v1412_v53 = vrot.slane %v3991_v49, 1 }
 0x16f   : > { %v1413_v27 = vrot.slane %v3994_v34, 1  ;;  %v1453_v52 = vrot.slane %v3997_v22, 1  ;;  %v1455_v23 = vrot.slane %v4000_v63, 1  ;;  %2960 = vrot.lane.b32.xlu1 %v2959_v47, %s3102_s22  ;;  %3025 = vrot.lane.b32.xlu0 %v3024_v29, %s3102_s22  ;;  %v2903_v17 = vunpack.i.h.bf16 %v2901_v42 }
 0x170   : > { %v2886_v44 = vpop.permute.xlu1 %2885  ;;  %v2902_v54 = vunpack.i.l.bf16 %v2901_v42  ;;  %v1589_v39 = vrot.slane %v3991_v49, 2  ;;  %v1258_v5 = vsel %vm1235_vm5, %v4305_v35, %v2868_v11  ;;  %v2964_v30 = vpack.i.bf16 %v1628_v50, %v1626_v10 }
 0x171   : > { %v2888_v62 = vunpack.i.h.bf16 %v2886_v44  ;;  %v2887_v37 = vunpack.i.l.bf16 %v2886_v44  ;;  %v1911_v3 = vsel %vm1909_vm9, %v3758_v24, 0  ;;  %v1257_v61 = vsel %vm1235_vm5, %v4306_v15, %v2867_v26  ;;  %v4307_v44 = vld [vmem:[#allocation11_spill] sm:$0xff] }
 0x172   : > { %v2878_v56 = vunpack.i.h.bf16 %v2876_v6  ;;  %2594 = vmatpush3.bf16.msra.mxu0 %v1911_v3  ;;  %2636 = vmatpush3.bf16.msra.mxu1 %v1911_v3  ;;  %v2877_v12 = vunpack.i.l.bf16 %v2876_v6  ;;  %v1456_v24 = vsel %vm1381_vm7, %v1453_v52, %v1455_v23  ;;  %v1308_v59 = vsel %vm1284_vm6, %v1259_v1, %v2902_v54 }
 0x173   : > { %v1305_v38 = vsel %vm1284_vm6, %v1256_v31, %v2887_v37  ;;  %v4023_v16 = vsel %vm1284_vm6, %v1278_v18, %v2888_v62  ;;  %2965 = vrot.lane.b32.xlu1 %v2964_v30, %s3102_s22  ;;  %v4030_v45 = vsel %vm1284_vm6, %v1281_v0, %v2903_v17  ;;  %v1414_v6 = vsel %vm1381_vm7, %v1412_v53, %v1413_v27 }
 0x174   : > { %v1415_v7 = vrot.slane %v1305_v38, 1  ;;  %v1452_v36 = vrot.slane %v4023_v16, 1  ;;  %v2896_v58 = vpop.permute.xlu1 %2895  ;;  %v1592_v18 = vrot.slane %v1305_v38, 2  ;;  %v1590_v0 = vrot.slane %v3994_v34, 2 }
 0x175   : > { %v2898_v11 = vunpack.i.h.bf16 %v2896_v58  ;;  %v2897_v42 = vunpack.i.l.bf16 %v2896_v58  ;;  %v1420_v10 = vrot.slane %v1308_v59, 1  ;;  %v1283_v53 = vsel %vm1235_vm5, %v4307_v44, %v2878_v56 }
 0x176   : > { %v1454_v47 = vsel %vm1381_vm7, %v1452_v36, %v1453_v52  ;;  %v1416_v29 = vsel %vm1381_vm7, %v1413_v27, %v1415_v7  ;;  %v4308_v27 = vld [vmem:[#allocation10_spill] sm:$0xff]  ;;  %v1457_v37 = vrot.slane %v4030_v45, 1  ;;  %v1629_v35 = vrot.slane %v4023_v16, 2 }
 0x177   : > { %v4036_v57 = vsel %vm1284_vm6, %v1257_v61, %v2897_v42  ;;  %v4039_v31 = vsel %vm1284_vm6, %v1258_v5, %v2898_v11  ;;  %v3034_v26 = vpack.i.bf16 %v1456_v24, %v1454_v47  ;;  %v3029_v1 = vpack.i.bf16 %v1416_v29, %v1414_v6 }
 0x178   : > { %v1417_v50 = vrot.slane %v4036_v57, 1  ;;  %v1418_v23 = vrot.slane %v4039_v31, 1  ;;  %v2906_v52 = vpop.permute.xlu1 %2905  ;;  %v1282_v17 = vsel %vm1235_vm5, %v4308_v27, %v2877_v12  ;;  %v1593_v56 = vsel %vm1558_vm8, %v1590_v0, %v1592_v18 }
 0x179   : > { %v2908_v54 = vunpack.i.h.bf16 %v2906_v52  ;;  %v2907_v62 = vunpack.i.l.bf16 %v2906_v52  ;;  %3035 = vrot.lane.b32.xlu1 %v3034_v26, %s3101_s15  ;;  %3030 = vrot.lane.b32.xlu0 %v3029_v1, %s3101_s15  ;;  %v1594_v38 = vrot.slane %v4036_v57, 2  ;;  %v1595_v12 = vrot.slane %v4039_v31, 2 }
 0x17a   : > { %v1419_v5 = vsel %vm1381_vm7, %v1417_v50, %v1418_v23  ;;  %v1421_v30 = vsel %vm1381_vm7, %v1418_v23, %v1420_v10  ;;  %v1630_v58 = vrot.slane %v3997_v22, 2  ;;  %v1632_v24 = vrot.slane %v4000_v63, 2 }
 0x17b   : > { %v4055_v3 = vsel %vm1284_vm6, %v1282_v17, %v2907_v62  ;;  %v1332_v15 = vsel %vm1284_vm6, %v1283_v53, %v2908_v54  ;;  %v3039_v61 = vpack.i.bf16 %v1421_v30, %v1419_v5  ;;  %v1597_v11 = vrot.slane %v1308_v59, 2 }
 0x17c   : > { %v1458_v7 = vrot.slane %v4055_v3, 1  ;;  %v1460_v36 = vrot.slane %v1332_v15, 1  ;;  %v1591_v18 = vsel %vm1558_vm8, %v1589_v39, %v1590_v0  ;;  %v1631_v26 = vsel %vm1558_vm8, %v1629_v35, %v1630_v58 }
 0x17d   : > { %3040 = vrot.lane.b32.xlu0 %v3039_v61, %s3101_s15  ;;  %v3049_v29 = vpack.i.bf16 %v1593_v56, %v1591_v18  ;;  %v1635_v1 = vrot.slane %v4055_v3, 2  ;;  %v1637_v10 = vrot.slane %v1332_v15, 2  ;;  %v1596_v50 = vsel %vm1558_vm8, %v1594_v38, %v1595_v12  ;;  %v4309_v38 = vld [vmem:[#allocation12_spill] sm:$0xff] }
 0x17e   : > { %v1459_v42 = vsel %vm1381_vm7, %v1457_v37, %v1458_v7  ;;  %v1461_v47 = vsel %vm1381_vm7, %v1458_v7, %v1460_v36  ;;  %v1598_v63 = vsel %vm1558_vm8, %v1595_v12, %v1597_v11  ;;  %v1634_v59 = vrot.slane %v4030_v45, 2 }
 0x17f   : > { %v3044_v6 = vpack.i.bf16 %v1461_v47, %v1459_v42  ;;  %v1633_v23 = vsel %vm1558_vm8, %v1630_v58, %v1632_v24  ;;  %v3059_v0 = vpack.i.bf16 %v1598_v63, %v1596_v50  ;;  %v1638_v44 = vsel %vm1558_vm8, %v1635_v1, %v1637_v10  ;;  %v4310_v50 = vld [vmem:[#allocation13_spill] sm:$0xff] }
 0x180   : > { %v3054_v39 = vpack.i.bf16 %v1633_v23, %v1631_v26  ;;  %v1636_v52 = vsel %vm1558_vm8, %v1634_v59, %v1635_v1 }
 0x181   : > { %3045 = vrot.lane.b32.xlu1 %v3044_v6, %s3101_s15  ;;  %3050 = vrot.lane.b32.xlu0 %v3049_v29, %s3102_s22  ;;  %v3064_v53 = vpack.i.bf16 %v1638_v44, %v1636_v52 }
 0x185   : > { %3055 = vrot.lane.b32.xlu1 %v3054_v39, %s3102_s22  ;;  %3060 = vrot.lane.b32.xlu0 %v3059_v0, %s3102_s22 }
 0x189   : > { %3065 = vrot.lane.b32.xlu1 %v3064_v53, %s3102_s22 }
 0x1a9   : > { %v2911_v27 = vpop.permute.xlu1 %2910  ;;  %v2971_v17 = vpop.permute.xlu0 %2970 }
 0x1aa   : > { %v2912_v54 = vunpack.i.l.bf16 %v2911_v27  ;;  %v2973_v62 = vunpack.i.h.bf16 %v2971_v17  ;;  %v2972_v37 = vunpack.i.l.bf16 %v2971_v17  ;;  %v2913_v30 = vunpack.i.h.bf16 %v2911_v27 }
 0x1ac   : > { %v1736_v12 = vsel %vm1735_vm10, %v4309_v38, %v2972_v37  ;;  %v1737_v7 = vsel %vm1735_vm10, %v3594_v28, %v2973_v62  ;;  %v1752_v36 = vsel %vm1735_vm10, %v3645_v55, %v2912_v54  ;;  %v1753_v29 = vsel %vm1735_vm10, %v3583_v33, %v2913_v30  ;;  %v4311_v33 = vld [vmem:[#allocation14_spill] sm:$0xff] }
 0x1ad   : > { %v2916_v35 = vpop.permute.xlu1 %2915  ;;  %v2976_v5 = vpop.permute.xlu0 %2975 }
 0x1ae   : > { %v2918_v15 = vunpack.i.h.bf16 %v2916_v35  ;;  %v2917_v47 = vunpack.i.l.bf16 %v2916_v35  ;;  %v2978_v18 = vunpack.i.h.bf16 %v2976_v5  ;;  %v2977_v6 = vunpack.i.l.bf16 %v2976_v5 }
 0x1b0   : > { %v1755_v55 = vsel %vm1735_vm10, %v4310_v50, %v2918_v15  ;;  %v1754_v27 = vsel %vm1735_vm10, %v4311_v33, %v2917_v47  ;;  %v1739_v17 = vsel %vm1735_vm10, %v3677_v32, %v2978_v18  ;;  %v1738_v54 = vsel %vm1735_vm10, %v3674_v40, %v2977_v6 }
 0x1b1   : > { %v2921_v61 = vpop.permute.xlu1 %2920  ;;  %v2981_v56 = vpop.permute.xlu0 %2980 }
 0x1b2   : > { %v2923_v58 = vunpack.i.h.bf16 %v2921_v61  ;;  %v2922_v24 = vunpack.i.l.bf16 %v2921_v61  ;;  %v2983_v11 = vunpack.i.h.bf16 %v2981_v56  ;;  %v2982_v42 = vunpack.i.l.bf16 %v2981_v56 }
 0x1b4   : > { %v1769_v26 = vsel %vm1768_vm11, %v1736_v12, %v2982_v42  ;;  %v1770_v1 = vsel %vm1768_vm11, %v1737_v7, %v2983_v11  ;;  %v1785_v10 = vsel %vm1768_vm11, %v1752_v36, %v2922_v24  ;;  %v1786_v28 = vsel %vm1768_vm11, %v1753_v29, %v2923_v58 }
 0x1b5   : > { %v2926_v63 = vpop.permute.xlu1 %2925  ;;  %v2986_v59 = vpop.permute.xlu0 %2985  ;;  %v1801_v23 = vpack.c.bf16 %v1770_v1, %v1769_v26  ;;  %v1809_v39 = vpack.c.bf16 %v1786_v28, %v1785_v10 }
 0x1b6   : > { %v2928_v0 = vunpack.i.h.bf16 %v2926_v63  ;;  %v2927_v52 = vunpack.i.l.bf16 %v2926_v63  ;;  %v2988_v44 = vunpack.i.h.bf16 %v2986_v59  ;;  %v2987_v53 = vunpack.i.l.bf16 %v2986_v59 }
 0x1b7   : > { %2595 = vmatprep.mubr.msk.bf16.mxu0 %vm1860_vm12, %v1801_v23  ;;  %2611 = vmatprep.mubr.msk.bf16.mxu1 %vm1860_vm12, %v1809_v39 }
 0x1b8   : > { %v1787_v62 = vsel %vm1768_vm11, %v1754_v27, %v2927_v52  ;;  %v1788_v37 = vsel %vm1768_vm11, %v1755_v55, %v2928_v0  ;;  %v1771_v35 = vsel %vm1768_vm11, %v1738_v54, %v2987_v53  ;;  %v1772_v5 = vsel %vm1768_vm11, %v1739_v17, %v2988_v44 }
 0x1b9   : > { %v1810_v30 = vpack.c.bf16 %v1788_v37, %v1787_v62  ;;  %v1802_v15 = vpack.c.bf16 %v1772_v5, %v1771_v35 }
 0x1bb   : > { %2596 = vmatmul.mubr.msk.bf16.vlgmr.msra.gmra.mrb[0].mxu0 %vm1860_vm12, %v1802_v15  ;;  %2612 = vmatmul.mubr.msk.bf16.vlgmr.msra.gmra.mrb[0].mxu1 %vm1860_vm12, %v1810_v30 }
 0x1bc   : > { %v2931_v40 = vpop.permute.xlu1 %2930 }
 0x1bd   : > { %v2991_v32 = vpop.permute.xlu0 %2990  ;;  %v2933_v12 = vunpack.i.h.bf16 %v2931_v40  ;;  %v2932_v7 = vunpack.i.l.bf16 %v2931_v40 }
 0x1be   : > { %v2993_v56 = vunpack.i.h.bf16 %v2991_v32  ;;  %v2992_v38 = vunpack.i.l.bf16 %v2991_v32 }
 0x1bf   : > { %v1757_v1 = vsel %vm1735_vm10, %v3746_v14, %v2933_v12  ;;  %v1756_v10 = vsel %vm1735_vm10, %v3777_v48, %v2932_v7 }
 0x1c0   : > { %v1741_v42 = vsel %vm1735_vm10, %v3742_v51, %v2993_v56  ;;  %v1740_v47 = vsel %vm1735_vm10, %v3721_v43, %v2992_v38 }
 0x1c1   : > { %v2996_v61 = vpop.permute.xlu0 %2995 }
 0x1c2   : > { %v2998_v18 = vunpack.i.h.bf16 %v2996_v61  ;;  %v2997_v6 = vunpack.i.l.bf16 %v2996_v61 }
 0x1c4   : > { %v1743_v43 = vsel %vm1735_vm10, %v3806_v8, %v2998_v18  ;;  %v1742_v39 = vsel %vm1735_vm10, %v3803_v25, %v2997_v6 }
 0x1c5   : > { %v2936_v36 = vpop.permute.xlu1 %2935  ;;  %v3001_v58 = vpop.permute.xlu0 %3000 }
 0x1c6   : > { %v3003_v24 = vunpack.i.h.bf16 %v3001_v58  ;;  %v3002_v11 = vunpack.i.l.bf16 %v3001_v58  ;;  %v2938_v0 = vunpack.i.h.bf16 %v2936_v36  ;;  %v2937_v52 = vunpack.i.l.bf16 %v2936_v36 }
 0x1c8   : > { %v1773_v29 = vsel %vm1768_vm11, %v1740_v47, %v3002_v11  ;;  %v1774_v26 = vsel %vm1768_vm11, %v1741_v42, %v3003_v24  ;;  %v1759_v25 = vsel %vm1735_vm10, %v3822_v20, %v2938_v0  ;;  %v1758_v62 = vsel %vm1735_vm10, %v3812_v41, %v2937_v52 }
 0x1c9   : > { %v1803_v28 = vpack.c.bf16 %v1774_v26, %v1773_v29  ;;  %v2941_v50 = vpop.permute.xlu1 %2940  ;;  %v3006_v55 = vpop.permute.xlu0 %3005 }
 0x1ca   : > { %v2943_v63 = vunpack.i.h.bf16 %v2941_v50  ;;  %v2942_v51 = vunpack.i.l.bf16 %v2941_v50  ;;  %v3008_v59 = vunpack.i.h.bf16 %v3006_v55  ;;  %v3007_v23 = vunpack.i.l.bf16 %v3006_v55 }
 0x1cb   : > { %2599 = vmatprep.mubr.msk.bf16.mxu0 %vm1860_vm12, %v1803_v28 }
 0x1cc   : > { %v1789_v14 = vsel %vm1768_vm11, %v1756_v10, %v2942_v51  ;;  %v1790_v48 = vsel %vm1768_vm11, %v1757_v1, %v2943_v63  ;;  %v1775_v44 = vsel %vm1768_vm11, %v1742_v39, %v3007_v23  ;;  %v1776_v53 = vsel %vm1768_vm11, %v1743_v43, %v3008_v59 }
 0x1cd   : > { %v1811_v33 = vpack.c.bf16 %v1790_v48, %v1789_v14  ;;  %v1804_v27 = vpack.c.bf16 %v1776_v53, %v1775_v44  ;;  %v2946_v17 = vpop.permute.xlu1 %2945 }
 0x1ce   : > { %v2948_v54 = vunpack.i.h.bf16 %v2946_v17  ;;  %v2947_v8 = vunpack.i.l.bf16 %v2946_v17 }
 0x1cf   : > { %2600 = vmatmul.mubr.msk.bf16.gmra.mrb[4].mxu0 %vm1860_vm12, %v1804_v27  ;;  %2615 = vmatprep.mubr.msk.bf16.mxu1 %vm1860_vm12, %v1811_v33 }
 0x1d0   : > { %v1791_v37 = vsel %vm1768_vm11, %v1758_v62, %v2947_v8  ;;  %v1792_v35 = vsel %vm1768_vm11, %v1759_v25, %v2948_v54 }
 0x1d1   : > { %v1812_v5 = vpack.c.bf16 %v1792_v35, %v1791_v37 }
 0x1d3   : > { %2616 = vmatmul.mubr.msk.bf16.gmra.mrb[4].mxu1 %vm1860_vm12, %v1812_v5 }
 0x1d4   : > { %v2951_v15 = vpop.permute.xlu1 %2950 }
 0x1d5   : > { %v3011_v30 = vpop.permute.xlu0 %3010  ;;  %v2953_v20 = vunpack.i.h.bf16 %v2951_v15  ;;  %v2952_v56 = vunpack.i.l.bf16 %v2951_v15 }
 0x1d6   : > { %v3013_v40 = vunpack.i.h.bf16 %v3011_v30  ;;  %v3012_v61 = vunpack.i.l.bf16 %v3011_v30 }
 0x1d7   : > { %v1761_v18 = vsel %vm1735_vm10, %v3881_v21, %v2953_v20  ;;  %v1760_v6 = vsel %vm1735_vm10, %v3904_v13, %v2952_v56 }
 0x1d8   : > { %v1745_v36 = vsel %vm1735_vm10, %v3878_v2, %v3013_v40  ;;  %v1744_v58 = vsel %vm1735_vm10, %v3860_v46, %v3012_v61 }
 0x1d9   : > { %v3016_v32 = vpop.permute.xlu0 %3015 }
 0x1da   : > { %v3018_v24 = vunpack.i.h.bf16 %v3016_v32  ;;  %v3017_v11 = vunpack.i.l.bf16 %v3016_v32 }
 0x1dc   : > { %v2956_v38 = vpop.permute.xlu1 %2955  ;;  %v1747_v46 = vsel %vm1735_vm10, %v3929_v4, %v3018_v24  ;;  %v1746_v55 = vsel %vm1735_vm10, %v3926_v9, %v3017_v11 }
 0x1dd   : > { %v3021_v41 = vpop.permute.xlu0 %3020  ;;  %v2958_v63 = vunpack.i.h.bf16 %v2956_v38  ;;  %v2957_v51 = vunpack.i.l.bf16 %v2956_v38 }
 0x1de   : > { %v3023_v12 = vunpack.i.h.bf16 %v3021_v41  ;;  %v3022_v7 = vunpack.i.l.bf16 %v3021_v41 }
 0x1df   : > { %v1763_v9 = vsel %vm1735_vm10, %v3941_v19, %v2958_v63  ;;  %v1762_v14 = vsel %vm1735_vm10, %v3917_v60, %v2957_v51 }
 0x1e0   : > { %v1777_v42 = vsel %vm1768_vm11, %v1744_v58, %v3022_v7  ;;  %v1778_v47 = vsel %vm1768_vm11, %v1745_v36, %v3023_v12 }
 0x1e1   : > { %v1805_v29 = vpack.c.bf16 %v1778_v47, %v1777_v42  ;;  %v2961_v26 = vpop.permute.xlu1 %2960  ;;  %v3026_v1 = vpop.permute.xlu0 %3025 }
 0x1e2   : > { %v2963_v10 = vunpack.i.h.bf16 %v2961_v26  ;;  %v2962_v2 = vunpack.i.l.bf16 %v2961_v26  ;;  %v3028_v28 = vunpack.i.h.bf16 %v3026_v1  ;;  %v3027_v50 = vunpack.i.l.bf16 %v3026_v1 }
 0x1e3   : > { %2603 = vmatprep.mubr.msk.bf16.mxu0 %vm1860_vm12, %v1805_v29 }
 0x1e4   : > { %v1793_v21 = vsel %vm1768_vm11, %v1760_v6, %v2962_v2  ;;  %v1794_v13 = vsel %vm1768_vm11, %v1761_v18, %v2963_v10  ;;  %v1779_v59 = vsel %vm1768_vm11, %v1746_v55, %v3027_v50  ;;  %v1780_v23 = vsel %vm1768_vm11, %v1747_v46, %v3028_v28  ;;  %v4196_v55 = vld [vmem:[%s4263_s2] ss:$0 sm:$0xff] }
 0x1e5   : > { %v1813_v43 = vpack.c.bf16 %v1794_v13, %v1793_v21  ;;  %v1806_v39 = vpack.c.bf16 %v1780_v23, %v1779_v59  ;;  %v2966_v0 = vpop.permute.xlu1 %2965 }
 0x1e6   : > { %v2968_v52 = vunpack.i.h.bf16 %v2966_v0  ;;  %v2967_v4 = vunpack.i.l.bf16 %v2966_v0 }
 0x1e7   : > { %2604 = vmatmul.mubr.msk.bf16.gmra.mrb[8].mxu0 %vm1860_vm12, %v1806_v39  ;;  %2619 = vmatprep.mubr.msk.bf16.mxu1 %vm1860_vm12, %v1813_v43 }
 0x1e8   : > { %v1795_v48 = vsel %vm1768_vm11, %v1762_v14, %v2967_v4  ;;  %v1796_v44 = vsel %vm1768_vm11, %v1763_v9, %v2968_v52 }
 0x1e9   : > { %v1814_v53 = vpack.c.bf16 %v1796_v44, %v1795_v48 }
 0x1eb   : > { %v3031_v33 = vpop.permute.xlu0 %3030  ;;  %2620 = vmatmul.mubr.msk.bf16.gmra.mrb[8].mxu1 %vm1860_vm12, %v1814_v53  ;;  %v3036_v27 = vpop.permute.xlu1 %3035 }
 0x1ec   : > { %v3033_v54 = vunpack.i.h.bf16 %v3031_v33  ;;  %v3032_v8 = vunpack.i.l.bf16 %v3031_v33  ;;  %v3038_v19 = vunpack.i.h.bf16 %v3036_v27  ;;  %v3037_v25 = vunpack.i.l.bf16 %v3036_v27 }
 0x1ee   : > { %v1749_v5 = vsel %vm1735_vm10, %v3994_v34, %v3033_v54  ;;  %v1748_v30 = vsel %vm1735_vm10, %v3991_v49, %v3032_v8  ;;  %v1765_v20 = vsel %vm1735_vm10, %v3997_v22, %v3038_v19  ;;  %v1764_v56 = vsel %vm1735_vm10, %v4023_v16, %v3037_v25 }
 0x1ef   : > { %v3041_v17 = vpop.permute.xlu0 %3040 }
 0x1f0   : > { %v3043_v15 = vunpack.i.h.bf16 %v3041_v17  ;;  %v3042_v32 = vunpack.i.l.bf16 %v3041_v17 }
 0x1f2   : > { %v1751_v49 = vsel %vm1735_vm10, %v4039_v31, %v3043_v15  ;;  %v1750_v24 = vsel %vm1735_vm10, %v4036_v57, %v3042_v32 }
 0x1f3   : > { %v3046_v62 = vpop.permute.xlu1 %3045  ;;  %v3051_v60 = vpop.permute.xlu0 %3050 }
 0x1f4   : > { %v3053_v37 = vunpack.i.h.bf16 %v3051_v60  ;;  %v3052_v35 = vunpack.i.l.bf16 %v3051_v60  ;;  %v3048_v11 = vunpack.i.h.bf16 %v3046_v62  ;;  %v3047_v42 = vunpack.i.l.bf16 %v3046_v62 }
 0x1f6   : > { %v1781_v40 = vsel %vm1768_vm11, %v1748_v30, %v3052_v35  ;;  %v1782_v61 = vsel %vm1768_vm11, %v1749_v5, %v3053_v37  ;;  %v1767_v57 = vsel %vm1735_vm10, %v4055_v3, %v3048_v11  ;;  %v1766_v10 = vsel %vm1735_vm10, %v4030_v45, %v3047_v42 }
 0x1f7   : > { %v1807_v38 = vpack.c.bf16 %v1782_v61, %v1781_v40  ;;  %v3056_v41 = vpop.permute.xlu1 %3055  ;;  %v3061_v12 = vpop.permute.xlu0 %3060 }
 0x1f8   : > { %v3058_v7 = vunpack.i.h.bf16 %v3056_v41  ;;  %v3057_v34 = vunpack.i.l.bf16 %v3056_v41  ;;  %v3063_v36 = vunpack.i.h.bf16 %v3061_v12  ;;  %v3062_v58 = vunpack.i.l.bf16 %v3061_v12 }
 0x1f9   : > { %2607 = vmatprep.mubr.msk.bf16.mxu0 %vm1860_vm12, %v1807_v38 }
 0x1fa   : > { %v1797_v22 = vsel %vm1768_vm11, %v1764_v56, %v3057_v34  ;;  %v1798_v16 = vsel %vm1768_vm11, %v1765_v20, %v3058_v7  ;;  %v1783_v47 = vsel %vm1768_vm11, %v1750_v24, %v3062_v58  ;;  %v1784_v18 = vsel %vm1768_vm11, %v1751_v49, %v3063_v36 }
 0x1fb   : > { %v1815_v6 = vpack.c.bf16 %v1798_v16, %v1797_v22  ;;  %v1808_v29 = vpack.c.bf16 %v1784_v18, %v1783_v47  ;;  %v3066_v26 = vpop.permute.xlu1 %3065 }
 0x1fc   : > { %v3068_v31 = vunpack.i.h.bf16 %v3066_v26  ;;  %v3067_v1 = vunpack.i.l.bf16 %v3066_v26 }
 0x1fd   : > { %2608 = vmatmul.mubr.msk.bf16.gmra.mrb[12].mxu0 %vm1860_vm12, %v1808_v29  ;;  %2623 = vmatprep.mubr.msk.bf16.mxu1 %vm1860_vm12, %v1815_v6 }
 0x1fe   : > { %v1799_v2 = vsel %vm1768_vm11, %v1766_v10, %v3067_v1  ;;  %v1800_v28 = vsel %vm1768_vm11, %v1767_v57, %v3068_v31 }
 0x1ff   : > { %v1816_v50 = vpack.c.bf16 %v1800_v28, %v1799_v2 }
 0x201   : > { %2624 = vmatmul.mubr.msk.bf16.gmra.mrb[12].mxu1 %vm1860_vm12, %v1816_v50 }
 0x28e   : > { %v2597_v46 = vpop.f32.mrb[0].mxu0  ;;  %v2613_v3 = vpop.f32.mrb[0].mxu1 }
 0x28f   : > { %v1947_v63 = vpop.f32.mrb[1].mxu0  ;;  %v2011_v45 = vpop.f32.mrb[1].mxu1  ;;  %v1956_v13 = vadd.f32 %v2597_v46, %v4196_v55  ;;  %v2020_v59 = vadd.f32 %v2613_v3, %v4196_v55 }
 0x290   : > { %v2598_v51 = vpop.f32.mrb[2].mxu0  ;;  %v2614_v21 = vpop.f32.mrb[2].mxu1  ;;  %v1948_v52 = vadd.f32 %v4196_v55, %v1947_v63  ;;  %v2012_v4 = vadd.f32 %v4196_v55, %v2011_v45 }
 0x291   : > { %v1959_v23 = vadd.f32 %v2598_v51, %v4196_v55  ;;  %v2023_v43 = vadd.f32 %v2614_v21, %v4196_v55  ;;  %v1950_v39 = vpop.f32.mrb[3].mxu0  ;;  %v2014_v0 = vpop.f32.mrb[3].mxu1 }
 0x292   : > { %v1951_v9 = vadd.f32 %v4196_v55, %v1950_v39  ;;  %v2015_v14 = vadd.f32 %v4196_v55, %v2014_v0 }
 0x293   : > { %v2469_v48 = vpack.c.bf16 %v1959_v23, %v1956_v13  ;;  %v2509_v44 = vpack.c.bf16 %v2023_v43, %v2020_v59 }
 0x294   : > { %v2464_v53 = vpack.c.bf16 %v1951_v9, %v1948_v52  ;;  %v2504_v33 = vpack.c.bf16 %v2015_v14, %v2012_v4 }
 0x295   : > { %2549 = vst [vmem:[%s4208_s18 + $0x8] sm:$0xff] %v2469_v48   ;;  %2557 = vst [vmem:[%s4208_s18 + $0x48] sm:$0xff] %v2509_v44  }
 0x296   : > { %2465 = vst [vmem:[%s4208_s18] sm:$0xff] %v2464_v53   ;;  %2556 = vst [vmem:[%s4208_s18 + $0x40] sm:$0xff] %v2504_v33  }
 0x2a2   : > { %v2601_v27 = vpop.f32.mrb[4].mxu0 }
 0x2a3   : > { %v1963_v17 = vpop.f32.mrb[5].mxu0  ;;  %v1972_v8 = vadd.f32 %v2601_v27, %v4196_v55 }
 0x2a4   : > { %v2602_v54 = vpop.f32.mrb[6].mxu0  ;;  %v1964_v62 = vadd.f32 %v4196_v55, %v1963_v17 }
 0x2a5   : > { %v1975_v19 = vadd.f32 %v2602_v54, %v4196_v55  ;;  %v1966_v25 = vpop.f32.mrb[7].mxu0 }
 0x2a6   : > { %v1967_v60 = vadd.f32 %v4196_v55, %v1966_v25  ;;  %v2617_v37 = vpop.f32.mrb[4].mxu1 }
 0x2a7   : > { %v2479_v35 = vpack.c.bf16 %v1975_v19, %v1972_v8  ;;  %v2027_v5 = vpop.f32.mrb[5].mxu1  ;;  %v2036_v32 = vadd.f32 %v2617_v37, %v4196_v55 }
 0x2a8   : > { %v2474_v30 = vpack.c.bf16 %v1967_v60, %v1964_v62  ;;  %v2618_v15 = vpop.f32.mrb[6].mxu1  ;;  %v2028_v20 = vadd.f32 %v4196_v55, %v2027_v5 }
 0x2a9   : > { %2551 = vst [vmem:[%s4208_s18 + $0x18] sm:$0xff] %v2479_v35   ;;  %v2039_v40 = vadd.f32 %v2618_v15, %v4196_v55  ;;  %v2030_v61 = vpop.f32.mrb[7].mxu1 }
 0x2aa   : > { %2550 = vst [vmem:[%s4208_s18 + $0x10] sm:$0xff] %v2474_v30   ;;  %v2031_v56 = vadd.f32 %v4196_v55, %v2030_v61 }
 0x2ab   : > { %v2519_v38 = vpack.c.bf16 %v2039_v40, %v2036_v32 }
 0x2ac   : > { %v2514_v41 = vpack.c.bf16 %v2031_v56, %v2028_v20 }
 0x2ad   : > { %2559 = vst [vmem:[%s4208_s18 + $0x58] sm:$0xff] %v2519_v38  }
 0x2ae   : > { %2558 = vst [vmem:[%s4208_s18 + $0x50] sm:$0xff] %v2514_v41  }
 0x2ba   : > { %v2605_v12 = vpop.f32.mrb[8].mxu0 }
 0x2bb   : > { %v1979_v7 = vpop.f32.mrb[9].mxu0  ;;  %v1988_v36 = vadd.f32 %v2605_v12, %v4196_v55 }
 0x2bc   : > { %v2606_v34 = vpop.f32.mrb[10].mxu0  ;;  %v1980_v24 = vadd.f32 %v4196_v55, %v1979_v7 }
 0x2bd   : > { %v1991_v58 = vadd.f32 %v2606_v34, %v4196_v55  ;;  %v1982_v49 = vpop.f32.mrb[11].mxu0 }
 0x2be   : > { %v1983_v11 = vadd.f32 %v4196_v55, %v1982_v49  ;;  %v2621_v42 = vpop.f32.mrb[8].mxu1 }
 0x2bf   : > { %v2489_v22 = vpack.c.bf16 %v1991_v58, %v1988_v36  ;;  %v2043_v16 = vpop.f32.mrb[9].mxu1  ;;  %v2052_v6 = vadd.f32 %v2621_v42, %v4196_v55 }
 0x2c0   : > { %v2484_v47 = vpack.c.bf16 %v1983_v11, %v1980_v24  ;;  %v2622_v18 = vpop.f32.mrb[10].mxu1  ;;  %v2044_v31 = vadd.f32 %v4196_v55, %v2043_v16 }
 0x2c1   : > { %2553 = vst [vmem:[%s4208_s18 + $0x28] sm:$0xff] %v2489_v22   ;;  %v2055_v29 = vadd.f32 %v2622_v18, %v4196_v55  ;;  %v2046_v26 = vpop.f32.mrb[11].mxu1 }
 0x2c2   : > { %2552 = vst [vmem:[%s4208_s18 + $0x20] sm:$0xff] %v2484_v47   ;;  %v2047_v1 = vadd.f32 %v4196_v55, %v2046_v26 }
 0x2c3   : > { %v2529_v57 = vpack.c.bf16 %v2055_v29, %v2052_v6 }
 0x2c4   : > { %v2524_v10 = vpack.c.bf16 %v2047_v1, %v2044_v31 }
 0x2c5   : > { %2561 = vst [vmem:[%s4208_s18 + $0x68] sm:$0xff] %v2529_v57  }
 0x2c6   : > { %2560 = vst [vmem:[%s4208_s18 + $0x60] sm:$0xff] %v2524_v10  }
 0x2d0   : > { %v2609_v2 = vpop.f32.mrb[12].mxu0 }
 0x2d1   : > { %v1995_v28 = vpop.f32.mrb[13].mxu0  ;;  %v2004_v46 = vadd.f32 %v2609_v2, %v4196_v55 }
 0x2d2   : > { %v2610_v50 = vpop.f32.mrb[14].mxu0  ;;  %v1996_v45 = vadd.f32 %v4196_v55, %v1995_v28 }
 0x2d3   : > { %v2007_v3 = vadd.f32 %v2610_v50, %v4196_v55  ;;  %v1998_v63 = vpop.f32.mrb[15].mxu0 }
 0x2d4   : > { %v1999_v51 = vadd.f32 %v4196_v55, %v1998_v63  ;;  %v2625_v21 = vpop.f32.mrb[12].mxu1 }
 0x2d5   : > { %v2499_v13 = vpack.c.bf16 %v2007_v3, %v2004_v46  ;;  %v2059_v59 = vpop.f32.mrb[13].mxu1  ;;  %v2068_v39 = vadd.f32 %v2625_v21, %v4196_v55 }
 0x2d6   : > { %v2494_v23 = vpack.c.bf16 %v1999_v51, %v1996_v45  ;;  %v2626_v43 = vpop.f32.mrb[14].mxu1  ;;  %v2060_v4 = vadd.f32 %v4196_v55, %v2059_v59 }
 0x2d7   : > { %2555 = vst [vmem:[%s4208_s18 + $0x38] sm:$0xff] %v2499_v13   ;;  %v2071_v0 = vadd.f32 %v2626_v43, %v4196_v55  ;;  %v2062_v52 = vpop.f32.mrb[15].mxu1 }
 0x2d8   : > { %2554 = vst [vmem:[%s4208_s18 + $0x30] sm:$0xff] %v2494_v23   ;;  %v2063_v9 = vadd.f32 %v4196_v55, %v2062_v52 }
 0x2d9   : > { %v2539_v14 = vpack.c.bf16 %v2071_v0, %v2068_v39 }
 0x2da   : > { %v2534_v48 = vpack.c.bf16 %v2063_v9, %v2060_v4 }
 0x2db   : > { %2563 = vst [vmem:[%s4208_s18 + $0x78] sm:$0xff] %v2539_v14  }
 0x2dc   : > { %2562 = vst [vmem:[%s4208_s18 + $0x70] sm:$0xff] %v2534_v48  }
 0x2dd PF: > { %s15_s20 = sadd.s32 1, %s3096_s20   ;;  %s4312_s18 = smov %s3092_s19 }
 0x2de   : > { %p12_p5 = scmp.ge.s32.totalorder %s15_s20, 4   ;;  %s4313_s19 = smov %s4315_s21 }
 0x2e0   :  { %14 = sbr.rel (!%p12_p5) target bundleno = 2 (0x2), region = 71 }

</bundles_post_ra>
